<compile_context>
chip_gen: v7x
topology: tpu7x:2x2x1
jax: 0.10.0
libtpu: 0.0.40
codegen_flags: <defaults>
</compile_context>

<pallas_src>
import functools

import jax
import jax.numpy as jnp
from jax.experimental import pallas as pl
from jax.experimental.pallas import tpu as pltpu


def _morph_consts(h, w, r):
    """Neighborhood matrix K[q, p] = 1 if flat pixel q is inside the
    (2r+1)x(2r+1) window centered at flat pixel p, plus per-pixel in-bounds
    neighbor counts (column sums). Built once, outside the kernel."""
    n = h * w
    qi = jax.lax.broadcasted_iota(jnp.int32, (n, n), 0)
    pi = jax.lax.broadcasted_iota(jnp.int32, (n, n), 1)
    qr, qc = qi // w, qi % w
    pr, pc = pi // w, pi % w
    k = (jnp.abs(qr - pr) <= r) & (jnp.abs(qc - pc) <= r)
    kf = k.astype(jnp.float32)
    return kf.astype(jnp.bfloat16), jnp.sum(kf, axis=0, keepdims=True)


def _vmem_limit_bytes(n):
    """VMEM request sized from the real working set and the chip's capacity."""
    # resident: 2x (n,n) bf16 neighborhood constants; transient: 2x (n,n) bf16
    # rank matrices, (256,n) bf16 Otsu indicator, assorted (1,n)/(256,1) f32.
    est = 4 * n * n * 2 + 4 * 256 * n * 2 + 64 * n * 4
    try:
        cap = int(getattr(pltpu.get_tpu_info(), "vmem_capacity_bytes",
                          64 * 1024 * 1024))
    except Exception:
        cap = 64 * 1024 * 1024            # conservative (v7x per-core VMEM)
    limit = int(min(max(2 * est + (8 << 20), 16 << 20), int(cap * 0.75)))
    return limit, est


def _seeder_kernel(cam_r_ref, cam_c_ref, pfg_r_ref, pfg_c_ref, pbg_r_ref,
                   pbg_c_ref, ker_ref, kdil_ref, ncnt_ref, out_ref, *,
                   n, min_, max_, nbr_bg, ksz, fg_erode_iter, ignore_idx):
    f32 = jnp.float32
    bf16 = jnp.bfloat16

    cam_row = cam_r_ref[0]          # (1, n) f32 CAM
    cam_col = cam_c_ref[0]          # (n, 1) f32 CAM (same values, column view)
    pfg_row = pfg_r_ref[0]          # (1, n) f32 FG sampling priorities
    pfg_col = pfg_c_ref[0]          # (n, 1)
    pbg_row = pbg_r_ref[0]          # (1, n) f32 BG sampling priorities
    pbg_col = pbg_c_ref[0]          # (n, 1)

    # ---- quantize (matches numpy uint8 cast) + bad-egg check ----------------
    cam_img = (cam_row * 255.0).astype(jnp.int32)                  # (1, n)
    cmin = jnp.min(cam_img, axis=1, keepdims=True)
    cmax = jnp.max(cam_img, axis=1, keepdims=True)
    bad_egg = cmin == cmax                                         # (1, 1)

    # ---- Otsu threshold: cumulative count / sum per bin on the MXU ----------
    kidx = jax.lax.broadcasted_iota(jnp.int32, (256, 1), 0)        # (256, 1)
    le = (cam_img <= kidx).astype(f32).astype(bf16)                # (256, n)
    cam_col_q = (cam_col * 255.0).astype(jnp.int32).astype(f32).astype(bf16)
    ones_col = jnp.ones((n, 1), bf16)
    w1 = jnp.dot(le, ones_col, preferred_element_type=f32)         # #pix <= k
    c1 = jnp.dot(le, cam_col_q, preferred_element_type=f32)        # sum pix <= k
    total_sum = c1[255:256, :]
    w2 = f32(n) - w1
    m1 = c1 / jnp.maximum(w1, 1.0)
    m2 = (total_sum - c1) / jnp.maximum(w2, 1.0)
    valid = (w1 > 0.5) & (w2 > 0.5)
    var = jnp.where(valid, w1 * w2 * (m1 - m2) ** 2, -1.0)
    maxv = jnp.max(var, axis=0, keepdims=True)
    thr = jnp.min(jnp.where(var == maxv, kidx, 256), axis=0, keepdims=True)
    thr = jnp.clip(thr, 1, 254)                                    # (1, 1) int32

    # ---- ROI + erosion_n (revert if the mask vanishes) -----------------------
    roi = (cam_img > thr).astype(f32)                              # (1, n)
    if fg_erode_iter > 0:
        k_er = ker_ref[...]                                        # (n, n) bf16
        ncnt = ncnt_ref[...]                                       # (1, n) f32
        cur = roi
        stopped = jnp.zeros((1, 1), jnp.bool_)
        for _ in range(fg_erode_iter):
            s = jnp.dot(cur.astype(bf16), k_er, preferred_element_type=f32)
            nxt = (s >= ncnt - 0.5).astype(f32)                    # OOB = fg
            is_zero = jnp.sum(nxt, axis=1, keepdims=True) < 0.5
            keep = stopped | is_zero
            cur = jnp.where(keep, cur, nxt)
            stopped = keep
        roi = cur

    # ---- FG: sample min(max_, n_fg) ROI pixels uniformly w/o replacement ----
    if max_ > 0:
        n_fg = jnp.sum(roi, axis=1, keepdims=True)
        k_fg = jnp.minimum(f32(max_), n_fg)
        less_fg = (pfg_col < pfg_row).astype(f32).astype(bf16)     # (n, n)
        rank_fg = jnp.dot(roi.astype(bf16), less_fg, preferred_element_type=f32)
        fg = roi * (rank_fg < k_fg).astype(f32)
    else:
        fg = jnp.zeros((1, n), f32)

    # ---- BG: nbr_bg lowest-CAM pixels (via the Otsu histogram), then sample --
    if nbr_bg > 0 and min_ > 0:
        # boundary bin: smallest t with count(cam_img <= t) >= nbr_bg
        t_bin = jnp.min(jnp.where(w1 >= f32(nbr_bg), kidx, 256),
                        axis=0, keepdims=True)                     # (1, 1) int32
        below = cam_img < t_bin
        inbin = cam_img == t_bin
        cnt_below = jnp.sum(below.astype(f32), axis=1, keepdims=True)
        rem = f32(nbr_bg) - cnt_below                              # >= 1
        # binary search the flat-index cutoff that admits exactly `rem`
        # boundary-bin pixels (flat-index order), O(n log n) instead of O(n^2).
        idx = jax.lax.broadcasted_iota(jnp.int32, (1, n), 1).astype(f32)
        inbin_f = inbin.astype(f32)
        lo = jnp.zeros((1, 1), f32)
        hi = jnp.full((1, 1), float(n - 1), f32)
        for _ in range(max(1, (n - 1).bit_length())):
            mid = jnp.floor((lo + hi) * 0.5)
            cnt = jnp.sum(inbin_f * (idx <= mid).astype(f32),
                          axis=1, keepdims=True)
            pred = cnt >= rem
            hi = jnp.where(pred, mid, hi)
            lo = jnp.where(pred, lo, mid + 1.0)
        bg_cand = (below | (inbin & (idx <= hi))).astype(f32)      # nbr_bg ones
        k_bg = f32(min(min_, nbr_bg))
        less_bg = (pbg_col < pbg_row).astype(f32).astype(bf16)     # (n, n)
        rank_bg = jnp.dot(bg_cand.astype(bf16), less_bg,
                          preferred_element_type=f32)
        bg = bg_cand * (rank_bg < k_bg).astype(f32)
    else:
        bg = jnp.zeros((1, n), f32)

    # ---- ksz x ksz dilation of both seed masks with one stacked matmul ------
    if ksz > 1:
        k_dil = kdil_ref[...]                                      # (n, n) bf16
        # build the (2, n) LHS without a concatenate (broadcast + select)
        rows2 = jax.lax.broadcasted_iota(jnp.int32, (2, n), 0)
        stacked = jnp.where(rows2 == 0,
                            jnp.broadcast_to(fg, (2, n)),
                            jnp.broadcast_to(bg, (2, n))).astype(bf16)
        dil = jnp.dot(stacked, k_dil, preferred_element_type=f32)  # (2, n)
        fg = (dil[0:1, :] > 0.5).astype(f32)
        bg = (dil[1:2, :] > 0.5).astype(f32)

    # ---- bad eggs get no seeds; resolve overlaps; assemble seed map ---------
    fg = jnp.where(bad_egg, 0.0, fg)
    bg = jnp.where(bad_egg, 0.0, bg)
    both = (fg + bg) > 1.5
    fg = jnp.where(both, 0.0, fg)
    bg = jnp.where(both, 0.0, bg)
    seeds = jnp.full((1, n), ignore_idx, dtype=jnp.int32)
    seeds = jnp.where(fg > 0.5, 1, seeds)
    seeds = jnp.where(bg > 0.5, 0, seeds)
    out_ref[0] = seeds


def get_fast_seeder_slfcams(x, key, *, min_, max_, min_p, fg_erode_k,
                            fg_erode_iter, ksz, seg_ignore_idx):
    """x: (b, 1, h, w) float32 CAMs in [0, 1] (NCHW). Returns (b, h, w) int32."""
    b, d, h, w = x.shape
    assert d == 1
    assert min_ >= 0 and max_ >= 0 and (min_ + max_) > 0
    assert 0.0 <= min_p <= 1.0
    assert ksz >= 1 and (ksz == 1 or ksz % 2 == 1)
    assert fg_erode_iter == 0 or (fg_erode_k > 1 and fg_erode_k % 2 == 1)
    n = h * w
    nbr_bg = int(min_p * h * w)

    vmem_limit, est = _vmem_limit_bytes(n)
    if est > vmem_limit:
        raise ValueError(f"image of {h}x{w} pixels needs ~{est >> 20} MiB VMEM, "
                         f"exceeding the {vmem_limit >> 20} MiB budget")

    # per-image inputs: CAM and sampling priorities in row and column layouts
    # (column views are passed in so no in-kernel transpose/reshape is needed).
    xf = x.astype(jnp.float32)
    xr = xf.reshape(b, 1, n)
    xc = xf.reshape(b, n, 1)
    kfg, kbg = jax.random.split(key)
    pfg = jax.random.uniform(kfg, (b, 1, n), dtype=jnp.float32)
    pbg = jax.random.uniform(kbg, (b, 1, n), dtype=jnp.float32)
    pfgc = pfg.reshape(b, n, 1)
    pbgc = pbg.reshape(b, n, 1)

    # image-independent constants: hoisted out of the kernel, DMA'd once and
    # kept VMEM-resident across the whole (sequential) batch grid.
    if fg_erode_iter > 0:
        k_er, ncnt_er = _morph_consts(h, w, fg_erode_k // 2)
    else:
        k_er = jnp.eye(n, dtype=jnp.bfloat16)
        ncnt_er = jnp.ones((1, n), jnp.float32)
    if ksz > 1:
        k_dil, _ = _morph_consts(h, w, ksz // 2)
    else:
        k_dil = jnp.eye(n, dtype=jnp.bfloat16)

    kernel = functools.partial(
        _seeder_kernel, n=n, min_=min_, max_=max_, nbr_bg=nbr_bg,
        ksz=ksz, fg_erode_iter=fg_erode_iter, ignore_idx=seg_ignore_idx)

    row_spec = pl.BlockSpec((1, 1, n), lambda i: (i, 0, 0))
    col_spec = pl.BlockSpec((1, n, 1), lambda i: (i, 0, 0))
    nn_spec = pl.BlockSpec((n, n), lambda i: (0, 0))
    cnt_spec = pl.BlockSpec((1, n), lambda i: (0, 0))

    out = pl.pallas_call(
        kernel,
        out_shape=jax.ShapeDtypeStruct((b, 1, n), jnp.int32),
        grid=(b,),
        in_specs=[row_spec, col_spec, row_spec, col_spec, row_spec, col_spec,
                  nn_spec, nn_spec, cnt_spec],
        out_specs=row_spec,
        compiler_params=pltpu.CompilerParams(
            dimension_semantics=("parallel",),
            vmem_limit_bytes=vmem_limit),
    )(xr, xc, pfg, pfgc, pbg, pbgc, k_er, k_dil, ncnt_er)
    return out.reshape(b, h, w)


if __name__ == "__main__":
    key = jax.random.PRNGKey(0)
    kx, ks = jax.random.split(key)
    b, h, w = 2, 16, 16
    x = jax.random.uniform(kx, (b, 1, h, w), dtype=jnp.float32)

    out = get_fast_seeder_slfcams(
        x, ks,
        min_=2,              # bg seeds to sample
        max_=3,              # fg seeds to sample
        min_p=0.2,           # fraction of lowest-CAM pixels as bg candidates
        fg_erode_k=3,
        fg_erode_iter=1,
        ksz=3,               # seed dilation kernel
        seg_ignore_idx=-255)
    out = jax.block_until_ready(out)

    assert out.shape == (b, h, w)
    assert out.dtype == jnp.int32
    # sanity: only {ignore, 0, 1} labels
    vals = set(int(v) for v in jnp.unique(out).tolist())
    assert vals.issubset({-255, 0, 1})
    print("KERNEL_OK")
</pallas_src>

<mosaic_0001>
module attributes {stable_mosaic.version = 11 : i64} {
  func.func @_seeder_kernel(%arg0: i32, %arg1: memref<1x1x256xf32, #tpu.memory_space<vmem>>, %arg2: memref<1x256x1xf32, #tpu.memory_space<vmem>>, %arg3: memref<1x1x256xf32, #tpu.memory_space<vmem>>, %arg4: memref<1x256x1xf32, #tpu.memory_space<vmem>>, %arg5: memref<1x1x256xf32, #tpu.memory_space<vmem>>, %arg6: memref<1x256x1xf32, #tpu.memory_space<vmem>>, %arg7: memref<256x256xbf16, #tpu.memory_space<vmem>>, %arg8: memref<256x256xbf16, #tpu.memory_space<vmem>>, %arg9: memref<1x256xf32, #tpu.memory_space<vmem>>, %arg10: memref<1x1x256xi32, #tpu.memory_space<vmem>>) attributes {dimension_semantics = [#tpu.dimension_semantics<parallel>], iteration_bounds = array<i64: 2>, scalar_prefetch = 0 : i64, scratch_operands = 0 : i64, tpu.core_type = #tpu.core_type<tc>, window_params = [{transform_indices = @transform_0, window_bounds = array<i64: 1, 1, 256>}, {transform_indices = @transform_1, window_bounds = array<i64: 1, 256, 1>}, {transform_indices = @transform_2, window_bounds = array<i64: 1, 1, 256>}, {transform_indices = @transform_3, window_bounds = array<i64: 1, 256, 1>}, {transform_indices = @transform_4, window_bounds = array<i64: 1, 1, 256>}, {transform_indices = @transform_5, window_bounds = array<i64: 1, 256, 1>}, {pipeline_mode = #tpu.pipeline_mode<synchronous>, transform_indices = @transform_6, window_bounds = array<i64: 256, 256>}, {pipeline_mode = #tpu.pipeline_mode<synchronous>, transform_indices = @transform_7, window_bounds = array<i64: 256, 256>}, {pipeline_mode = #tpu.pipeline_mode<synchronous>, transform_indices = @transform_8, window_bounds = array<i64: 1, 256>}, {transform_indices = @transform_9, window_bounds = array<i64: 1, 1, 256>}]} {
    %c0 = arith.constant 0 : index
    %c0_0 = arith.constant 0 : index
    %c0_1 = arith.constant 0 : index
    %0 = vector.load %arg1[%c0, %c0_0, %c0_1] : memref<1x1x256xf32, #tpu.memory_space<vmem>>, vector<1x1x256xf32>
    %1 = vector.shape_cast %0 : vector<1x1x256xf32> to vector<1x256xf32>
    %c0_2 = arith.constant 0 : index
    %c0_3 = arith.constant 0 : index
    %c0_4 = arith.constant 0 : index
    %2 = vector.load %arg2[%c0_2, %c0_3, %c0_4] : memref<1x256x1xf32, #tpu.memory_space<vmem>>, vector<1x256x1xf32>
    %3 = vector.shape_cast %2 : vector<1x256x1xf32> to vector<256x1xf32>
    %c0_5 = arith.constant 0 : index
    %c0_6 = arith.constant 0 : index
    %c0_7 = arith.constant 0 : index
    %4 = vector.load %arg3[%c0_5, %c0_6, %c0_7] : memref<1x1x256xf32, #tpu.memory_space<vmem>>, vector<1x1x256xf32>
    %5 = vector.shape_cast %4 : vector<1x1x256xf32> to vector<1x256xf32>
    %c0_8 = arith.constant 0 : index
    %c0_9 = arith.constant 0 : index
    %c0_10 = arith.constant 0 : index
    %6 = vector.load %arg4[%c0_8, %c0_9, %c0_10] : memref<1x256x1xf32, #tpu.memory_space<vmem>>, vector<1x256x1xf32>
    %7 = vector.shape_cast %6 : vector<1x256x1xf32> to vector<256x1xf32>
    %c0_11 = arith.constant 0 : index
    %c0_12 = arith.constant 0 : index
    %c0_13 = arith.constant 0 : index
    %8 = vector.load %arg5[%c0_11, %c0_12, %c0_13] : memref<1x1x256xf32, #tpu.memory_space<vmem>>, vector<1x1x256xf32>
    %9 = vector.shape_cast %8 : vector<1x1x256xf32> to vector<1x256xf32>
    %c0_14 = arith.constant 0 : index
    %c0_15 = arith.constant 0 : index
    %c0_16 = arith.constant 0 : index
    %10 = vector.load %arg6[%c0_14, %c0_15, %c0_16] : memref<1x256x1xf32, #tpu.memory_space<vmem>>, vector<1x256x1xf32>
    %11 = vector.shape_cast %10 : vector<1x256x1xf32> to vector<256x1xf32>
    %cst = arith.constant 2.550000e+02 : f32
    %12 = vector.broadcast %cst : f32 to vector<1x256xf32>
    %13 = arith.mulf %1, %12 : vector<1x256xf32>
    %14 = arith.fptosi %13 : vector<1x256xf32> to vector<1x256xi32>
    %cst_17 = arith.constant dense<2147483647> : vector<1xi32>
    %15 = vector.multi_reduction <minsi>, %14, %cst_17 [1] : vector<1x256xi32> to vector<1xi32>
    %16 = vector.shape_cast %15 : vector<1xi32> to vector<1x1xi32>
    %cst_18 = arith.constant dense<-2147483648> : vector<1xi32>
    %17 = vector.multi_reduction <maxsi>, %14, %cst_18 [1] : vector<1x256xi32> to vector<1xi32>
    %18 = vector.shape_cast %17 : vector<1xi32> to vector<1x1xi32>
    %19 = arith.cmpi eq, %16, %18 : vector<1x1xi32>
    %20 = tpu.iota {dimensions = array<i32: 0>} : vector<256x1xi32>
    %21 = vector.broadcast %14 : vector<1x256xi32> to vector<256x256xi32>
    %22 = vector.broadcast %20 : vector<256x1xi32> to vector<256x256xi32>
    %23 = arith.cmpi sle, %21, %22 : vector<256x256xi32>
    %24 = arith.extui %23 : vector<256x256xi1> to vector<256x256xi32>
    %25 = arith.sitofp %24 : vector<256x256xi32> to vector<256x256xf32>
    %26 = arith.truncf %25 : vector<256x256xf32> to vector<256x256xbf16>
    %cst_19 = arith.constant 2.550000e+02 : f32
    %27 = vector.broadcast %cst_19 : f32 to vector<256x1xf32>
    %28 = arith.mulf %3, %27 : vector<256x1xf32>
    %29 = arith.fptosi %28 : vector<256x1xf32> to vector<256x1xi32>
    %30 = arith.sitofp %29 : vector<256x1xi32> to vector<256x1xf32>
    %31 = arith.truncf %30 : vector<256x1xf32> to vector<256x1xbf16>
    %cst_20 = arith.constant 1.000000e+00 : bf16
    %32 = vector.broadcast %cst_20 : bf16 to vector<256x1xbf16>
    %cst_21 = arith.constant dense<0.000000e+00> : vector<256x1xf32>
    %33 = tpu.matmul %26, %32, %cst_21 {dimension_numbers = #tpu.dot_dimension_numbers<[1], [0], [0], [1], [0, 0, 1, 1], [], []>} : vector<256x256xbf16>, vector<256x1xbf16>, vector<256x1xf32> -> vector<256x1xf32>
    %cst_22 = arith.constant dense<0.000000e+00> : vector<256x1xf32>
    %34 = tpu.matmul %26, %31, %cst_22 {dimension_numbers = #tpu.dot_dimension_numbers<[1], [0], [0], [1], [0, 0, 1, 1], [], []>} : vector<256x256xbf16>, vector<256x1xbf16>, vector<256x1xf32> -> vector<256x1xf32>
    %35 = vector.extract_strided_slice %34 {offsets = [255, 0], sizes = [1, 1], strides = [1, 1]} : vector<256x1xf32> to vector<1x1xf32>
    %cst_23 = arith.constant 2.560000e+02 : f32
    %36 = vector.broadcast %cst_23 : f32 to vector<256x1xf32>
    %37 = arith.subf %36, %33 : vector<256x1xf32>
    %cst_24 = arith.constant 1.000000e+00 : f32
    %38 = vector.broadcast %cst_24 : f32 to vector<256x1xf32>
    %39 = arith.maximumf %33, %38 : vector<256x1xf32>
    %40 = arith.divf %34, %39 : vector<256x1xf32>
    %41 = vector.broadcast %35 : vector<1x1xf32> to vector<256x1xf32>
    %42 = arith.subf %41, %34 : vector<256x1xf32>
    %cst_25 = arith.constant 1.000000e+00 : f32
    %43 = vector.broadcast %cst_25 : f32 to vector<256x1xf32>
    %44 = arith.maximumf %37, %43 : vector<256x1xf32>
    %45 = arith.divf %42, %44 : vector<256x1xf32>
    %cst_26 = arith.constant 5.000000e-01 : f32
    %46 = vector.broadcast %cst_26 : f32 to vector<256x1xf32>
    %47 = arith.cmpf ogt, %33, %46 : vector<256x1xf32>
    %cst_27 = arith.constant 5.000000e-01 : f32
    %48 = vector.broadcast %cst_27 : f32 to vector<256x1xf32>
    %49 = arith.cmpf ogt, %37, %48 : vector<256x1xf32>
    %50 = arith.andi %47, %49 : vector<256x1xi1>
    %51 = arith.mulf %33, %37 : vector<256x1xf32>
    %52 = arith.subf %40, %45 : vector<256x1xf32>
    %53 = arith.mulf %52, %52 : vector<256x1xf32>
    %54 = arith.mulf %51, %53 : vector<256x1xf32>
    %cst_28 = arith.constant -1.000000e+00 : f32
    %55 = vector.broadcast %cst_28 : f32 to vector<256x1xf32>
    %56 = arith.select %50, %54, %55 : vector<256x1xi1>, vector<256x1xf32>
    %cst_29 = arith.constant dense<0xFF800000> : vector<1xf32>
    %57 = vector.multi_reduction <maximumf>, %56, %cst_29 [0] : vector<256x1xf32> to vector<1xf32>
    %58 = vector.shape_cast %57 : vector<1xf32> to vector<1x1xf32>
    %59 = vector.broadcast %58 : vector<1x1xf32> to vector<256x1xf32>
    %60 = arith.cmpf oeq, %56, %59 : vector<256x1xf32>
    %c256_i32 = arith.constant 256 : i32
    %61 = vector.broadcast %c256_i32 : i32 to vector<256x1xi32>
    %62 = arith.select %60, %20, %61 : vector<256x1xi1>, vector<256x1xi32>
    %cst_30 = arith.constant dense<2147483647> : vector<1xi32>
    %63 = vector.multi_reduction <minsi>, %62, %cst_30 [0] : vector<256x1xi32> to vector<1xi32>
    %64 = vector.shape_cast %63 : vector<1xi32> to vector<1x1xi32>
    %c1_i32 = arith.constant 1 : i32
    %c254_i32 = arith.constant 254 : i32
    %65 = vector.broadcast %c1_i32 : i32 to vector<1x1xi32>
    %66 = arith.maxsi %65, %64 : vector<1x1xi32>
    %67 = vector.broadcast %c254_i32 : i32 to vector<1x1xi32>
    %68 = arith.minsi %67, %66 : vector<1x1xi32>
    %69 = vector.broadcast %68 : vector<1x1xi32> to vector<1x256xi32>
    %70 = arith.cmpi sgt, %14, %69 : vector<1x256xi32>
    %71 = arith.extui %70 : vector<1x256xi1> to vector<1x256xi32>
    %72 = arith.sitofp %71 : vector<1x256xi32> to vector<1x256xf32>
    %c0_31 = arith.constant 0 : index
    %c0_32 = arith.constant 0 : index
    %73 = vector.load %arg7[%c0_31, %c0_32] : memref<256x256xbf16, #tpu.memory_space<vmem>>, vector<256x256xbf16>
    %c0_33 = arith.constant 0 : index
    %c0_34 = arith.constant 0 : index
    %74 = vector.load %arg9[%c0_33, %c0_34] : memref<1x256xf32, #tpu.memory_space<vmem>>, vector<1x256xf32>
    %false = arith.constant false
    %75 = vector.broadcast %false : i1 to vector<1x1xi1>
    %76 = arith.truncf %72 : vector<1x256xf32> to vector<1x256xbf16>
    %cst_35 = arith.constant dense<0.000000e+00> : vector<1x256xf32>
    %77 = tpu.matmul %76, %73, %cst_35 {dimension_numbers = #tpu.dot_dimension_numbers<[1], [0], [0], [1], [0, 0, 1, 1], [], []>} : vector<1x256xbf16>, vector<256x256xbf16>, vector<1x256xf32> -> vector<1x256xf32>
    %cst_36 = arith.constant 5.000000e-01 : f32
    %78 = vector.broadcast %cst_36 : f32 to vector<1x256xf32>
    %79 = arith.subf %74, %78 : vector<1x256xf32>
    %80 = arith.cmpf oge, %77, %79 : vector<1x256xf32>
    %81 = arith.extui %80 : vector<1x256xi1> to vector<1x256xi32>
    %82 = arith.sitofp %81 : vector<1x256xi32> to vector<1x256xf32>
    %cst_37 = arith.constant dense<0.000000e+00> : vector<1xf32>
    %83 = vector.multi_reduction <add>, %82, %cst_37 [1] : vector<1x256xf32> to vector<1xf32>
    %84 = vector.shape_cast %83 : vector<1xf32> to vector<1x1xf32>
    %cst_38 = arith.constant 5.000000e-01 : f32
    %85 = vector.broadcast %cst_38 : f32 to vector<1x1xf32>
    %86 = arith.cmpf olt, %84, %85 : vector<1x1xf32>
    %87 = arith.ori %75, %86 : vector<1x1xi1>
    %88 = vector.shape_cast %87 : vector<1x1xi1> to vector<1x1xi1>
    %89 = vector.broadcast %88 : vector<1x1xi1> to vector<1x256xi1>
    %90 = arith.select %89, %72, %82 : vector<1x256xi1>, vector<1x256xf32>
    %cst_39 = arith.constant dense<0.000000e+00> : vector<1xf32>
    %91 = vector.multi_reduction <add>, %90, %cst_39 [1] : vector<1x256xf32> to vector<1xf32>
    %92 = vector.shape_cast %91 : vector<1xf32> to vector<1x1xf32>
    %cst_40 = arith.constant 3.000000e+00 : f32
    %93 = vector.broadcast %cst_40 : f32 to vector<1x1xf32>
    %94 = arith.minimumf %93, %92 : vector<1x1xf32>
    %95 = vector.broadcast %7 : vector<256x1xf32> to vector<256x256xf32>
    %96 = vector.broadcast %5 : vector<1x256xf32> to vector<256x256xf32>
    %97 = arith.cmpf olt, %95, %96 : vector<256x256xf32>
    %98 = arith.extui %97 : vector<256x256xi1> to vector<256x256xi32>
    %99 = arith.sitofp %98 : vector<256x256xi32> to vector<256x256xf32>
    %100 = arith.truncf %99 : vector<256x256xf32> to vector<256x256xbf16>
    %101 = arith.truncf %90 : vector<1x256xf32> to vector<1x256xbf16>
    %cst_41 = arith.constant dense<0.000000e+00> : vector<1x256xf32>
    %102 = tpu.matmul %101, %100, %cst_41 {dimension_numbers = #tpu.dot_dimension_numbers<[1], [0], [0], [1], [0, 0, 1, 1], [], []>} : vector<1x256xbf16>, vector<256x256xbf16>, vector<1x256xf32> -> vector<1x256xf32>
    %103 = vector.broadcast %94 : vector<1x1xf32> to vector<1x256xf32>
    %104 = arith.cmpf olt, %102, %103 : vector<1x256xf32>
    %105 = arith.extui %104 : vector<1x256xi1> to vector<1x256xi32>
    %106 = arith.sitofp %105 : vector<1x256xi32> to vector<1x256xf32>
    %107 = arith.mulf %90, %106 : vector<1x256xf32>
    %cst_42 = arith.constant 5.100000e+01 : f32
    %108 = vector.broadcast %cst_42 : f32 to vector<256x1xf32>
    %109 = arith.cmpf oge, %33, %108 : vector<256x1xf32>
    %c256_i32_43 = arith.constant 256 : i32
    %110 = vector.broadcast %c256_i32_43 : i32 to vector<256x1xi32>
    %111 = arith.select %109, %20, %110 : vector<256x1xi1>, vector<256x1xi32>
    %cst_44 = arith.constant dense<2147483647> : vector<1xi32>
    %112 = vector.multi_reduction <minsi>, %111, %cst_44 [0] : vector<256x1xi32> to vector<1xi32>
    %113 = vector.shape_cast %112 : vector<1xi32> to vector<1x1xi32>
    %114 = vector.broadcast %113 : vector<1x1xi32> to vector<1x256xi32>
    %115 = arith.cmpi slt, %14, %114 : vector<1x256xi32>
    %116 = vector.broadcast %113 : vector<1x1xi32> to vector<1x256xi32>
    %117 = arith.cmpi eq, %14, %116 : vector<1x256xi32>
    %118 = arith.extui %115 : vector<1x256xi1> to vector<1x256xi32>
    %119 = arith.sitofp %118 : vector<1x256xi32> to vector<1x256xf32>
    %cst_45 = arith.constant dense<0.000000e+00> : vector<1xf32>
    %120 = vector.multi_reduction <add>, %119, %cst_45 [1] : vector<1x256xf32> to vector<1xf32>
    %121 = vector.shape_cast %120 : vector<1xf32> to vector<1x1xf32>
    %cst_46 = arith.constant 5.100000e+01 : f32
    %122 = vector.broadcast %cst_46 : f32 to vector<1x1xf32>
    %123 = arith.subf %122, %121 : vector<1x1xf32>
    %124 = tpu.iota {dimensions = array<i32: 1>} : vector<1x256xi32>
    %125 = arith.sitofp %124 : vector<1x256xi32> to vector<1x256xf32>
    %126 = arith.extui %117 : vector<1x256xi1> to vector<1x256xi32>
    %127 = arith.sitofp %126 : vector<1x256xi32> to vector<1x256xf32>
    %cst_47 = arith.constant 0.000000e+00 : f32
    %128 = vector.broadcast %cst_47 : f32 to vector<1x1xf32>
    %cst_48 = arith.constant 2.550000e+02 : f32
    %129 = vector.broadcast %cst_48 : f32 to vector<1x1xf32>
    %130 = arith.addf %128, %129 : vector<1x1xf32>
    %cst_49 = arith.constant 5.000000e-01 : f32
    %131 = vector.broadcast %cst_49 : f32 to vector<1x1xf32>
    %132 = arith.mulf %130, %131 : vector<1x1xf32>
    %133 = math.floor %132 : vector<1x1xf32>
    %134 = vector.broadcast %133 : vector<1x1xf32> to vector<1x256xf32>
    %135 = arith.cmpf ole, %125, %134 : vector<1x256xf32>
    %136 = arith.extui %135 : vector<1x256xi1> to vector<1x256xi32>
    %137 = arith.sitofp %136 : vector<1x256xi32> to vector<1x256xf32>
    %138 = arith.mulf %127, %137 : vector<1x256xf32>
    %cst_50 = arith.constant dense<0.000000e+00> : vector<1xf32>
    %139 = vector.multi_reduction <add>, %138, %cst_50 [1] : vector<1x256xf32> to vector<1xf32>
    %140 = vector.shape_cast %139 : vector<1xf32> to vector<1x1xf32>
    %141 = arith.cmpf oge, %140, %123 : vector<1x1xf32>
    %142 = arith.select %141, %133, %129 : vector<1x1xi1>, vector<1x1xf32>
    %cst_51 = arith.constant 1.000000e+00 : f32
    %143 = vector.broadcast %cst_51 : f32 to vector<1x1xf32>
    %144 = arith.addf %133, %143 : vector<1x1xf32>
    %145 = arith.select %141, %128, %144 : vector<1x1xi1>, vector<1x1xf32>
    %146 = arith.addf %145, %142 : vector<1x1xf32>
    %cst_52 = arith.constant 5.000000e-01 : f32
    %147 = vector.broadcast %cst_52 : f32 to vector<1x1xf32>
    %148 = arith.mulf %146, %147 : vector<1x1xf32>
    %149 = math.floor %148 : vector<1x1xf32>
    %150 = vector.broadcast %149 : vector<1x1xf32> to vector<1x256xf32>
    %151 = arith.cmpf ole, %125, %150 : vector<1x256xf32>
    %152 = arith.extui %151 : vector<1x256xi1> to vector<1x256xi32>
    %153 = arith.sitofp %152 : vector<1x256xi32> to vector<1x256xf32>
    %154 = arith.mulf %127, %153 : vector<1x256xf32>
    %cst_53 = arith.constant dense<0.000000e+00> : vector<1xf32>
    %155 = vector.multi_reduction <add>, %154, %cst_53 [1] : vector<1x256xf32> to vector<1xf32>
    %156 = vector.shape_cast %155 : vector<1xf32> to vector<1x1xf32>
    %157 = arith.cmpf oge, %156, %123 : vector<1x1xf32>
    %158 = arith.select %157, %149, %142 : vector<1x1xi1>, vector<1x1xf32>
    %cst_54 = arith.constant 1.000000e+00 : f32
    %159 = vector.broadcast %cst_54 : f32 to vector<1x1xf32>
    %160 = arith.addf %149, %159 : vector<1x1xf32>
    %161 = arith.select %157, %145, %160 : vector<1x1xi1>, vector<1x1xf32>
    %162 = arith.addf %161, %158 : vector<1x1xf32>
    %cst_55 = arith.constant 5.000000e-01 : f32
    %163 = vector.broadcast %cst_55 : f32 to vector<1x1xf32>
    %164 = arith.mulf %162, %163 : vector<1x1xf32>
    %165 = math.floor %164 : vector<1x1xf32>
    %166 = vector.broadcast %165 : vector<1x1xf32> to vector<1x256xf32>
    %167 = arith.cmpf ole, %125, %166 : vector<1x256xf32>
    %168 = arith.extui %167 : vector<1x256xi1> to vector<1x256xi32>
    %169 = arith.sitofp %168 : vector<1x256xi32> to vector<1x256xf32>
    %170 = arith.mulf %127, %169 : vector<1x256xf32>
    %cst_56 = arith.constant dense<0.000000e+00> : vector<1xf32>
    %171 = vector.multi_reduction <add>, %170, %cst_56 [1] : vector<1x256xf32> to vector<1xf32>
    %172 = vector.shape_cast %171 : vector<1xf32> to vector<1x1xf32>
    %173 = arith.cmpf oge, %172, %123 : vector<1x1xf32>
    %174 = arith.select %173, %165, %158 : vector<1x1xi1>, vector<1x1xf32>
    %cst_57 = arith.constant 1.000000e+00 : f32
    %175 = vector.broadcast %cst_57 : f32 to vector<1x1xf32>
    %176 = arith.addf %165, %175 : vector<1x1xf32>
    %177 = arith.select %173, %161, %176 : vector<1x1xi1>, vector<1x1xf32>
    %178 = arith.addf %177, %174 : vector<1x1xf32>
    %cst_58 = arith.constant 5.000000e-01 : f32
    %179 = vector.broadcast %cst_58 : f32 to vector<1x1xf32>
    %180 = arith.mulf %178, %179 : vector<1x1xf32>
    %181 = math.floor %180 : vector<1x1xf32>
    %182 = vector.broadcast %181 : vector<1x1xf32> to vector<1x256xf32>
    %183 = arith.cmpf ole, %125, %182 : vector<1x256xf32>
    %184 = arith.extui %183 : vector<1x256xi1> to vector<1x256xi32>
    %185 = arith.sitofp %184 : vector<1x256xi32> to vector<1x256xf32>
    %186 = arith.mulf %127, %185 : vector<1x256xf32>
    %cst_59 = arith.constant dense<0.000000e+00> : vector<1xf32>
    %187 = vector.multi_reduction <add>, %186, %cst_59 [1] : vector<1x256xf32> to vector<1xf32>
    %188 = vector.shape_cast %187 : vector<1xf32> to vector<1x1xf32>
    %189 = arith.cmpf oge, %188, %123 : vector<1x1xf32>
    %190 = arith.select %189, %181, %174 : vector<1x1xi1>, vector<1x1xf32>
    %cst_60 = arith.constant 1.000000e+00 : f32
    %191 = vector.broadcast %cst_60 : f32 to vector<1x1xf32>
    %192 = arith.addf %181, %191 : vector<1x1xf32>
    %193 = arith.select %189, %177, %192 : vector<1x1xi1>, vector<1x1xf32>
    %194 = arith.addf %193, %190 : vector<1x1xf32>
    %cst_61 = arith.constant 5.000000e-01 : f32
    %195 = vector.broadcast %cst_61 : f32 to vector<1x1xf32>
    %196 = arith.mulf %194, %195 : vector<1x1xf32>
    %197 = math.floor %196 : vector<1x1xf32>
    %198 = vector.broadcast %197 : vector<1x1xf32> to vector<1x256xf32>
    %199 = arith.cmpf ole, %125, %198 : vector<1x256xf32>
    %200 = arith.extui %199 : vector<1x256xi1> to vector<1x256xi32>
    %201 = arith.sitofp %200 : vector<1x256xi32> to vector<1x256xf32>
    %202 = arith.mulf %127, %201 : vector<1x256xf32>
    %cst_62 = arith.constant dense<0.000000e+00> : vector<1xf32>
    %203 = vector.multi_reduction <add>, %202, %cst_62 [1] : vector<1x256xf32> to vector<1xf32>
    %204 = vector.shape_cast %203 : vector<1xf32> to vector<1x1xf32>
    %205 = arith.cmpf oge, %204, %123 : vector<1x1xf32>
    %206 = arith.select %205, %197, %190 : vector<1x1xi1>, vector<1x1xf32>
    %cst_63 = arith.constant 1.000000e+00 : f32
    %207 = vector.broadcast %cst_63 : f32 to vector<1x1xf32>
    %208 = arith.addf %197, %207 : vector<1x1xf32>
    %209 = arith.select %205, %193, %208 : vector<1x1xi1>, vector<1x1xf32>
    %210 = arith.addf %209, %206 : vector<1x1xf32>
    %cst_64 = arith.constant 5.000000e-01 : f32
    %211 = vector.broadcast %cst_64 : f32 to vector<1x1xf32>
    %212 = arith.mulf %210, %211 : vector<1x1xf32>
    %213 = math.floor %212 : vector<1x1xf32>
    %214 = vector.broadcast %213 : vector<1x1xf32> to vector<1x256xf32>
    %215 = arith.cmpf ole, %125, %214 : vector<1x256xf32>
    %216 = arith.extui %215 : vector<1x256xi1> to vector<1x256xi32>
    %217 = arith.sitofp %216 : vector<1x256xi32> to vector<1x256xf32>
    %218 = arith.mulf %127, %217 : vector<1x256xf32>
    %cst_65 = arith.constant dense<0.000000e+00> : vector<1xf32>
    %219 = vector.multi_reduction <add>, %218, %cst_65 [1] : vector<1x256xf32> to vector<1xf32>
    %220 = vector.shape_cast %219 : vector<1xf32> to vector<1x1xf32>
    %221 = arith.cmpf oge, %220, %123 : vector<1x1xf32>
    %222 = arith.select %221, %213, %206 : vector<1x1xi1>, vector<1x1xf32>
    %cst_66 = arith.constant 1.000000e+00 : f32
    %223 = vector.broadcast %cst_66 : f32 to vector<1x1xf32>
    %224 = arith.addf %213, %223 : vector<1x1xf32>
    %225 = arith.select %221, %209, %224 : vector<1x1xi1>, vector<1x1xf32>
    %226 = arith.addf %225, %222 : vector<1x1xf32>
    %cst_67 = arith.constant 5.000000e-01 : f32
    %227 = vector.broadcast %cst_67 : f32 to vector<1x1xf32>
    %228 = arith.mulf %226, %227 : vector<1x1xf32>
    %229 = math.floor %228 : vector<1x1xf32>
    %230 = vector.broadcast %229 : vector<1x1xf32> to vector<1x256xf32>
    %231 = arith.cmpf ole, %125, %230 : vector<1x256xf32>
    %232 = arith.extui %231 : vector<1x256xi1> to vector<1x256xi32>
    %233 = arith.sitofp %232 : vector<1x256xi32> to vector<1x256xf32>
    %234 = arith.mulf %127, %233 : vector<1x256xf32>
    %cst_68 = arith.constant dense<0.000000e+00> : vector<1xf32>
    %235 = vector.multi_reduction <add>, %234, %cst_68 [1] : vector<1x256xf32> to vector<1xf32>
    %236 = vector.shape_cast %235 : vector<1xf32> to vector<1x1xf32>
    %237 = arith.cmpf oge, %236, %123 : vector<1x1xf32>
    %238 = arith.select %237, %229, %222 : vector<1x1xi1>, vector<1x1xf32>
    %cst_69 = arith.constant 1.000000e+00 : f32
    %239 = vector.broadcast %cst_69 : f32 to vector<1x1xf32>
    %240 = arith.addf %229, %239 : vector<1x1xf32>
    %241 = arith.select %237, %225, %240 : vector<1x1xi1>, vector<1x1xf32>
    %242 = arith.addf %241, %238 : vector<1x1xf32>
    %cst_70 = arith.constant 5.000000e-01 : f32
    %243 = vector.broadcast %cst_70 : f32 to vector<1x1xf32>
    %244 = arith.mulf %242, %243 : vector<1x1xf32>
    %245 = math.floor %244 : vector<1x1xf32>
    %246 = vector.broadcast %245 : vector<1x1xf32> to vector<1x256xf32>
    %247 = arith.cmpf ole, %125, %246 : vector<1x256xf32>
    %248 = arith.extui %247 : vector<1x256xi1> to vector<1x256xi32>
    %249 = arith.sitofp %248 : vector<1x256xi32> to vector<1x256xf32>
    %250 = arith.mulf %127, %249 : vector<1x256xf32>
    %cst_71 = arith.constant dense<0.000000e+00> : vector<1xf32>
    %251 = vector.multi_reduction <add>, %250, %cst_71 [1] : vector<1x256xf32> to vector<1xf32>
    %252 = vector.shape_cast %251 : vector<1xf32> to vector<1x1xf32>
    %253 = arith.cmpf oge, %252, %123 : vector<1x1xf32>
    %254 = arith.select %253, %245, %238 : vector<1x1xi1>, vector<1x1xf32>
    %255 = vector.broadcast %254 : vector<1x1xf32> to vector<1x256xf32>
    %256 = arith.cmpf ole, %125, %255 : vector<1x256xf32>
    %257 = arith.andi %117, %256 : vector<1x256xi1>
    %258 = arith.ori %115, %257 : vector<1x256xi1>
    %259 = arith.extui %258 : vector<1x256xi1> to vector<1x256xi32>
    %260 = arith.sitofp %259 : vector<1x256xi32> to vector<1x256xf32>
    %261 = vector.broadcast %11 : vector<256x1xf32> to vector<256x256xf32>
    %262 = vector.broadcast %9 : vector<1x256xf32> to vector<256x256xf32>
    %263 = arith.cmpf olt, %261, %262 : vector<256x256xf32>
    %264 = arith.extui %263 : vector<256x256xi1> to vector<256x256xi32>
    %265 = arith.sitofp %264 : vector<256x256xi32> to vector<256x256xf32>
    %266 = arith.truncf %265 : vector<256x256xf32> to vector<256x256xbf16>
    %267 = arith.truncf %260 : vector<1x256xf32> to vector<1x256xbf16>
    %cst_72 = arith.constant dense<0.000000e+00> : vector<1x256xf32>
    %268 = tpu.matmul %267, %266, %cst_72 {dimension_numbers = #tpu.dot_dimension_numbers<[1], [0], [0], [1], [0, 0, 1, 1], [], []>} : vector<1x256xbf16>, vector<256x256xbf16>, vector<1x256xf32> -> vector<1x256xf32>
    %cst_73 = arith.constant 2.000000e+00 : f32
    %269 = vector.broadcast %cst_73 : f32 to vector<1x256xf32>
    %270 = arith.cmpf olt, %268, %269 : vector<1x256xf32>
    %271 = arith.extui %270 : vector<1x256xi1> to vector<1x256xi32>
    %272 = arith.sitofp %271 : vector<1x256xi32> to vector<1x256xf32>
    %273 = arith.mulf %260, %272 : vector<1x256xf32>
    %c0_74 = arith.constant 0 : index
    %c0_75 = arith.constant 0 : index
    %274 = vector.load %arg8[%c0_74, %c0_75] : memref<256x256xbf16, #tpu.memory_space<vmem>>, vector<256x256xbf16>
    %275 = tpu.iota {dimensions = array<i32: 0>} : vector<2x256xi32>
    %c0_i32 = arith.constant 0 : i32
    %276 = vector.broadcast %c0_i32 : i32 to vector<2x256xi32>
    %277 = arith.cmpi eq, %275, %276 : vector<2x256xi32>
    %278 = vector.shape_cast %107 : vector<1x256xf32> to vector<1x256xf32>
    %279 = vector.broadcast %278 : vector<1x256xf32> to vector<2x256xf32>
    %280 = vector.shape_cast %273 : vector<1x256xf32> to vector<1x256xf32>
    %281 = vector.broadcast %280 : vector<1x256xf32> to vector<2x256xf32>
    %282 = arith.select %277, %279, %281 : vector<2x256xi1>, vector<2x256xf32>
    %283 = arith.truncf %282 : vector<2x256xf32> to vector<2x256xbf16>
    %cst_76 = arith.constant dense<0.000000e+00> : vector<2x256xf32>
    %284 = tpu.matmul %283, %274, %cst_76 {dimension_numbers = #tpu.dot_dimension_numbers<[1], [0], [0], [1], [0, 0, 1, 1], [], []>} : vector<2x256xbf16>, vector<256x256xbf16>, vector<2x256xf32> -> vector<2x256xf32>
    %285 = vector.extract_strided_slice %284 {offsets = [0, 0], sizes = [1, 256], strides = [1, 1]} : vector<2x256xf32> to vector<1x256xf32>
    %cst_77 = arith.constant 5.000000e-01 : f32
    %286 = vector.broadcast %cst_77 : f32 to vector<1x256xf32>
    %287 = arith.cmpf ogt, %285, %286 : vector<1x256xf32>
    %288 = arith.extui %287 : vector<1x256xi1> to vector<1x256xi32>
    %289 = arith.sitofp %288 : vector<1x256xi32> to vector<1x256xf32>
    %290 = vector.extract_strided_slice %284 {offsets = [1, 0], sizes = [1, 256], strides = [1, 1]} : vector<2x256xf32> to vector<1x256xf32>
    %cst_78 = arith.constant 5.000000e-01 : f32
    %291 = vector.broadcast %cst_78 : f32 to vector<1x256xf32>
    %292 = arith.cmpf ogt, %290, %291 : vector<1x256xf32>
    %293 = arith.extui %292 : vector<1x256xi1> to vector<1x256xi32>
    %294 = arith.sitofp %293 : vector<1x256xi32> to vector<1x256xf32>
    %cst_79 = arith.constant 0.000000e+00 : f32
    %295 = vector.shape_cast %19 : vector<1x1xi1> to vector<1x1xi1>
    %296 = vector.broadcast %295 : vector<1x1xi1> to vector<1x256xi1>
    %297 = vector.broadcast %cst_79 : f32 to vector<1x256xf32>
    %298 = arith.select %296, %297, %289 : vector<1x256xi1>, vector<1x256xf32>
    %cst_80 = arith.constant 0.000000e+00 : f32
    %299 = vector.shape_cast %19 : vector<1x1xi1> to vector<1x1xi1>
    %300 = vector.broadcast %299 : vector<1x1xi1> to vector<1x256xi1>
    %301 = vector.broadcast %cst_80 : f32 to vector<1x256xf32>
    %302 = arith.select %300, %301, %294 : vector<1x256xi1>, vector<1x256xf32>
    %303 = arith.addf %298, %302 : vector<1x256xf32>
    %cst_81 = arith.constant 1.500000e+00 : f32
    %304 = vector.broadcast %cst_81 : f32 to vector<1x256xf32>
    %305 = arith.cmpf ogt, %303, %304 : vector<1x256xf32>
    %cst_82 = arith.constant 0.000000e+00 : f32
    %306 = vector.broadcast %cst_82 : f32 to vector<1x256xf32>
    %307 = arith.select %305, %306, %298 : vector<1x256xi1>, vector<1x256xf32>
    %cst_83 = arith.constant 0.000000e+00 : f32
    %308 = vector.broadcast %cst_83 : f32 to vector<1x256xf32>
    %309 = arith.select %305, %308, %302 : vector<1x256xi1>, vector<1x256xf32>
    %c-255_i32 = arith.constant -255 : i32
    %310 = vector.broadcast %c-255_i32 : i32 to vector<1x256xi32>
    %cst_84 = arith.constant 5.000000e-01 : f32
    %311 = vector.broadcast %cst_84 : f32 to vector<1x256xf32>
    %312 = arith.cmpf ogt, %307, %311 : vector<1x256xf32>
    %c1_i32_85 = arith.constant 1 : i32
    %313 = vector.broadcast %c1_i32_85 : i32 to vector<1x256xi32>
    %314 = arith.select %312, %313, %310 : vector<1x256xi1>, vector<1x256xi32>
    %cst_86 = arith.constant 5.000000e-01 : f32
    %315 = vector.broadcast %cst_86 : f32 to vector<1x256xf32>
    %316 = arith.cmpf ogt, %309, %315 : vector<1x256xf32>
    %c0_i32_87 = arith.constant 0 : i32
    %317 = vector.broadcast %c0_i32_87 : i32 to vector<1x256xi32>
    %318 = arith.select %316, %317, %314 : vector<1x256xi1>, vector<1x256xi32>
    %c0_88 = arith.constant 0 : index
    %c0_89 = arith.constant 0 : index
    %c0_90 = arith.constant 0 : index
    %319 = vector.load %arg10[%c0_88, %c0_89, %c0_90] : memref<1x1x256xi32, #tpu.memory_space<vmem>>, vector<1x1x256xi32>
    %320 = vector.shape_cast %319 : vector<1x1x256xi32> to vector<1x256xi32>
    %321 = vector.shape_cast %318 : vector<1x256xi32> to vector<1x1x256xi32>
    tpu.vector_store %arg10[%c0_88, %c0_89, %c0_90], %321 {strides = array<i32>} : memref<1x1x256xi32, #tpu.memory_space<vmem>>, vector<1x1x256xi32>,
    return
  }
  func.func @transform_0(%arg0: i32) -> (i32, i32, i32) {
    %c0_i32 = arith.constant 0 : i32
    %c0_i32_0 = arith.constant 0 : i32
    %c0_i32_1 = arith.constant 0 : i32
    return %arg0, %c0_i32, %c0_i32_0 : i32, i32, i32
  }
  func.func @transform_1(%arg0: i32) -> (i32, i32, i32) {
    %c0_i32 = arith.constant 0 : i32
    %c0_i32_0 = arith.constant 0 : i32
    %c0_i32_1 = arith.constant 0 : i32
    return %arg0, %c0_i32, %c0_i32_0 : i32, i32, i32
  }
  func.func @transform_2(%arg0: i32) -> (i32, i32, i32) {
    %c0_i32 = arith.constant 0 : i32
    %c0_i32_0 = arith.constant 0 : i32
    %c0_i32_1 = arith.constant 0 : i32
    return %arg0, %c0_i32, %c0_i32_0 : i32, i32, i32
  }
  func.func @transform_3(%arg0: i32) -> (i32, i32, i32) {
    %c0_i32 = arith.constant 0 : i32
    %c0_i32_0 = arith.constant 0 : i32
    %c0_i32_1 = arith.constant 0 : i32
    return %arg0, %c0_i32, %c0_i32_0 : i32, i32, i32
  }
  func.func @transform_4(%arg0: i32) -> (i32, i32, i32) {
    %c0_i32 = arith.constant 0 : i32
    %c0_i32_0 = arith.constant 0 : i32
    %c0_i32_1 = arith.constant 0 : i32
    return %arg0, %c0_i32, %c0_i32_0 : i32, i32, i32
  }
  func.func @transform_5(%arg0: i32) -> (i32, i32, i32) {
    %c0_i32 = arith.constant 0 : i32
    %c0_i32_0 = arith.constant 0 : i32
    %c0_i32_1 = arith.constant 0 : i32
    return %arg0, %c0_i32, %c0_i32_0 : i32, i32, i32
  }
  func.func @transform_6(%arg0: i32) -> (i32, i32) {
    %c0_i32 = arith.constant 0 : i32
    %c0_i32_0 = arith.constant 0 : i32
    %c0_i32_1 = arith.constant 0 : i32
    return %c0_i32, %c0_i32_0 : i32, i32
  }
  func.func @transform_7(%arg0: i32) -> (i32, i32) {
    %c0_i32 = arith.constant 0 : i32
    %c0_i32_0 = arith.constant 0 : i32
    %c0_i32_1 = arith.constant 0 : i32
    return %c0_i32, %c0_i32_0 : i32, i32
  }
  func.func @transform_8(%arg0: i32) -> (i32, i32) {
    %c0_i32 = arith.constant 0 : i32
    %c0_i32_0 = arith.constant 0 : i32
    %c0_i32_1 = arith.constant 0 : i32
    return %c0_i32, %c0_i32_0 : i32, i32
  }
  func.func @transform_9(%arg0: i32) -> (i32, i32, i32) {
    %c0_i32 = arith.constant 0 : i32
    %c0_i32_0 = arith.constant 0 : i32
    %c0_i32_1 = arith.constant 0 : i32
    return %arg0, %c0_i32, %c0_i32_0 : i32, i32, i32
  }
}

</mosaic_0001>

<bundles_post_ra>
// kernel: tpu_custom_call.1
= control target key start
LH: loop header
LB: loop body
LE: loop exit
PB: predicated region body
PF: predicated region fallthrough
CT: control target
= control target key end

     0   :  { %14 = vsyncpa [#allocation3], 0  ;;  %s8936_s0 = inlined_call_operand.vmem [shape: f32[2,1,256], index: 0, kind: input, shape index: {}]   ;;  %s8937_s1 = inlined_call_operand.vmem [shape: f32[2,256,1], index: 1, kind: input, shape index: {}]   ;;  %s8938_s2 = inlined_call_operand.vmem [shape: f32[2,1,256], index: 2, kind: input, shape index: {}]   ;;  %s8939_s3 = inlined_call_operand.vmem [shape: f32[2,256,1], index: 3, kind: input, shape index: {}]   ;;  %s8940_s4 = inlined_call_operand.vmem [shape: f32[2,1,256], index: 4, kind: input, shape index: {}]   ;;  %s8941_s5 = inlined_call_operand.vmem [shape: f32[2,256,1], index: 5, kind: input, shape index: {}]   ;;  %s8942_s6 = inlined_call_operand.vmem [shape: bf16[256,256], index: 6, kind: input, shape index: {}]   ;;  %s8943_s7 = inlined_call_operand.vmem [shape: bf16[256,256], index: 7, kind: input, shape index: {}]   ;;  %s8944_s8 = inlined_call_operand.vmem [shape: f32[1,256], index: 8, kind: input, shape index: {}]   ;;  %s8945_s9 = inlined_call_operand.hbm [shape: s32[2,1,256], index: 9, kind: output, shape index: {}]  }
   0x1   :  { %16 = vsyncpa [#allocation3 + $0x1], 0  ;;  %s5521_s30 = smov 0   ;;  %s5523_s10 = smov 0  }
   0x2   :  { %s5525_s11 = smov 0   ;;  %s5527_s12 = smov 0  }
   0x3 LB: > { %s5542_s13 = sadd.s32 4294967295, %s5460_s12   ;;  %s4271_s14 = sadd.s32 4294967294, %s5460_s12   ;;  %s5460_s12 = sphi %s5527_s12, %s9875_s12   ;;  %s5456_s11 = sphi %s5525_s11, %s9874_s11   ;;  %s5452_s10 = sphi %s5523_s10, %s9873_s10   ;;  %s5448_s30 = sphi %s5521_s30, %s9872_s30  }
   0x4   : > { %s5546_s15 = sadd.s32 1, %s5460_s12   ;;  %s248_s16 = sadd.s32 1, %s5456_s11 }
   0x5   : > { %s245_s17 = ssub.s32 %s5460_s12, %s5546_s15  ;;  %p258_p0 = scmp.ne.s32.totalorder %s5456_s11, %s5452_s10 }
   0x6   : > { %p246_p1 = scmp.eq.s32.totalorder %s245_s17, 0  ;;  %p259_p2 = scmp.eq.s32.totalorder %s5542_s13, 1 }
   0x7   : > { %p264_p3 = scmp.ne.s32.totalorder %s5452_s10, %s5448_s30  ;;  %p265_p4 = scmp.eq.s32.totalorder %s4271_s14, 1 }
   0x8   : > { %s5557_s18 = scalar_select %p246_p1, %s5456_s11, %s248_s16  }
   0x9   : > { %p5559_p5 = por %p259_p2, %p258_p0  ;;  %p5563_p6 = por %p265_p4, %p264_p3 }
   0xa   : > { %p4274_p7 = scmp.ge.s32.totalorder %s5460_s12, 1  ;;  %p337_p8 = scmp.lt.s32.totalorder %s5460_s12, 3 }
   0xc   : > { %p338_p9 = pnand %p4274_p7, %p337_p8 }
   0xe   : > { %341 = sbr.rel (%p338_p9) target bundleno = 2417 (0x971), region = 56 }
  0x15   : > { %p395_p10 = scmp.lt.s32.totalorder %s5542_s13, 1  ;;  %v8948_v0 = vlaneseq  ;;  %v5462_v1 = vmov 1065369472   ;;  %s5470_s27 = smov [#allocation2]  }
  0x16   : > { %4835 = vmatprep.subr.bf16.mxu0 %v5462_v1 }
  0x17   : > { %4836 = vmatpush3.bf16.msra.mxu0 %v5462_v1  ;;  %s396_s21 = scalar_select %p395_p10, %s5542_s13, 1  ;;  %v5574_v2 = vshrl.u32 %v8948_v0, 7 }
  0x18   : > { %4837 = vmatprep.subr.bf16.mxu0 %v5462_v1 }
  0x19   : > { %9153 = vst [vmem:[#allocation5_spill] sm:$0xff] %v5574_v2  ;;  %s5577_s22 = sshll.u32 %s396_s21, 1  ;;  %s5579_s23 = sshll.u32 %s396_s21, 8  ;;  %v5592_v3 = vsub.s32 0, %v5574_v2  ;;  %v5595_v4 = vsub.s32 1, %v5574_v2  ;;  %v5601_v8 = vadd.s32 8, %v5574_v2 }
  0x1a   : > { %s398_s26 = scalar_lea.vmem %s8936_s0, %s5577_s22  ;;  %s5589_s29 = scalar_lea.vmem %s8937_s1, %s5579_s23  ;;  %v5604_v9 = vadd.s32 16, %v5574_v2  ;;  %v5608_v12 = vadd.s32 24, %v5574_v2  ;;  %v5611_v13 = vadd.s32 32, %v5574_v2  ;;  %v5617_v18 = vadd.s32 40, %v5574_v2 }
  0x1b   : > { %9154 = vst [vmem:[#allocation6_spill] sm:$0xff] %v5592_v3  ;;  %9155 = vst [vmem:[#allocation7_spill] sm:$0xff] %v5595_v4  ;;  %4838 = vmatpush3.bf16.msra.mxu0 %v5462_v1  ;;  %v424_v5 = vld [vmem:[%s398_s26] sm:$0x3]  ;;  %v442_v7 = vld [vmem:[%s5589_s29 + $0x88] sm:$0xff]  ;;  %v5620_v19 = vadd.s32 48, %v5574_v2  ;;  %s8212_s28 = scalar_lea.vmem %s8939_s3, %s5579_s23  ;;  %s8224_s25 = scalar_lea.vmem %s8941_s5, %s5579_s23 }
  0x1c   : > { %v441_v6 = vld [vmem:[%s5589_s29 + $0x80] sm:$0xff]  ;;  %9156 = vst [vmem:[#allocation8_spill] sm:$0xff] %v5601_v8  ;;  %9157 = vst [vmem:[#allocation9_spill] sm:$0xff] %v5604_v9  ;;  %4839 = vmatprep.subr.bf16.mxu0 %v5462_v1  ;;  %v523_v10 = vmul.f32 255.0, %v424_v5  ;;  %v845_v14 = vmul.f32 255.0, %v442_v7  ;;  %v426_v16 = vld [vmem:[%s5589_s29 + $0x8] sm:$0xff]  ;;  %s416_s17 = scalar_lea.vmem %s8940_s4, %s5577_s22  ;;  %s407_s26 = scalar_lea.vmem %s8938_s2, %s5577_s22 }
  0x1d   : > { %v844_v11 = vmul.f32 255.0, %v441_v6  ;;  %9158 = vst [vmem:[#allocation10_spill] sm:$0xff] %v5608_v12  ;;  %9159 = vst [vmem:[#allocation11_spill] sm:$0xff] %v5611_v13  ;;  %v425_v15 = vld [vmem:[%s5589_s29] sm:$0xff]  ;;  %v443_v17 = vld [vmem:[%s5589_s29 + $0x90] sm:$0xff]  ;;  %v5625_v25 = vadd.s32 56, %v5574_v2 }
  0x1e   : > { %9160 = vst [vmem:[#allocation12_spill] sm:$0xff] %v5617_v18  ;;  %9161 = vst [vmem:[#allocation13_spill] sm:$0xff] %v5620_v19  ;;  %v5059_v20 = vtrunc.f32 %v523_v10  ;;  %v828_v22 = vmul.f32 255.0, %v425_v15  ;;  %v444_v23 = vld [vmem:[%s5589_s29 + $0x98] sm:$0xff]  ;;  %v427_v24 = vld [vmem:[%s5589_s29 + $0x10] sm:$0xff]  ;;  %v5095_v26 = vtrunc.f32 %v845_v14  ;;  %v829_v27 = vmul.f32 255.0, %v426_v16 }
  0x1f   : > { %v5093_v21 = vtrunc.f32 %v844_v11  ;;  %9162 = vst [vmem:[#allocation14_spill] sm:$0xff] %v5625_v25  ;;  %4840 = vmatpush3.bf16.msra.mxu0 %v5462_v1  ;;  %v846_v28 = vmul.f32 255.0, %v443_v17  ;;  %v847_v29 = vmul.f32 255.0, %v444_v23  ;;  %v830_v33 = vmul.f32 255.0, %v427_v24  ;;  %v428_v38 = vld [vmem:[%s5589_s29 + $0x18] sm:$0xff]  ;;  %v445_v39 = vld [vmem:[%s5589_s29 + $0xa0] sm:$0xff] }
  0x20   : > { %4841 = vmatprep.subr.bf16.mxu0 %v5462_v1  ;;  %v5629_v30 = vcvt.f32.s32 %v5059_v20  ;;  %v5061_v32 = vtrunc.f32 %v828_v22  ;;  %v5096_v34 = vcvt.f32.s32 %v5095_v26  ;;  %v5063_v35 = vtrunc.f32 %v829_v27  ;;  %v446_v48 = vld [vmem:[%s5589_s29 + $0xa8] sm:$0xff]  ;;  %v429_v53 = vld [vmem:[%s5589_s29 + $0x20] sm:$0xff]  ;;  %v447_v63 = vld [vmem:[%s5589_s29 + $0xb0] sm:$0xff]  ;;  %s392_s23 = sand.u32 1, %s5452_s10  }
  0x21   : > { %v5094_v31 = vcvt.f32.s32 %v5093_v21  ;;  %v5097_v36 = vtrunc.f32 %v846_v28  ;;  %v5099_v37 = vtrunc.f32 %v847_v29  ;;  %v831_v50 = vmul.f32 255.0, %v428_v38  ;;  %v430_v54 = vld [vmem:[%s5589_s29 + $0x28] sm:$0xff]  ;;  %v448_v5 = vld [vmem:[%s5589_s29 + $0xb8] sm:$0xff]  ;;  %v431_v6 = vld [vmem:[%s5589_s29 + $0x30] sm:$0xff]  ;;  %s4275_s16 = sshll.u32 %s392_s23, 1 }
  0x22   : > { %9163 = vst [vmem:[#allocation15_spill] sm:$0xff] %v5629_v30  ;;  %v5635_v40 = vrot.slane %v5629_v30, %v5592_v3  ;;  %v5639_v41 = vrot.slane %v5629_v30, %v5595_v4  ;;  %v5062_v43 = vcvt.f32.s32 %v5061_v32  ;;  %v909_v44 = vcvt.s32.f32 %v5096_v34  ;;  %v432_v15 = vld [vmem:[%s5589_s29 + $0x38] sm:$0xff]  ;;  %s394_s21 = scalar_lea.vmem [#allocation2], %s4275_s16 }
  0x23   : > { %v908_v42 = vcvt.s32.f32 %v5094_v31  ;;  %4842 = vmatpush3.bf16.msra.mxu0 %v5462_v1  ;;  %v5064_v45 = vcvt.f32.s32 %v5063_v35  ;;  %v5098_v46 = vcvt.f32.s32 %v5097_v36  ;;  %v5100_v47 = vcvt.f32.s32 %v5099_v37  ;;  %s4152_s24 = sshll.u32 %s394_s21, 4  ;;  %s8896_s24 = int_to_ptr.vmem [resolvable:$true] %s4152_s24 }
  0x24   : > { %9164 = vst [vmem:[#allocation16_spill] sm:$0xff] %v5635_v40  ;;  %9165 = vst [vmem:[#allocation17_spill] sm:$0xff] %v5639_v41  ;;  %4843 = vmatprep.subr.bf16.mxu0 %v5462_v1  ;;  %v892_v49 = vcvt.s32.f32 %v5062_v43  ;;  %v5065_v51 = vtrunc.f32 %v830_v33  ;;  %v848_v52 = vmul.f32 255.0, %v445_v39  ;;  %v5067_v60 = vtrunc.f32 %v831_v50  ;;  %v450_v43 = vld [vmem:[%s5589_s29 + $0xc8] sm:$0xff]  ;;  %v451_v50 = vld [vmem:[%s5589_s29 + $0xd0] sm:$0xff] }
  0x25   : > { %v932_v55 = vpack.c.bf16 %v909_v44, %v908_v42  ;;  %v893_v56 = vcvt.s32.f32 %v5064_v45  ;;  %v910_v57 = vcvt.s32.f32 %v5098_v46  ;;  %v911_v58 = vcvt.s32.f32 %v5100_v47  ;;  %v449_v42 = vld [vmem:[%s5589_s29 + $0xc0] sm:$0xff] }
  0x26   : > { %v5066_v59 = vcvt.f32.s32 %v5065_v51  ;;  %v849_v61 = vmul.f32 255.0, %v446_v48  ;;  %v5101_v62 = vtrunc.f32 %v848_v52  ;;  %v832_v11 = vmul.f32 255.0, %v429_v53  ;;  %v433_v44 = vld [vmem:[%s5589_s29 + $0x40] sm:$0xff]  ;;  %v452_v51 = vld [vmem:[%s5589_s29 + $0xd8] sm:$0xff] }
  0x27   : > { %4947 = vmatprep.subr.bf16.mxu1 %v932_v55  ;;  %4844 = vmatpush3.bf16.msra.mxu0 %v5462_v1  ;;  %v924_v7 = vpack.c.bf16 %v893_v56, %v892_v49  ;;  %v933_v10 = vpack.c.bf16 %v911_v58, %v910_v57  ;;  %v833_v14 = vmul.f32 255.0, %v430_v54  ;;  %v5068_v16 = vcvt.f32.s32 %v5067_v60  ;;  %v434_v49 = vld [vmem:[%s5589_s29 + $0x48] sm:$0xff]  ;;  %v435_v55 = vld [vmem:[%s5589_s29 + $0x50] sm:$0xff] }
  0x28   : > { %4845 = vmatprep.subr.bf16.mxu0 %v5462_v1  ;;  %v894_v17 = vcvt.s32.f32 %v5066_v59  ;;  %v5102_v20 = vcvt.f32.s32 %v5101_v62  ;;  %v5103_v21 = vtrunc.f32 %v849_v61  ;;  %v5069_v22 = vtrunc.f32 %v832_v11  ;;  %v436_v61 = vld [vmem:[%s5589_s29 + $0x58] sm:$0xff] }
  0x29   : > { %4948 = vmatpush3.bf16.msra.mxu1 %v924_v7  ;;  %v5071_v23 = vtrunc.f32 %v833_v14  ;;  %v850_v24 = vmul.f32 255.0, %v447_v63  ;;  %v851_v26 = vmul.f32 255.0, %v448_v5  ;;  %v895_v27 = vcvt.s32.f32 %v5068_v16 }
  0x2a   : > { %4949 = vmatprep.subr.bf16.mxu1 %v933_v10  ;;  %v5104_v28 = vcvt.f32.s32 %v5103_v21  ;;  %v912_v29 = vcvt.s32.f32 %v5102_v20  ;;  %v834_v31 = vmul.f32 255.0, %v431_v6  ;;  %v5070_v32 = vcvt.f32.s32 %v5069_v22 }
  0x2b   : > { %4846 = vmatpush3.bf16.msra.mxu0 %v5462_v1  ;;  %v5072_v33 = vcvt.f32.s32 %v5071_v23  ;;  %v5105_v34 = vtrunc.f32 %v850_v24  ;;  %v5107_v35 = vtrunc.f32 %v851_v26  ;;  %v925_v36 = vpack.c.bf16 %v895_v27, %v894_v17 }
  0x2c   : > { %4847 = vmatprep.subr.bf16.mxu0 %v5462_v1  ;;  %v913_v37 = vcvt.s32.f32 %v5104_v28  ;;  %v835_v38 = vmul.f32 255.0, %v432_v15  ;;  %v5073_v39 = vtrunc.f32 %v834_v31  ;;  %v896_v45 = vcvt.s32.f32 %v5070_v32 }
  0x2d   : > { %v897_v46 = vcvt.s32.f32 %v5072_v33  ;;  %v5106_v47 = vcvt.f32.s32 %v5105_v34  ;;  %v5108_v48 = vcvt.f32.s32 %v5107_v35  ;;  %4950 = vmatpush3.bf16.msra.mxu1 %v925_v36  ;;  %vm605_vm0 = vcmp.le.s32.totalorder %v5639_v41, %v5574_v2  ;;  %v453_v36 = vld [vmem:[%s5589_s29 + $0xe0] sm:$0xff] }
  0x2e   : > { %v934_v52 = vpack.c.bf16 %v913_v37, %v912_v29  ;;  %v5074_v53 = vcvt.f32.s32 %v5073_v39  ;;  %v5075_v54 = vtrunc.f32 %v835_v38  ;;  %vm607_vm1 = vcmp.le.s32.totalorder %v5639_v41, %v5601_v8  ;;  %v454_v37 = vld [vmem:[%s5589_s29 + $0xe8] sm:$0xff] }
  0x2f   : > { %4848 = vmatpush3.bf16.msra.mxu0 %v5462_v1  ;;  %v926_v56 = vpack.c.bf16 %v897_v46, %v896_v45  ;;  %v914_v57 = vcvt.s32.f32 %v5106_v47  ;;  %v915_v58 = vcvt.s32.f32 %v5108_v48  ;;  %vm4349_vm2 = vmpackc.low %vm607_vm1, %vm605_vm0  ;;  %vm604_vm3 = vcmp.le.s32.totalorder %v5635_v40, %v5574_v2 }
  0x30   : > { %4951 = vmatprep.subr.bf16.mxu1 %v934_v52  ;;  %4849 = vmatprep.subr.bf16.mxu0 %v5462_v1  ;;  %v5076_v59 = vcvt.f32.s32 %v5075_v54  ;;  %v898_v60 = vcvt.s32.f32 %v5074_v53  ;;  %vm606_vm4 = vcmp.le.s32.totalorder %v5635_v40, %v5601_v8  ;;  %v8946_v63 = vmov 1.0|1.0   ;;  %v455_v52 = vld [vmem:[%s5589_s29 + $0xf0] sm:$0xff]  ;;  %v456_v53 = vld [vmem:[%s5589_s29 + $0xf8] sm:$0xff] }
  0x31   : > { %v935_v62 = vpack.c.bf16 %v915_v58, %v914_v57  ;;  %4350 = vmatprep.mubr.msk.bf16.mxu0 %vm4349_vm2, %v8946_v63  ;;  %vm5673_vm5 = vmpackc.low %vm606_vm4, %vm604_vm3  ;;  %v852_v6 = vmul.f32 255.0, %v449_v42  ;;  %v853_v7 = vmul.f32 255.0, %v450_v43  ;;  %v836_v10 = vmul.f32 255.0, %v433_v44  ;;  %4414 = vmatprep.mubr.msk.bf16.mxu1 %vm4349_vm2, %v8946_v63  ;;  %v437_v44 = vld [vmem:[%s5589_s29 + $0x60] sm:$0xff]  ;;  %v439_v58 = vld [vmem:[%s5589_s29 + $0x70] sm:$0xff] }
  0x32   : > { %4952 = vmatpush3.bf16.msra.mxu1 %v926_v56  ;;  %v899_v11 = vcvt.s32.f32 %v5076_v59  ;;  %v837_v14 = vmul.f32 255.0, %v434_v49  ;;  %v854_v15 = vmul.f32 255.0, %v451_v50  ;;  %v855_v16 = vmul.f32 255.0, %v452_v51  ;;  %v438_v51 = vld [vmem:[%s5589_s29 + $0x68] sm:$0xff] }
  0x33   : > { %4953 = vmatprep.subr.bf16.mxu1 %v935_v62  ;;  %4850 = vmatpush3.bf16.msra.mxu0 %v5462_v1  ;;  %v5109_v17 = vtrunc.f32 %v852_v6  ;;  %v5111_v20 = vtrunc.f32 %v853_v7  ;;  %v5077_v21 = vtrunc.f32 %v836_v10  ;;  %v838_v22 = vmul.f32 255.0, %v435_v55 }
  0x34   : > { %v927_v23 = vpack.c.bf16 %v899_v11, %v898_v60  ;;  %v5079_v24 = vtrunc.f32 %v837_v14  ;;  %v5113_v26 = vtrunc.f32 %v854_v15  ;;  %v5115_v27 = vtrunc.f32 %v855_v16  ;;  %v440_v14 = vld [vmem:[%s5589_s29 + $0x78] sm:$0xff]  ;;  %s5402_s29 = sshll.u32 %s5470_s27, 4  ;;  %s5403_s29 = int_to_ptr.vmem [resolvable:$false] %s5402_s29 }
  0x35   : > { %v5110_v28 = vcvt.f32.s32 %v5109_v17  ;;  %v5112_v29 = vcvt.f32.s32 %v5111_v20  ;;  %v5078_v31 = vcvt.f32.s32 %v5077_v21  ;;  %v839_v32 = vmul.f32 255.0, %v436_v61  ;;  %s5404_s14 = scalar_lea.vmem %s5403_s29, 64  ;;  %p5405_p0 = scmp.lt.s32.totalorder %s8896_s24, %s5403_s29 }
  0x36   : > { %4954 = vmatpush3.bf16.msra.mxu1 %v927_v23  ;;  %4352 = vmatmul.mubr.msk.bf16.vlgmr.msra.gmra.mrb[0].mxu0 %vm5673_vm5, %v8946_v63  ;;  %v5080_v1 = vcvt.f32.s32 %v5079_v24  ;;  %v5114_v33 = vcvt.f32.s32 %v5113_v26  ;;  %v5116_v34 = vcvt.f32.s32 %v5115_v27  ;;  %v5081_v35 = vtrunc.f32 %v838_v22 }
  0x37   : > { %v916_v38 = vcvt.s32.f32 %v5110_v28  ;;  %v917_v39 = vcvt.s32.f32 %v5112_v29  ;;  %v900_v42 = vcvt.s32.f32 %v5078_v31  ;;  %v5083_v43 = vtrunc.f32 %v839_v32 }
  0x38   : > { %v901_v45 = vcvt.s32.f32 %v5080_v1  ;;  %v918_v46 = vcvt.s32.f32 %v5114_v33  ;;  %v919_v47 = vcvt.s32.f32 %v5116_v34  ;;  %v5082_v48 = vcvt.f32.s32 %v5081_v35 }
  0x39   : > { %v936_v49 = vpack.c.bf16 %v917_v39, %v916_v38  ;;  %v5084_v50 = vcvt.f32.s32 %v5083_v43  ;;  %vm609_vm6 = vcmp.le.s32.totalorder %v5639_v41, %v5604_v9  ;;  %vm611_vm7 = vcmp.le.s32.totalorder %v5639_v41, %v5608_v12 }
  0x3a   : > { %v928_v54 = vpack.c.bf16 %v901_v45, %v900_v42  ;;  %v937_v55 = vpack.c.bf16 %v919_v47, %v918_v46  ;;  %v902_v56 = vcvt.s32.f32 %v5082_v48  ;;  %vm5692_vm8 = vmpackc.low %vm611_vm7, %vm609_vm6  ;;  %vm608_vm9 = vcmp.le.s32.totalorder %v5635_v40, %v5604_v9 }
  0x3b   : > { %4955 = vmatprep.subr.bf16.mxu1 %v936_v49  ;;  %v903_v59 = vcvt.s32.f32 %v5084_v50  ;;  %4354 = vmatprep.mubr.msk.bf16.mxu0 %vm5692_vm8, %v8946_v63  ;;  %vm610_vm10 = vcmp.le.s32.totalorder %v5635_v40, %v5608_v12  ;;  %v856_v60 = vmul.f32 255.0, %v453_v36  ;;  %v857_v61 = vmul.f32 255.0, %v454_v37 }
  0x3c   : > { %4956 = vmatpush3.bf16.msra.mxu1 %v928_v54  ;;  %vm5704_vm11 = vmpackc.low %vm610_vm10, %vm608_vm9  ;;  %v840_v6 = vmul.f32 255.0, %v437_v44  ;;  %v841_v7 = vmul.f32 255.0, %v438_v51  ;;  %v858_v10 = vmul.f32 255.0, %v455_v52  ;;  %v859_v11 = vmul.f32 255.0, %v456_v53 }
  0x3d   : > { %4957 = vmatprep.subr.bf16.mxu1 %v937_v55  ;;  %v929_v15 = vpack.c.bf16 %v903_v59, %v902_v56  ;;  %v5117_v16 = vtrunc.f32 %v856_v60  ;;  %v5119_v17 = vtrunc.f32 %v857_v61  ;;  %v842_v20 = vmul.f32 255.0, %v439_v58 }
  0x3e   : > { %4356 = vmatmul.mubr.msk.bf16.gmra.mrb[4].mxu0 %vm5704_vm11, %v8946_v63  ;;  %v5085_v21 = vtrunc.f32 %v840_v6  ;;  %v5087_v22 = vtrunc.f32 %v841_v7  ;;  %v5121_v23 = vtrunc.f32 %v858_v10  ;;  %v5123_v24 = vtrunc.f32 %v859_v11 }
  0x3f   : > { %v5118_v26 = vcvt.f32.s32 %v5117_v16  ;;  %v5120_v27 = vcvt.f32.s32 %v5119_v17  ;;  %v843_v28 = vmul.f32 255.0, %v440_v14  ;;  %v5089_v29 = vtrunc.f32 %v842_v20 }
  0x40   : > { %4958 = vmatpush3.bf16.msra.mxu1 %v929_v15  ;;  %v5086_v31 = vcvt.f32.s32 %v5085_v21  ;;  %v5088_v32 = vcvt.f32.s32 %v5087_v22  ;;  %v5122_v1 = vcvt.f32.s32 %v5121_v23  ;;  %v5124_v33 = vcvt.f32.s32 %v5123_v24 }
  0x41   : > { %v920_v34 = vcvt.s32.f32 %v5118_v26  ;;  %v921_v35 = vcvt.s32.f32 %v5120_v27  ;;  %v5090_v36 = vcvt.f32.s32 %v5089_v29  ;;  %v5091_v37 = vtrunc.f32 %v843_v28 }
  0x42   : > { %v904_v38 = vcvt.s32.f32 %v5086_v31  ;;  %v905_v39 = vcvt.s32.f32 %v5088_v32  ;;  %v922_v42 = vcvt.s32.f32 %v5122_v1  ;;  %v923_v43 = vcvt.s32.f32 %v5124_v33 }
  0x43   : > { %v938_v44 = vpack.c.bf16 %v921_v35, %v920_v34  ;;  %v5092_v45 = vcvt.f32.s32 %v5091_v37  ;;  %v906_v46 = vcvt.s32.f32 %v5090_v36  ;;  %vm613_vm12 = vcmp.le.s32.totalorder %v5639_v41, %v5611_v13 }
  0x44   : > { %v930_v47 = vpack.c.bf16 %v905_v39, %v904_v38  ;;  %v939_v48 = vpack.c.bf16 %v923_v43, %v922_v42  ;;  %vm615_vm13 = vcmp.le.s32.totalorder %v5639_v41, %v5617_v18  ;;  %vm612_vm14 = vcmp.le.s32.totalorder %v5635_v40, %v5611_v13 }
  0x45   : > { %4959 = vmatprep.subr.bf16.mxu1 %v938_v44  ;;  %v907_v49 = vcvt.s32.f32 %v5092_v45  ;;  %vm5718_vm15 = vmpackc.low %vm615_vm13, %vm613_vm12  ;;  %vm614_vm0 = vcmp.le.s32.totalorder %v5635_v40, %v5617_v18  ;;  %vm617_vm1 = vcmp.le.s32.totalorder %v5639_v41, %v5620_v19  ;;  %vm619_vm2 = vcmp.le.s32.totalorder %v5639_v41, %v5625_v25 }
  0x46   : > { %4960 = vmatpush3.bf16.msra.mxu1 %v930_v47  ;;  %4358 = vmatprep.mubr.msk.bf16.mxu0 %vm5718_vm15, %v8946_v63  ;;  %vm5731_vm3 = vmpackc.low %vm614_vm0, %vm612_vm14  ;;  %v5736_v52 = vadd.s32 64, %v5574_v2  ;;  %v5739_v53 = vadd.s32 72, %v5574_v2  ;;  %vm616_vm6 = vcmp.le.s32.totalorder %v5635_v40, %v5620_v19  ;;  %vm618_vm7 = vcmp.le.s32.totalorder %v5635_v40, %v5625_v25 }
  0x47   : > { %4961 = vmatprep.subr.bf16.mxu1 %v939_v48  ;;  %v931_v54 = vpack.c.bf16 %v907_v49, %v906_v46  ;;  %4360 = vmatmul.mubr.msk.bf16.gmra.mrb[8].mxu0 %vm5731_vm3, %v8946_v63  ;;  %vm5744_vm4 = vmpackc.low %vm619_vm2, %vm617_vm1  ;;  %v5774_v59 = vadd.s32 80, %v5574_v2  ;;  %v5777_v60 = vadd.s32 88, %v5574_v2  ;;  %v5808_v61 = vadd.s32 96, %v5574_v2 }
  0x48   : > { %9176 = vst [vmem:[#allocation18_spill] sm:$0xff] %v5736_v52  ;;  %9177 = vst [vmem:[#allocation19_spill] sm:$0xff] %v5739_v53  ;;  %4362 = vmatprep.mubr.msk.bf16.mxu0 %vm5744_vm4, %v8946_v63  ;;  %vm621_vm9 = vcmp.le.s32.totalorder %v5639_v41, %v5736_v52  ;;  %vm623_vm10 = vcmp.le.s32.totalorder %v5639_v41, %v5739_v53  ;;  %v5811_v6 = vadd.s32 104, %v5574_v2  ;;  %v5842_v10 = vadd.s32 112, %v5574_v2 }
  0x49   : > { %vm5759_vm12 = vmpackc.low %vm618_vm7, %vm616_vm6  ;;  %9184 = vst [vmem:[#allocation20_spill] sm:$0xff] %v5774_v59  ;;  %vm625_vm14 = vcmp.le.s32.totalorder %v5639_v41, %v5774_v59  ;;  %vm627_vm0 = vcmp.le.s32.totalorder %v5639_v41, %v5777_v60  ;;  %vm629_vm6 = vcmp.le.s32.totalorder %v5639_v41, %v5808_v61  ;;  %v5845_v11 = vadd.s32 120, %v5574_v2 }
  0x4a   : > { %4962 = vmatpush3.bf16.msra.mxu1 %v931_v54  ;;  %vm5766_vm13 = vmpackc.low %vm623_vm10, %vm621_vm9  ;;  %9185 = vst [vmem:[#allocation21_spill] sm:$0xff] %v5777_v60  ;;  %vm631_vm7 = vcmp.le.s32.totalorder %v5639_v41, %v5811_v6  ;;  %v5876_v16 = vadd.s32 128, %v5574_v2  ;;  %v5879_v17 = vadd.s32 136, %v5574_v2  ;;  %v5910_v22 = vadd.s32 144, %v5574_v2 }
  0x4b   : > { %vm5800_vm2 = vmpackc.low %vm627_vm0, %vm625_vm14  ;;  %9190 = vst [vmem:[#allocation22_spill] sm:$0xff] %v5808_v61  ;;  %v5913_v23 = vadd.s32 152, %v5574_v2  ;;  %v5944_v27 = vadd.s32 160, %v5574_v2  ;;  %v5947_v28 = vadd.s32 168, %v5574_v2  ;;  %v5978_v32 = vadd.s32 176, %v5574_v2 }
  0x4c   : > { %9191 = vst [vmem:[#allocation23_spill] sm:$0xff] %v5811_v6  ;;  %vm5834_vm10 = vmpackc.low %vm631_vm7, %vm629_vm6  ;;  %v5981_v1 = vadd.s32 184, %v5574_v2  ;;  %v6012_v35 = vadd.s32 192, %v5574_v2  ;;  %v6015_v36 = vadd.s32 200, %v5574_v2  ;;  %v6046_v39 = vadd.s32 208, %v5574_v2 }
  0x4d   : > { %4416 = vmatmul.mubr.msk.bf16.vlgmr.msra.gmra.mrb[0].mxu1 %vm5673_vm5, %v8946_v63  ;;  %vm620_vm5 = vcmp.le.s32.totalorder %v5635_v40, %v5736_v52  ;;  %9196 = vst [vmem:[#allocation24_spill] sm:$0xff] %v5842_v10  ;;  %9197 = vst [vmem:[#allocation25_spill] sm:$0xff] %v5845_v11  ;;  %v6049_v42 = vadd.s32 216, %v5574_v2  ;;  %v6080_v45 = vadd.s32 224, %v5574_v2  ;;  %v6083_v46 = vadd.s32 232, %v5574_v2 }
  0x4e   : > { %4418 = vmatprep.mubr.msk.bf16.mxu1 %vm5692_vm8, %v8946_v63  ;;  %vm622_vm8 = vcmp.le.s32.totalorder %v5635_v40, %v5739_v53  ;;  %9202 = vst [vmem:[#allocation26_spill] sm:$0xff] %v5876_v16  ;;  %9203 = vst [vmem:[#allocation27_spill] sm:$0xff] %v5879_v17  ;;  %v6114_v49 = vadd.s32 240, %v5574_v2  ;;  %v6117_v50 = vadd.s32 248, %v5574_v2 }
  0x4f   : > { %4364 = vmatmul.mubr.msk.bf16.gmra.mrb[12].mxu0 %vm5759_vm12, %v8946_v63  ;;  %vm5793_vm1 = vmpackc.low %vm622_vm8, %vm620_vm5  ;;  %vm633_vm5 = vcmp.le.s32.totalorder %v5639_v41, %v5842_v10  ;;  %vm635_vm8 = vcmp.le.s32.totalorder %v5639_v41, %v5845_v11  ;;  %9208 = vst [vmem:[#allocation28_spill] sm:$0xff] %v5910_v22 }
  0x50   : > { %4366 = vmatprep.mubr.msk.bf16.mxu0 %vm5766_vm13, %v8946_v63  ;;  %vm5868_vm0 = vmpackc.low %vm635_vm8, %vm633_vm5  ;;  %9209 = vst [vmem:[#allocation29_spill] sm:$0xff] %v5913_v23 }
  0x51   : > { %9214 = vst [vmem:[#allocation30_spill] sm:$0xff] %v5944_v27  ;;  %9215 = vst [vmem:[#allocation31_spill] sm:$0xff] %v5947_v28 }
  0x52   : > { %9220 = vst [vmem:[#allocation32_spill] sm:$0xff] %v5978_v32  ;;  %9221 = vst [vmem:[#allocation33_spill] sm:$0xff] %v5981_v1 }
  0x53   : > { %9226 = vst [vmem:[#allocation34_spill] sm:$0xff] %v6012_v35  ;;  %9227 = vst [vmem:[#allocation35_spill] sm:$0xff] %v6015_v36 }
  0x54   : > { %9232 = vst [vmem:[#allocation36_spill] sm:$0xff] %v6046_v39  ;;  %9233 = vst [vmem:[#allocation37_spill] sm:$0xff] %v6049_v42 }
  0x55   : > { %4420 = vmatmul.mubr.msk.bf16.gmra.mrb[4].mxu1 %vm5704_vm11, %v8946_v63  ;;  %vm624_vm11 = vcmp.le.s32.totalorder %v5635_v40, %v5774_v59  ;;  %9238 = vst [vmem:[#allocation38_spill] sm:$0xff] %v6080_v45  ;;  %9239 = vst [vmem:[#allocation39_spill] sm:$0xff] %v6083_v46 }
  0x56   : > { %4422 = vmatprep.mubr.msk.bf16.mxu1 %vm5718_vm15, %v8946_v63  ;;  %vm626_vm15 = vcmp.le.s32.totalorder %v5635_v40, %v5777_v60  ;;  %9244 = vst [vmem:[#allocation40_spill] sm:$0xff] %v6114_v49  ;;  %9245 = vst [vmem:[#allocation41_spill] sm:$0xff] %v6117_v50 }
  0x57   : > { %4368 = vmatmul.mubr.msk.bf16.gmra.mrb[16].mxu0 %vm5793_vm1, %v8946_v63  ;;  %vm5827_vm9 = vmpackc.low %vm626_vm15, %vm624_vm11  ;;  %vm637_vm11 = vcmp.le.s32.totalorder %v5639_v41, %v5876_v16  ;;  %vm639_vm15 = vcmp.le.s32.totalorder %v5639_v41, %v5879_v17 }
  0x58   : > { %4370 = vmatprep.mubr.msk.bf16.mxu0 %vm5800_vm2, %v8946_v63  ;;  %vm5902_vm7 = vmpackc.low %vm639_vm15, %vm637_vm11 }
  0x5d   : > { %4424 = vmatmul.mubr.msk.bf16.gmra.mrb[8].mxu1 %vm5731_vm3, %v8946_v63  ;;  %vm628_vm3 = vcmp.le.s32.totalorder %v5635_v40, %v5808_v61 }
  0x5e   : > { %4426 = vmatprep.mubr.msk.bf16.mxu1 %vm5744_vm4, %v8946_v63  ;;  %vm630_vm4 = vcmp.le.s32.totalorder %v5635_v40, %v5811_v6 }
  0x5f   : > { %4372 = vmatmul.mubr.msk.bf16.gmra.mrb[20].mxu0 %vm5827_vm9, %v8946_v63  ;;  %vm5861_vm14 = vmpackc.low %vm630_vm4, %vm628_vm3  ;;  %vm641_vm3 = vcmp.le.s32.totalorder %v5639_v41, %v5910_v22  ;;  %vm643_vm4 = vcmp.le.s32.totalorder %v5639_v41, %v5913_v23 }
  0x60   : > { %4374 = vmatprep.mubr.msk.bf16.mxu0 %vm5834_vm10, %v8946_v63  ;;  %vm5936_vm8 = vmpackc.low %vm643_vm4, %vm641_vm3 }
  0x65   : > { %4428 = vmatmul.mubr.msk.bf16.gmra.mrb[12].mxu1 %vm5759_vm12, %v8946_v63  ;;  %vm632_vm12 = vcmp.le.s32.totalorder %v5635_v40, %v5842_v10 }
  0x66   : > { %4430 = vmatprep.mubr.msk.bf16.mxu1 %vm5766_vm13, %v8946_v63  ;;  %vm634_vm13 = vcmp.le.s32.totalorder %v5635_v40, %v5845_v11 }
  0x67   : > { %4376 = vmatmul.mubr.msk.bf16.gmra.mrb[24].mxu0 %vm5861_vm14, %v8946_v63  ;;  %vm5895_vm6 = vmpackc.low %vm634_vm13, %vm632_vm12  ;;  %vm645_vm12 = vcmp.le.s32.totalorder %v5639_v41, %v5944_v27  ;;  %vm647_vm13 = vcmp.le.s32.totalorder %v5639_v41, %v5947_v28 }
  0x68   : > { %4378 = vmatprep.mubr.msk.bf16.mxu0 %vm5868_vm0, %v8946_v63  ;;  %vm5970_vm15 = vmpackc.low %vm647_vm13, %vm645_vm12 }
  0x6d   : > { %4432 = vmatmul.mubr.msk.bf16.gmra.mrb[16].mxu1 %vm5793_vm1, %v8946_v63  ;;  %vm636_vm1 = vcmp.le.s32.totalorder %v5635_v40, %v5876_v16 }
  0x6e   : > { %4434 = vmatprep.mubr.msk.bf16.mxu1 %vm5800_vm2, %v8946_v63  ;;  %vm638_vm2 = vcmp.le.s32.totalorder %v5635_v40, %v5879_v17 }
  0x6f   : > { %4380 = vmatmul.mubr.msk.bf16.gmra.mrb[28].mxu0 %vm5895_vm6, %v8946_v63  ;;  %vm5929_vm5 = vmpackc.low %vm638_vm2, %vm636_vm1  ;;  %vm649_vm1 = vcmp.le.s32.totalorder %v5639_v41, %v5978_v32  ;;  %vm651_vm2 = vcmp.le.s32.totalorder %v5639_v41, %v5981_v1 }
  0x70   : > { %4382 = vmatprep.mubr.msk.bf16.mxu0 %vm5902_vm7, %v8946_v63  ;;  %vm6004_vm4 = vmpackc.low %vm651_vm2, %vm649_vm1 }
  0x75   : > { %4436 = vmatmul.mubr.msk.bf16.gmra.mrb[20].mxu1 %vm5827_vm9, %v8946_v63  ;;  %vm640_vm9 = vcmp.le.s32.totalorder %v5635_v40, %v5910_v22 }
  0x76   : > { %4438 = vmatprep.mubr.msk.bf16.mxu1 %vm5834_vm10, %v8946_v63  ;;  %vm642_vm10 = vcmp.le.s32.totalorder %v5635_v40, %v5913_v23 }
  0x77   : > { %4384 = vmatmul.mubr.msk.bf16.gmra.mrb[32].mxu0 %vm5929_vm5, %v8946_v63  ;;  %vm5963_vm11 = vmpackc.low %vm642_vm10, %vm640_vm9  ;;  %vm653_vm9 = vcmp.le.s32.totalorder %v5639_v41, %v6012_v35  ;;  %vm655_vm10 = vcmp.le.s32.totalorder %v5639_v41, %v6015_v36 }
  0x78   : > { %4386 = vmatprep.mubr.msk.bf16.mxu0 %vm5936_vm8, %v8946_v63  ;;  %vm6038_vm13 = vmpackc.low %vm655_vm10, %vm653_vm9 }
  0x7d   : > { %4440 = vmatmul.mubr.msk.bf16.gmra.mrb[24].mxu1 %vm5861_vm14, %v8946_v63  ;;  %vm644_vm14 = vcmp.le.s32.totalorder %v5635_v40, %v5944_v27 }
  0x7e   : > { %4442 = vmatprep.mubr.msk.bf16.mxu1 %vm5868_vm0, %v8946_v63  ;;  %vm646_vm0 = vcmp.le.s32.totalorder %v5635_v40, %v5947_v28 }
  0x7f   : > { %4388 = vmatmul.mubr.msk.bf16.gmra.mrb[36].mxu0 %vm5963_vm11, %v8946_v63  ;;  %vm5997_vm3 = vmpackc.low %vm646_vm0, %vm644_vm14  ;;  %vm657_vm14 = vcmp.le.s32.totalorder %v5639_v41, %v6046_v39  ;;  %vm659_vm0 = vcmp.le.s32.totalorder %v5639_v41, %v6049_v42 }
  0x80   : > { %4390 = vmatprep.mubr.msk.bf16.mxu0 %vm5970_vm15, %v8946_v63  ;;  %vm6072_vm2 = vmpackc.low %vm659_vm0, %vm657_vm14 }
  0x85   : > { %4444 = vmatmul.mubr.msk.bf16.gmra.mrb[28].mxu1 %vm5895_vm6, %v8946_v63  ;;  %vm648_vm6 = vcmp.le.s32.totalorder %v5635_v40, %v5978_v32 }
  0x86   : > { %4446 = vmatprep.mubr.msk.bf16.mxu1 %vm5902_vm7, %v8946_v63  ;;  %vm650_vm7 = vcmp.le.s32.totalorder %v5635_v40, %v5981_v1 }
  0x87   : > { %4392 = vmatmul.mubr.msk.bf16.gmra.mrb[40].mxu0 %vm5997_vm3, %v8946_v63  ;;  %vm6031_vm12 = vmpackc.low %vm650_vm7, %vm648_vm6  ;;  %vm661_vm6 = vcmp.le.s32.totalorder %v5639_v41, %v6080_v45  ;;  %vm663_vm7 = vcmp.le.s32.totalorder %v5639_v41, %v6083_v46 }
  0x88   : > { %4394 = vmatprep.mubr.msk.bf16.mxu0 %vm6004_vm4, %v8946_v63  ;;  %vm6106_vm10 = vmpackc.low %vm663_vm7, %vm661_vm6 }
  0x8d   : > { %4448 = vmatmul.mubr.msk.bf16.gmra.mrb[32].mxu1 %vm5929_vm5, %v8946_v63  ;;  %vm652_vm5 = vcmp.le.s32.totalorder %v5635_v40, %v6012_v35 }
  0x8e   : > { %4450 = vmatprep.mubr.msk.bf16.mxu1 %vm5936_vm8, %v8946_v63  ;;  %vm654_vm8 = vcmp.le.s32.totalorder %v5635_v40, %v6015_v36 }
  0x8f   : > { %4396 = vmatmul.mubr.msk.bf16.gmra.mrb[44].mxu0 %vm6031_vm12, %v8946_v63  ;;  %vm6065_vm1 = vmpackc.low %vm654_vm8, %vm652_vm5  ;;  %vm665_vm5 = vcmp.le.s32.totalorder %v5639_v41, %v6114_v49  ;;  %vm667_vm8 = vcmp.le.s32.totalorder %v5639_v41, %v6117_v50 }
  0x90   : > { %4398 = vmatprep.mubr.msk.bf16.mxu0 %vm6038_vm13, %v8946_v63  ;;  %vm4409_vm0 = vmpackc.low %vm667_vm8, %vm665_vm5 }
  0x95   : > { %4452 = vmatmul.mubr.msk.bf16.gmra.mrb[36].mxu1 %vm5963_vm11, %v8946_v63  ;;  %vm656_vm11 = vcmp.le.s32.totalorder %v5635_v40, %v6046_v39 }
  0x96   : > { %4454 = vmatprep.mubr.msk.bf16.mxu1 %vm5970_vm15, %v8946_v63  ;;  %vm658_vm15 = vcmp.le.s32.totalorder %v5635_v40, %v6049_v42 }
  0x97   : > { %4400 = vmatmul.mubr.msk.bf16.gmra.mrb[48].mxu0 %vm6065_vm1, %v8946_v63  ;;  %vm6099_vm9 = vmpackc.low %vm658_vm15, %vm656_vm11  ;;  %vm664_vm11 = vcmp.le.s32.totalorder %v5635_v40, %v6114_v49  ;;  %vm666_vm15 = vcmp.le.s32.totalorder %v5635_v40, %v6117_v50 }
  0x98   : > { %4402 = vmatprep.mubr.msk.bf16.mxu0 %vm6072_vm2, %v8946_v63  ;;  %vm4411_vm6 = vmpackc.low %vm666_vm15, %vm664_vm11 }
  0x9d   : > { %4456 = vmatmul.mubr.msk.bf16.gmra.mrb[40].mxu1 %vm5997_vm3, %v8946_v63  ;;  %vm660_vm3 = vcmp.le.s32.totalorder %v5635_v40, %v6080_v45 }
  0x9e   : > { %4458 = vmatprep.mubr.msk.bf16.mxu1 %vm6004_vm4, %v8946_v63  ;;  %vm662_vm4 = vcmp.le.s32.totalorder %v5635_v40, %v6083_v46 }
  0x9f   : > { %4404 = vmatmul.mubr.msk.bf16.gmra.mrb[52].mxu0 %vm6099_vm9, %v8946_v63  ;;  %vm4407_vm14 = vmpackc.low %vm662_vm4, %vm660_vm3 }
  0xa0   : > { %4406 = vmatprep.mubr.msk.bf16.mxu0 %vm6106_vm10, %v8946_v63 }
  0xa5   : > { %4460 = vmatmul.mubr.msk.bf16.gmra.mrb[44].mxu1 %vm6031_vm12, %v8946_v63 }
  0xa6   : > { %4462 = vmatprep.mubr.msk.bf16.mxu1 %vm6038_vm13, %v8946_v63 }
  0xa7   : > { %4408 = vmatmul.mubr.msk.bf16.gmra.mrb[56].mxu0 %vm4407_vm14, %v8946_v63 }
  0xa8   : > { %4410 = vmatprep.mubr.msk.bf16.mxu0 %vm4409_vm0, %v8946_v63 }
  0xad   : > { %4464 = vmatmul.mubr.msk.bf16.gmra.mrb[48].mxu1 %vm6065_vm1, %v8946_v63  ;;  %vm9138_vm1 = vcmask 7168  }
  0xae   : > { %4466 = vmatprep.mubr.msk.bf16.mxu1 %vm6072_vm2, %v8946_v63 }
  0xaf   : > { %4412 = vmatmul.mubr.msk.bf16.gmra.mrb[60].mxu0 %vm4411_vm6, %v8946_v63 }
  0xb5   : > { %4468 = vmatmul.mubr.msk.bf16.gmra.mrb[52].mxu1 %vm6099_vm9, %v8946_v63 }
  0xb6   : > { %4470 = vmatprep.mubr.msk.bf16.mxu1 %vm6106_vm10, %v8946_v63 }
  0xbd   : > { %4472 = vmatmul.mubr.msk.bf16.gmra.mrb[56].mxu1 %vm4407_vm14, %v8946_v63 }
  0xbe   : > { %4474 = vmatprep.mubr.msk.bf16.mxu1 %vm4409_vm0, %v8946_v63 }
  0xc5   : > { %4476 = vmatmul.mubr.msk.bf16.gmra.mrb[60].mxu1 %vm4411_vm6, %v8946_v63 }
 0x109   : > { %v4851_v51 = vpop.f32.mrb[0].mxu0 }
 0x10a   : > { %v4852_v54 = vpop.f32.mrb[1].mxu0 }
 0x10b   : > { %v6161_v55 = vadd.f32 %v4852_v54, %v4851_v51  ;;  %v4854_v56 = vpop.f32.mrb[2].mxu0 }
 0x10c   : > { %v4855_v58 = vpop.f32.mrb[3].mxu0 }
 0x10d   : > { %9246 = vst [vmem:[#allocation42_spill] sm:$0xff] %v6161_v55  ;;  %v6163_v5 = vadd.f32 %v4855_v58, %v4854_v56  ;;  %v1294_v20 = vmax.f32 %v6161_v55, 1.0  ;;  %vm2752_vm12 = vcmp.ge.f32.partialorder %v6161_v55, 51.0 }
 0x10e   : > { %v2784_v34 = vsel %vm2752_vm12, %v5574_v2, 256 }
 0x10f   : > { %9247 = vst [vmem:[#allocation43_spill] sm:$0xff] %v6163_v5  ;;  %v1295_v24 = vmax.f32 %v6163_v5, 1.0  ;;  %5270 = vrcp.f32 %v1294_v20  ;;  %vm2753_vm13 = vcmp.ge.f32.partialorder %v6163_v5, 51.0  ;;  %v2816_v51 = vsel %vm9138_vm1, %v2784_v34, 2147483647 }
 0x110   : > { %v2785_v43 = vsel %vm2753_vm13, %v5601_v8, 256 }
 0x111   : > { %v4857_v57 = vpop.f32.mrb[4].mxu0  ;;  %5272 = vrcp.f32 %v1295_v24  ;;  %v2817_v58 = vsel %vm9138_vm1, %v2785_v43, 2147483647 }
 0x112   : > { %v4858_v62 = vpop.f32.mrb[5].mxu0 }
 0x113   : > { %v6165_v7 = vadd.f32 %v4858_v62, %v4857_v57  ;;  %v4860_v14 = vpop.f32.mrb[6].mxu0 }
 0x114   : > { %v4861_v15 = vpop.f32.mrb[7].mxu0 }
 0x115   : > { %9248 = vst [vmem:[#allocation44_spill] sm:$0xff] %v6165_v7  ;;  %v6168_v21 = vadd.f32 %v4861_v15, %v4860_v14  ;;  %v1296_v37 = vmax.f32 %v6165_v7, 1.0  ;;  %vm2754_vm10 = vcmp.ge.f32.partialorder %v6165_v7, 51.0 }
 0x117   : > { %9249 = vst [vmem:[#allocation45_spill] sm:$0xff] %v6168_v21  ;;  %v1297_v47 = vmax.f32 %v6168_v21, 1.0  ;;  %5274 = vrcp.f32 %v1296_v37  ;;  %vm2755_vm4 = vcmp.ge.f32.partialorder %v6168_v21, 51.0 }
 0x119   : > { %5276 = vrcp.f32 %v1297_v47 }
 0x11a   : > { %v4863_v26 = vpop.f32.mrb[8].mxu0 }
 0x11b   : > { %v4864_v29 = vpop.f32.mrb[9].mxu0 }
 0x11c   : > { %v6173_v31 = vadd.f32 %v4864_v29, %v4863_v26  ;;  %v4866_v33 = vpop.f32.mrb[10].mxu0  ;;  %v5271_v29 = vpop.eup %5270 }
 0x11d   : > { %v4867_v38 = vpop.f32.mrb[11].mxu0 }
 0x11e   : > { %9250 = vst [vmem:[#allocation46_spill] sm:$0xff] %v6173_v31  ;;  %vm2756_vm2 = vcmp.ge.f32.partialorder %v6173_v31, 51.0  ;;  %v6179_v44 = vadd.f32 %v4867_v38, %v4866_v33 }
 0x11f   : > { %v2788_v48 = vsel %vm2756_vm2, %v5611_v13, 256 }
 0x120   : > { %9251 = vst [vmem:[#allocation47_spill] sm:$0xff] %v6179_v44  ;;  %v4963_v54 = vpop.f32.mrb[0].mxu1  ;;  %v2820_v56 = vsel %vm9138_vm1, %v2788_v48, 2147483647  ;;  %vm2757_vm7 = vcmp.ge.f32.partialorder %v6179_v44, 51.0 }
 0x121   : > { %vm2821_vm9 = vcmp.lt.s32.totalorder %v2816_v51, %v2820_v56  ;;  %v4964_v57 = vpop.f32.mrb[1].mxu1  ;;  %v2789_v62 = vsel %vm2757_vm7, %v5617_v18, 256 }
 0x122   : > { %v6189_v14 = vadd.f32 %v4964_v57, %v4963_v54  ;;  %v4966_v15 = vpop.f32.mrb[2].mxu1  ;;  %v2823_v20 = vsel %vm9138_vm1, %v2789_v62, 2147483647  ;;  %v4869_v24 = vpop.f32.mrb[12].mxu0  ;;  %v6192_v26 = vsel %vm2821_vm9, %v2816_v51, %v2820_v56  ;;  %v2786_v51 = vsel %vm2754_vm10, %v5604_v9, 256 }
 0x123   : > { %vm2824_vm3 = vcmp.lt.s32.totalorder %v2817_v58, %v2823_v20  ;;  %v4967_v33 = vpop.f32.mrb[3].mxu1  ;;  %v4870_v34 = vpop.f32.mrb[13].mxu0  ;;  %v1298_v56 = vmax.f32 %v6173_v31, 1.0 }
 0x124   : > { %v6195_v38 = vmul.f32 %v5271_v29, %v6189_v14  ;;  %v6197_v43 = vadd.f32 %v4967_v33, %v4966_v15  ;;  %v6199_v37 = vadd.f32 %v4870_v34, %v4869_v24  ;;  %v4872_v48 = vpop.f32.mrb[14].mxu0  ;;  %v6201_v54 = vsel %vm2824_vm3, %v2817_v58, %v2823_v20  ;;  %v5273_v57 = vpop.eup %5272 }
 0x125   : > { %v4873_v47 = vpop.f32.mrb[15].mxu0  ;;  %v1299_v15 = vmax.f32 %v6179_v44, 1.0  ;;  %v2818_v24 = vsel %vm9138_vm1, %v2786_v51, 2147483647  ;;  %v2787_v29 = vsel %vm2755_vm4, %v5608_v12, 256  ;;  %5278 = vrcp.f32 %v1298_v56 }
 0x126   : > { %9252 = vst [vmem:[#allocation48_spill] sm:$0xff] %v6195_v38  ;;  %9253 = vst [vmem:[#allocation49_spill] sm:$0xff] %v6197_v43  ;;  %v6209_v62 = vmul.f32 %v5273_v57, %v6197_v43  ;;  %vm2758_vm5 = vcmp.ge.f32.partialorder %v6199_v37, 51.0  ;;  %v6214_v20 = vadd.f32 %v4873_v47, %v4872_v48  ;;  %v5275_v47 = vpop.eup %5274  ;;  %v2819_v51 = vsel %vm9138_vm1, %v2787_v29, 2147483647 }
 0x127   : > { %9254 = vst [vmem:[#allocation50_spill] sm:$0xff] %v6199_v37  ;;  %v2790_v58 = vsel %vm2758_vm5, %v5620_v19, 256  ;;  %5280 = vrcp.f32 %v1299_v15  ;;  %v5277_v19 = vpop.eup %5276 }
 0x128   : > { %9255 = vst [vmem:[#allocation51_spill] sm:$0xff] %v6209_v62  ;;  %9256 = vst [vmem:[#allocation52_spill] sm:$0xff] %v6214_v20  ;;  %v4969_v33 = vpop.f32.mrb[4].mxu1  ;;  %v2826_v34 = vsel %vm9138_vm1, %v2790_v58, 2147483647  ;;  %vm2759_vm14 = vcmp.ge.f32.partialorder %v6214_v20, 51.0 }
 0x129   : > { %vm2827_vm8 = vcmp.lt.s32.totalorder %v2818_v24, %v2826_v34  ;;  %v4970_v63 = vpop.f32.mrb[5].mxu1  ;;  %v2791_v41 = vsel %vm2759_vm14, %v5625_v25, 256 }
 0x12a   : > { %v6220_v57 = vadd.f32 %v4970_v63, %v4969_v33  ;;  %v4972_v0 = vpop.f32.mrb[6].mxu1  ;;  %v4875_v40 = vpop.f32.mrb[16].mxu0  ;;  %v2828_v48 = vsel %vm2827_vm8, %v2818_v24, %v2826_v34  ;;  %v2829_v4 = vsel %vm9138_vm1, %v2791_v41, 2147483647  ;;  %v1300_v24 = vmax.f32 %v6199_v37, 1.0 }
 0x12b   : > { %v4973_v3 = vpop.f32.mrb[7].mxu1  ;;  %v4876_v30 = vpop.f32.mrb[17].mxu0  ;;  %vm2830_vm0 = vcmp.lt.s32.totalorder %v2819_v51, %v2829_v4  ;;  %v1301_v41 = vmax.f32 %v6214_v20, 1.0 }
 0x12c   : > { %9257 = vst [vmem:[#allocation53_spill] sm:$0xff] %v6220_v57  ;;  %v6226_v58 = vmul.f32 %v5275_v47, %v6220_v57  ;;  %v6228_v56 = vadd.f32 %v4973_v3, %v4972_v0  ;;  %v6230_v63 = vadd.f32 %v4876_v30, %v4875_v40  ;;  %v4878_v33 = vpop.f32.mrb[18].mxu0  ;;  %v2831_v18 = vsel %vm2830_vm0, %v2819_v51, %v2829_v4 }
 0x12d   : > { %v4879_v34 = vpop.f32.mrb[19].mxu0  ;;  %5282 = vrcp.f32 %v1300_v24 }
 0x12e   : > { %9258 = vst [vmem:[#allocation54_spill] sm:$0xff] %v6226_v58  ;;  %9259 = vst [vmem:[#allocation55_spill] sm:$0xff] %v6228_v56  ;;  %v6234_v29 = vmul.f32 %v5277_v19, %v6228_v56  ;;  %vm2760_vm11 = vcmp.ge.f32.partialorder %v6230_v63, 51.0  ;;  %v6239_v47 = vadd.f32 %v4879_v34, %v4878_v33  ;;  %5284 = vrcp.f32 %v1301_v41 }
 0x12f   : > { %9260 = vst [vmem:[#allocation56_spill] sm:$0xff] %v6230_v63  ;;  %v2792_v15 = vsel %vm2760_vm11, %v5736_v52, 256  ;;  %v5279_v52 = vpop.eup %5278  ;;  %v1302_v8 = vmax.f32 %v6230_v63, 1.0 }
 0x130   : > { %9261 = vst [vmem:[#allocation57_spill] sm:$0xff] %v6234_v29  ;;  %9262 = vst [vmem:[#allocation58_spill] sm:$0xff] %v6239_v47  ;;  %v4975_v0 = vpop.f32.mrb[8].mxu1  ;;  %v2832_v3 = vsel %vm9138_vm1, %v2792_v15, 2147483647  ;;  %vm2761_vm6 = vcmp.ge.f32.partialorder %v6239_v47, 51.0 }
 0x131   : > { %vm2833_vm15 = vcmp.lt.s32.totalorder %v6192_v26, %v2832_v3  ;;  %v4976_v30 = vpop.f32.mrb[9].mxu1  ;;  %v2793_v40 = vsel %vm2761_vm6, %v5739_v53, 256  ;;  %v5281_v53 = vpop.eup %5280  ;;  %5286 = vrcp.f32 %v1302_v8  ;;  %v6463_v57 = vsub.f32 256.0, %v6239_v47 }
 0x132   : > { %v6244_v4 = vadd.f32 %v4976_v30, %v4975_v0  ;;  %v4978_v19 = vpop.f32.mrb[10].mxu1  ;;  %v4881_v51 = vpop.f32.mrb[20].mxu0  ;;  %v2834_v13 = vsel %vm2833_vm15, %v6192_v26, %v2832_v3  ;;  %v2835_v33 = vsel %vm9138_vm1, %v2793_v40, 2147483647 }
 0x133   : > { %v4979_v34 = vpop.f32.mrb[11].mxu1  ;;  %v4882_v9 = vpop.f32.mrb[21].mxu0  ;;  %vm2836_vm12 = vcmp.lt.s32.totalorder %v6201_v54, %v2835_v33  ;;  %9313 = vst [vmem:[#allocation109_spill] sm:$0xff] %v6463_v57 }
 0x134   : > { %9263 = vst [vmem:[#allocation59_spill] sm:$0xff] %v6244_v4  ;;  %v6250_v15 = vmul.f32 %v5279_v52, %v6244_v4  ;;  %v6253_v24 = vadd.f32 %v4979_v34, %v4978_v19  ;;  %v6255_v0 = vadd.f32 %v4882_v9, %v4881_v51  ;;  %v4884_v30 = vpop.f32.mrb[22].mxu0  ;;  %v2837_v3 = vsel %vm2836_vm12, %v6201_v54, %v2835_v33 }
 0x135   : > { %v4885_v26 = vpop.f32.mrb[23].mxu0  ;;  %v1303_v52 = vmax.f32 %v6239_v47, 1.0 }
 0x136   : > { %9264 = vst [vmem:[#allocation60_spill] sm:$0xff] %v6250_v15  ;;  %9265 = vst [vmem:[#allocation61_spill] sm:$0xff] %v6253_v24  ;;  %v6260_v40 = vmul.f32 %v5281_v53, %v6253_v24  ;;  %vm2762_vm13 = vcmp.ge.f32.partialorder %v6255_v0, 51.0  ;;  %v6265_v19 = vadd.f32 %v4885_v26, %v4884_v30 }
 0x137   : > { %9266 = vst [vmem:[#allocation62_spill] sm:$0xff] %v6255_v0  ;;  %v2794_v41 = vsel %vm2762_vm13, %v5774_v59, 256  ;;  %5288 = vrcp.f32 %v1303_v52 }
 0x138   : > { %9267 = vst [vmem:[#allocation63_spill] sm:$0xff] %v6260_v40  ;;  %9268 = vst [vmem:[#allocation64_spill] sm:$0xff] %v6265_v19  ;;  %v4981_v9 = vpop.f32.mrb[12].mxu1  ;;  %v2838_v51 = vsel %vm9138_vm1, %v2794_v41, 2147483647  ;;  %vm2763_vm7 = vcmp.ge.f32.partialorder %v6265_v19, 51.0  ;;  %v5283_v40 = vpop.eup %5282 }
 0x139   : > { %vm2839_vm2 = vcmp.lt.s32.totalorder %v2828_v48, %v2838_v51  ;;  %v4982_v34 = vpop.f32.mrb[13].mxu1  ;;  %v2795_v33 = vsel %vm2763_vm7, %v5777_v60, 256  ;;  %v1304_v60 = vmax.f32 %v6255_v0, 1.0  ;;  %v1305_v52 = vmax.f32 %v6265_v19, 1.0 }
 0x13a   : > { %v6269_v54 = vadd.f32 %v4982_v34, %v4981_v9  ;;  %v4984_v53 = vpop.f32.mrb[14].mxu1  ;;  %v4887_v25 = vpop.f32.mrb[24].mxu0  ;;  %v2840_v12 = vsel %vm2839_vm2, %v2828_v48, %v2838_v51  ;;  %v2841_v59 = vsel %vm9138_vm1, %v2795_v33, 2147483647 }
 0x13b   : > { %v4985_v30 = vpop.f32.mrb[15].mxu1  ;;  %v4888_v26 = vpop.f32.mrb[25].mxu0  ;;  %vm2842_vm9 = vcmp.lt.s32.totalorder %v2831_v18, %v2841_v59  ;;  %5290 = vrcp.f32 %v1304_v60 }
 0x13c   : > { %9269 = vst [vmem:[#allocation65_spill] sm:$0xff] %v6269_v54  ;;  %v6274_v41 = vmul.f32 %v5283_v40, %v6269_v54  ;;  %v6276_v15 = vadd.f32 %v4985_v30, %v4984_v53  ;;  %v6278_v8 = vadd.f32 %v4888_v26, %v4887_v25  ;;  %v4890_v9 = vpop.f32.mrb[26].mxu0  ;;  %v5285_v34 = vpop.eup %5284  ;;  %v2843_v48 = vsel %vm2842_vm9, %v2831_v18, %v2841_v59 }
 0x13d   : > { %v4891_v29 = vpop.f32.mrb[27].mxu0  ;;  %5292 = vrcp.f32 %v1305_v52 }
 0x13e   : > { %9270 = vst [vmem:[#allocation66_spill] sm:$0xff] %v6274_v41  ;;  %9271 = vst [vmem:[#allocation67_spill] sm:$0xff] %v6276_v15  ;;  %v6282_v51 = vmul.f32 %v5285_v34, %v6276_v15  ;;  %vm2764_vm10 = vcmp.ge.f32.partialorder %v6278_v8, 51.0  ;;  %v6287_v33 = vadd.f32 %v4891_v29, %v4890_v9  ;;  %v5287_v41 = vpop.eup %5286 }
 0x13f   : > { %9272 = vst [vmem:[#allocation68_spill] sm:$0xff] %v6278_v8  ;;  %v2796_v40 = vsel %vm2764_vm10, %v5808_v61, 256 }
 0x140   : > { %9273 = vst [vmem:[#allocation69_spill] sm:$0xff] %v6282_v51  ;;  %9274 = vst [vmem:[#allocation70_spill] sm:$0xff] %v6287_v33  ;;  %v4987_v53 = vpop.f32.mrb[16].mxu1  ;;  %v2844_v25 = vsel %vm9138_vm1, %v2796_v40, 2147483647  ;;  %vm2765_vm4 = vcmp.ge.f32.partialorder %v6287_v33, 51.0 }
 0x141   : > { %vm2845_vm3 = vcmp.lt.s32.totalorder %v2834_v13, %v2844_v25  ;;  %v4988_v30 = vpop.f32.mrb[17].mxu1  ;;  %v2797_v26 = vsel %vm2765_vm4, %v5811_v6, 256  ;;  %v1306_v6 = vmax.f32 %v6278_v8, 1.0 }
 0x142   : > { %v6291_v18 = vadd.f32 %v4988_v30, %v4987_v53  ;;  %v4990_v59 = vpop.f32.mrb[18].mxu1  ;;  %v4893_v34 = vpop.f32.mrb[28].mxu0  ;;  %v6294_v51 = vsel %vm2845_vm3, %v2834_v13, %v2844_v25  ;;  %v2847_v29 = vsel %vm9138_vm1, %v2797_v26, 2147483647 }
 0x143   : > { %v4991_v9 = vpop.f32.mrb[19].mxu1  ;;  %v4894_v61 = vpop.f32.mrb[29].mxu0  ;;  %vm2848_vm5 = vcmp.lt.s32.totalorder %v2837_v3, %v2847_v29  ;;  %5294 = vrcp.f32 %v1306_v6 }
 0x144   : > { %9275 = vst [vmem:[#allocation71_spill] sm:$0xff] %v6291_v18  ;;  %v6298_v40 = vmul.f32 %v5287_v41, %v6291_v18  ;;  %v6300_v58 = vadd.f32 %v4991_v9, %v4990_v59  ;;  %v6302_v60 = vadd.f32 %v4894_v61, %v4893_v34  ;;  %v4896_v53 = vpop.f32.mrb[30].mxu0  ;;  %v5289_v30 = vpop.eup %5288  ;;  %v6305_v25 = vsel %vm2848_vm5, %v2837_v3, %v2847_v29 }
 0x145   : > { %v4897_v13 = vpop.f32.mrb[31].mxu0  ;;  %v1307_v41 = vmax.f32 %v6287_v33, 1.0  ;;  %v5291_v62 = vpop.eup %5290 }
 0x146   : > { %9276 = vst [vmem:[#allocation72_spill] sm:$0xff] %v6298_v40  ;;  %9277 = vst [vmem:[#allocation73_spill] sm:$0xff] %v6300_v58  ;;  %v6308_v26 = vmul.f32 %v5289_v30, %v6300_v58  ;;  %vm2766_vm8 = vcmp.ge.f32.partialorder %v6302_v60, 51.0  ;;  %v6313_v59 = vadd.f32 %v4897_v13, %v4896_v53 }
 0x147   : > { %9278 = vst [vmem:[#allocation74_spill] sm:$0xff] %v6302_v60  ;;  %v2798_v52 = vsel %vm2766_vm8, %v5842_v10, 256  ;;  %5296 = vrcp.f32 %v1307_v41 }
 0x148   : > { %9279 = vst [vmem:[#allocation75_spill] sm:$0xff] %v6308_v26  ;;  %9280 = vst [vmem:[#allocation76_spill] sm:$0xff] %v6313_v59  ;;  %v4993_v61 = vpop.f32.mrb[20].mxu1  ;;  %v2850_v34 = vsel %vm9138_vm1, %v2798_v52, 2147483647  ;;  %vm2767_vm0 = vcmp.ge.f32.partialorder %v6313_v59, 51.0 }
 0x149   : > { %vm2851_vm14 = vcmp.lt.s32.totalorder %v2840_v12, %v2850_v34  ;;  %v4994_v9 = vpop.f32.mrb[21].mxu1  ;;  %v2799_v30 = vsel %vm2767_vm0, %v5845_v11, 256  ;;  %v1308_v11 = vmax.f32 %v6302_v60, 1.0 }
 0x14a   : > { %v6317_v3 = vadd.f32 %v4994_v9, %v4993_v61  ;;  %v4996_v29 = vpop.f32.mrb[22].mxu1  ;;  %v4899_v26 = vpop.f32.mrb[32].mxu0  ;;  %v6320_v40 = vsel %vm2851_vm14, %v2840_v12, %v2850_v34  ;;  %v2853_v53 = vsel %vm9138_vm1, %v2799_v30, 2147483647  ;;  %v6334_v30 = vsub.f32 256.0, %v6161_v55 }
 0x14b   : > { %v4997_v13 = vpop.f32.mrb[23].mxu1  ;;  %v4900_v10 = vpop.f32.mrb[33].mxu0  ;;  %vm2854_vm11 = vcmp.lt.s32.totalorder %v2843_v48, %v2853_v53  ;;  %5298 = vrcp.f32 %v1308_v11 }
 0x14c   : > { %9281 = vst [vmem:[#allocation77_spill] sm:$0xff] %v6317_v3  ;;  %v6324_v52 = vmul.f32 %v5291_v62, %v6317_v3  ;;  %v6326_v38 = vadd.f32 %v4997_v13, %v4996_v29  ;;  %v6328_v6 = vadd.f32 %v4900_v10, %v4899_v26  ;;  %v4902_v61 = vpop.f32.mrb[34].mxu0  ;;  %v5293_v9 = vpop.eup %5292  ;;  %v6331_v34 = vsel %vm2854_vm11, %v2843_v48, %v2853_v53 }
 0x14d   : > { %v4903_v12 = vpop.f32.mrb[35].mxu0  ;;  %9285 = vst [vmem:[#allocation81_spill] sm:$0xff] %v6334_v30  ;;  %v6341_v62 = vsub.f32 256.0, %v6163_v5  ;;  %v1309_v10 = vmax.f32 %v6313_v59, 1.0 }
 0x14e   : > { %9282 = vst [vmem:[#allocation78_spill] sm:$0xff] %v6324_v52  ;;  %9283 = vst [vmem:[#allocation79_spill] sm:$0xff] %v6326_v38  ;;  %v6337_v41 = vmul.f32 %v5293_v9, %v6326_v38  ;;  %vm2768_vm15 = vcmp.ge.f32.partialorder %v6328_v6, 51.0  ;;  %v6345_v29 = vadd.f32 %v4903_v12, %v4902_v61  ;;  %v1426_v9 = vmax.f32 %v6334_v30, 1.0  ;;  %v5295_v12 = vpop.eup %5294 }
 0x14f   : > { %9284 = vst [vmem:[#allocation80_spill] sm:$0xff] %v6328_v6  ;;  %9287 = vst [vmem:[#allocation83_spill] sm:$0xff] %v6341_v62  ;;  %v2800_v26 = vsel %vm2768_vm15, %v5876_v16, 256  ;;  %5300 = vrcp.f32 %v1309_v10  ;;  %v1310_v15 = vmax.f32 %v6328_v6, 1.0  ;;  %v6375_v10 = vsub.f32 256.0, %v6168_v21 }
 0x150   : > { %9286 = vst [vmem:[#allocation82_spill] sm:$0xff] %v6337_v41  ;;  %9288 = vst [vmem:[#allocation84_spill] sm:$0xff] %v6345_v29  ;;  %v4999_v13 = vpop.f32.mrb[24].mxu1  ;;  %v2856_v48 = vsel %vm9138_vm1, %v2800_v26, 2147483647  ;;  %vm2769_vm12 = vcmp.ge.f32.partialorder %v6345_v29, 51.0  ;;  %5302 = vrcp.f32 %v1426_v9 }
 0x151   : > { %vm2857_vm6 = vcmp.lt.s32.totalorder %v6294_v51, %v2856_v48  ;;  %v5000_v53 = vpop.f32.mrb[25].mxu1  ;;  %v2801_v38 = vsel %vm2769_vm12, %v5879_v17, 256  ;;  %v1427_v26 = vmax.f32 %v6341_v62, 1.0  ;;  %9294 = vst [vmem:[#allocation90_spill] sm:$0xff] %v6375_v10 }
 0x152   : > { %v6351_v41 = vadd.f32 %v5000_v53, %v4999_v13  ;;  %v5002_v52 = vpop.f32.mrb[26].mxu1  ;;  %v4905_v3 = vpop.f32.mrb[36].mxu0  ;;  %v6355_v61 = vsel %vm2857_vm6, %v6294_v51, %v2856_v48  ;;  %v2859_v16 = vsel %vm9138_vm1, %v2801_v38, 2147483647  ;;  %v6368_v48 = vsub.f32 256.0, %v6165_v7 }
 0x153   : > { %v5003_v58 = vpop.f32.mrb[27].mxu1  ;;  %v4906_v18 = vpop.f32.mrb[37].mxu0  ;;  %vm2860_vm13 = vcmp.lt.s32.totalorder %v6305_v25, %v2859_v16  ;;  %5304 = vrcp.f32 %v1427_v26 }
 0x154   : > { %9289 = vst [vmem:[#allocation85_spill] sm:$0xff] %v6351_v41  ;;  %v6360_v11 = vmul.f32 %v5295_v12, %v6351_v41  ;;  %v6363_v13 = vadd.f32 %v5003_v58, %v5002_v52  ;;  %v6365_v53 = vadd.f32 %v4906_v18, %v4905_v3  ;;  %v4908_v17 = vpop.f32.mrb[38].mxu0  ;;  %v5297_v51 = vpop.eup %5296  ;;  %9293 = vst [vmem:[#allocation89_spill] sm:$0xff] %v6368_v48  ;;  %v6382_v18 = vsub.f32 256.0, %v6173_v31 }
 0x155   : > { %v4909_v38 = vpop.f32.mrb[39].mxu0  ;;  %v6372_v54 = vsel %vm2860_vm13, %v6305_v25, %v2859_v16  ;;  %v1311_v3 = vmax.f32 %v6345_v29, 1.0  ;;  %v1428_v9 = vmax.f32 %v6368_v48, 1.0  ;;  %5306 = vrcp.f32 %v1310_v15 }
 0x156   : > { %9290 = vst [vmem:[#allocation86_spill] sm:$0xff] %v6360_v11  ;;  %9291 = vst [vmem:[#allocation87_spill] sm:$0xff] %v6363_v13  ;;  %v6378_v58 = vmul.f32 %v5297_v51, %v6363_v13  ;;  %vm2770_vm2 = vcmp.ge.f32.partialorder %v6365_v53, 51.0  ;;  %v6386_v12 = vadd.f32 %v4909_v38, %v4908_v17 }
 0x157   : > { %9292 = vst [vmem:[#allocation88_spill] sm:$0xff] %v6365_v53  ;;  %9296 = vst [vmem:[#allocation92_spill] sm:$0xff] %v6382_v18  ;;  %v2802_v52 = vsel %vm2770_vm2, %v5910_v22, 256  ;;  %v1430_v22 = vmax.f32 %v6382_v18, 1.0  ;;  %5308 = vrcp.f32 %v1311_v3 }
 0x158   : > { %9295 = vst [vmem:[#allocation91_spill] sm:$0xff] %v6378_v58  ;;  %9297 = vst [vmem:[#allocation93_spill] sm:$0xff] %v6386_v12  ;;  %v5005_v16 = vpop.f32.mrb[28].mxu1  ;;  %v2862_v25 = vsel %vm9138_vm1, %v2802_v52, 2147483647  ;;  %vm2771_vm9 = vcmp.ge.f32.partialorder %v6386_v12, 51.0  ;;  %v5299_v52 = vpop.eup %5298  ;;  %5310 = vrcp.f32 %v1428_v9 }
 0x159   : > { %vm2863_vm7 = vcmp.lt.s32.totalorder %v6320_v40, %v2862_v25  ;;  %v5006_v51 = vpop.f32.mrb[29].mxu1  ;;  %v1429_v58 = vmax.f32 %v6375_v10, 1.0  ;;  %v2803_v17 = vsel %vm2771_vm9, %v5913_v23, 256 }
 0x15a   : > { %v6393_v11 = vadd.f32 %v5006_v51, %v5005_v16  ;;  %v5008_v13 = vpop.f32.mrb[30].mxu1  ;;  %v4911_v38 = vpop.f32.mrb[40].mxu0  ;;  %v6397_v26 = vsel %vm2863_vm7, %v6320_v40, %v2862_v25  ;;  %v2865_v41 = vsel %vm9138_vm1, %v2803_v17, 2147483647  ;;  %v6410_v25 = vsub.f32 256.0, %v6179_v44 }
 0x15b   : > { %v5009_v24 = vpop.f32.mrb[31].mxu1  ;;  %v4912_v4 = vpop.f32.mrb[41].mxu0  ;;  %vm2866_vm10 = vcmp.lt.s32.totalorder %v6331_v34, %v2865_v41  ;;  %v1312_v17 = vmax.f32 %v6365_v53, 1.0  ;;  %5312 = vrcp.f32 %v1429_v58 }
 0x15c   : > { %9298 = vst [vmem:[#allocation94_spill] sm:$0xff] %v6393_v11  ;;  %v6402_v15 = vmul.f32 %v5299_v52, %v6393_v11  ;;  %v6405_v16 = vadd.f32 %v5009_v24, %v5008_v13  ;;  %v6407_v51 = vadd.f32 %v4912_v4, %v4911_v38  ;;  %v4914_v23 = vpop.f32.mrb[42].mxu0  ;;  %v5301_v40 = vpop.eup %5300  ;;  %9302 = vst [vmem:[#allocation98_spill] sm:$0xff] %v6410_v25  ;;  %v6417_v52 = vsub.f32 256.0, %v6199_v37 }
 0x15d   : > { %v4915_v56 = vpop.f32.mrb[43].mxu0  ;;  %v6414_v3 = vsel %vm2866_vm10, %v6331_v34, %v2865_v41  ;;  %v6424_v4 = vsub.f32 256.0, %v6214_v20  ;;  %v1313_v13 = vmax.f32 %v6386_v12, 1.0  ;;  %v6430_v34 = vpop.eup %5302  ;;  %v6434_v41 = vmul.f32 %v6161_v55, %v6334_v30 }
 0x15e   : > { %9299 = vst [vmem:[#allocation95_spill] sm:$0xff] %v6402_v15  ;;  %9300 = vst [vmem:[#allocation96_spill] sm:$0xff] %v6405_v16  ;;  %v6420_v24 = vmul.f32 %v5301_v40, %v6405_v16  ;;  %vm2772_vm3 = vcmp.ge.f32.partialorder %v6407_v51, 51.0  ;;  %v6428_v38 = vadd.f32 %v4915_v56, %v4914_v23  ;;  %5314 = vrcp.f32 %v1430_v22  ;;  %v6440_v23 = vpop.eup %5304 }
 0x15f   : > { %9301 = vst [vmem:[#allocation97_spill] sm:$0xff] %v6407_v51  ;;  %9303 = vst [vmem:[#allocation99_spill] sm:$0xff] %v6417_v52  ;;  %v2804_v9 = vsel %vm2772_vm3, %v5944_v27, 256  ;;  %5316 = vrcp.f32 %v1312_v17  ;;  %v1432_v56 = vmax.f32 %v6417_v52, 1.0  ;;  %v5307_v30 = vpop.eup %5306  ;;  %v1433_v16 = vmax.f32 %v6424_v4, 1.0 }
 0x160   : > { %9304 = vst [vmem:[#allocation100_spill] sm:$0xff] %v6420_v24  ;;  %9305 = vst [vmem:[#allocation101_spill] sm:$0xff] %v6424_v4  ;;  %v5011_v58 = vpop.f32.mrb[32].mxu1  ;;  %v2868_v40 = vsel %vm9138_vm1, %v2804_v9, 2147483647  ;;  %v1431_v24 = vmax.f32 %v6410_v25, 1.0  ;;  %5318 = vrcp.f32 %v1313_v13 }
 0x161   : > { %9306 = vst [vmem:[#allocation102_spill] sm:$0xff] %v6428_v38  ;;  %9307 = vst [vmem:[#allocation103_spill] sm:$0xff] %v6430_v34  ;;  %vm2869_vm4 = vcmp.lt.s32.totalorder %v6355_v61, %v2868_v40  ;;  %v5012_v15 = vpop.f32.mrb[33].mxu1  ;;  %vm2773_vm5 = vcmp.ge.f32.partialorder %v6428_v38, 51.0  ;;  %v6450_v34 = vsub.f32 256.0, %v6230_v63 }
 0x162   : > { %9308 = vst [vmem:[#allocation104_spill] sm:$0xff] %v6434_v41  ;;  %9309 = vst [vmem:[#allocation105_spill] sm:$0xff] %v6440_v23  ;;  %v6443_v27 = vadd.f32 %v5012_v15, %v5011_v58  ;;  %v5014_v55 = vpop.f32.mrb[34].mxu1  ;;  %v2805_v22 = vsel %vm2773_vm5, %v5947_v28, 256  ;;  %v4917_v41 = vpop.f32.mrb[44].mxu0  ;;  %v6447_v9 = vsel %vm2869_vm4, %v6355_v61, %v2868_v40  ;;  %5320 = vrcp.f32 %v1431_v24 }
 0x163   : > { %9310 = vst [vmem:[#allocation106_spill] sm:$0xff] %v6450_v34  ;;  %v2871_v17 = vsel %vm9138_vm1, %v2805_v22, 2147483647  ;;  %v5015_v23 = vpop.f32.mrb[35].mxu1  ;;  %v4918_v11 = vpop.f32.mrb[45].mxu0  ;;  %v1314_v22 = vmax.f32 %v6407_v51, 1.0  ;;  %5322 = vrcp.f32 %v1432_v56  ;;  %v6490_v56 = vmul.f32 %v6165_v7, %v6368_v48 }
 0x164   : > { %v6455_v15 = vmul.f32 %v5307_v30, %v6443_v27  ;;  %vm2872_vm8 = vcmp.lt.s32.totalorder %v6372_v54, %v2871_v17  ;;  %v6458_v58 = vadd.f32 %v5015_v23, %v5014_v55  ;;  %v6460_v61 = vadd.f32 %v4918_v11, %v4917_v41  ;;  %v4920_v40 = vpop.f32.mrb[46].mxu0  ;;  %v5309_v28 = vpop.eup %5308 }
 0x165   : > { %v4921_v43 = vpop.f32.mrb[47].mxu0  ;;  %v6467_v13 = vsel %vm2872_vm8, %v6372_v54, %v2871_v17  ;;  %v6471_v30 = vmul.f32 %v6163_v5, %v6341_v62  ;;  %v6477_v11 = vpop.eup %5310  ;;  %v6480_v24 = vsub.f32 256.0, %v6255_v0  ;;  %v1315_v41 = vmax.f32 %v6428_v38, 1.0  ;;  %9320 = vst [vmem:[#allocation116_spill] sm:$0xff] %v6490_v56 }
 0x166   : > { %9311 = vst [vmem:[#allocation107_spill] sm:$0xff] %v6455_v15  ;;  %9312 = vst [vmem:[#allocation108_spill] sm:$0xff] %v6460_v61  ;;  %v6474_v55 = vmul.f32 %v5309_v28, %v6458_v58  ;;  %vm2774_vm14 = vcmp.ge.f32.partialorder %v6460_v61, 51.0  ;;  %v6484_v23 = vadd.f32 %v4921_v43, %v4920_v40  ;;  %v6486_v17 = vpop.eup %5312  ;;  %5324 = vrcp.f32 %v1433_v16 }
 0x167   : > { %9314 = vst [vmem:[#allocation110_spill] sm:$0xff] %v6471_v30  ;;  %9316 = vst [vmem:[#allocation112_spill] sm:$0xff] %v6477_v11  ;;  %v2806_v54 = vsel %vm2774_vm14, %v5978_v32, 256  ;;  %v1434_v28 = vmax.f32 %v6450_v34, 1.0  ;;  %5326 = vrcp.f32 %v1314_v22  ;;  %v6500_v40 = vsub.f32 256.0, %v6265_v19 }
 0x168   : > { %9315 = vst [vmem:[#allocation111_spill] sm:$0xff] %v6474_v55  ;;  %9317 = vst [vmem:[#allocation113_spill] sm:$0xff] %v6480_v24  ;;  %v5017_v30 = vpop.f32.mrb[36].mxu1  ;;  %v2874_v5 = vsel %vm9138_vm1, %v2806_v54, 2147483647  ;;  %v1435_v55 = vmax.f32 %v6463_v57, 1.0  ;;  %v6497_v43 = vpop.eup %5314  ;;  %v6510_v62 = vmul.f32 %v6168_v21, %v6375_v10  ;;  %5328 = vrcp.f32 %v1315_v41 }
 0x169   : > { %9318 = vst [vmem:[#allocation114_spill] sm:$0xff] %v6484_v23  ;;  %9319 = vst [vmem:[#allocation115_spill] sm:$0xff] %v6486_v17  ;;  %vm2875_vm0 = vcmp.lt.s32.totalorder %v6397_v26, %v2874_v5  ;;  %v5018_v15 = vpop.f32.mrb[37].mxu1  ;;  %vm2775_vm11 = vcmp.ge.f32.partialorder %v6484_v23, 51.0  ;;  %v5317_v48 = vpop.eup %5316  ;;  %v1436_v22 = vmax.f32 %v6480_v24, 1.0  ;;  %5330 = vrcp.f32 %v1434_v28 }
 0x16a   : > { %9321 = vst [vmem:[#allocation117_spill] sm:$0xff] %v6497_v43  ;;  %9322 = vst [vmem:[#allocation118_spill] sm:$0xff] %v6500_v40  ;;  %v6502_v32 = vadd.f32 %v5018_v15, %v5017_v30  ;;  %v5020_v16 = vpop.f32.mrb[38].mxu1  ;;  %v2807_v56 = vsel %vm2775_vm11, %v5981_v1, 256  ;;  %v4923_v7 = vpop.f32.mrb[48].mxu0  ;;  %v6506_v54 = vsel %vm2875_vm0, %v6397_v26, %v2874_v5  ;;  %5332 = vrcp.f32 %v1435_v55 }
 0x16b   : > { %9323 = vst [vmem:[#allocation119_spill] sm:$0xff] %v6510_v62  ;;  %v2877_v43 = vsel %vm9138_vm1, %v2807_v56, 2147483647  ;;  %v5021_v17 = vpop.f32.mrb[39].mxu1  ;;  %v4924_v11 = vpop.f32.mrb[49].mxu0  ;;  %v6523_v62 = vsub.f32 256.0, %v6278_v8  ;;  %v6547_v55 = vmul.f32 %v6173_v31, %v6382_v18  ;;  %5334 = vrcp.f32 %v1436_v22 }
 0x16c   : > { %v6515_v15 = vmul.f32 %v5317_v48, %v6502_v32  ;;  %vm2878_vm15 = vcmp.lt.s32.totalorder %v6414_v3, %v2877_v43  ;;  %v6518_v30 = vadd.f32 %v5021_v17, %v5020_v16  ;;  %v6520_v5 = vadd.f32 %v4924_v11, %v4923_v7  ;;  %v4926_v26 = vpop.f32.mrb[50].mxu0  ;;  %v5319_v1 = vpop.eup %5318 }
 0x16d   : > { %9326 = vst [vmem:[#allocation122_spill] sm:$0xff] %v6523_v62  ;;  %v1316_v56 = vmax.f32 %v6460_v61, 1.0  ;;  %v4927_v21 = vpop.f32.mrb[51].mxu0  ;;  %v6527_v41 = vsel %vm2878_vm15, %v6414_v3, %v2877_v43  ;;  %v1437_v48 = vmax.f32 %v6500_v40, 1.0  ;;  %v6534_v7 = vpop.eup %5320  ;;  %v6537_v11 = vsub.f32 256.0, %v6287_v33  ;;  %9331 = vst [vmem:[#allocation127_spill] sm:$0xff] %v6547_v55 }
 0x16e   : > { %9324 = vst [vmem:[#allocation120_spill] sm:$0xff] %v6515_v15  ;;  %9325 = vst [vmem:[#allocation121_spill] sm:$0xff] %v6520_v5  ;;  %v6531_v17 = vmul.f32 %v5319_v1, %v6518_v30  ;;  %vm2776_vm6 = vcmp.ge.f32.partialorder %v6520_v5, 51.0  ;;  %v1317_v28 = vmax.f32 %v6484_v23, 1.0  ;;  %v6541_v15 = vadd.f32 %v4927_v21, %v4926_v26  ;;  %v6543_v3 = vpop.eup %5322 }
 0x16f   : > { %9328 = vst [vmem:[#allocation124_spill] sm:$0xff] %v6534_v7  ;;  %9329 = vst [vmem:[#allocation125_spill] sm:$0xff] %v6537_v11  ;;  %v2808_v16 = vsel %vm2776_vm6, %v6012_v35, 256  ;;  %v1438_v10 = vmax.f32 %v6523_v62, 1.0  ;;  %5336 = vrcp.f32 %v1316_v56  ;;  %v6558_v26 = vmul.f32 %v6179_v44, %v6410_v25 }
 0x170   : > { %9327 = vst [vmem:[#allocation123_spill] sm:$0xff] %v6531_v17  ;;  %9330 = vst [vmem:[#allocation126_spill] sm:$0xff] %v6541_v15  ;;  %v5023_v1 = vpop.f32.mrb[40].mxu1  ;;  %v2880_v43 = vsel %vm9138_vm1, %v2808_v16, 2147483647  ;;  %vm2777_vm13 = vcmp.ge.f32.partialorder %v6541_v15, 51.0  ;;  %v6554_v21 = vpop.eup %5324  ;;  %5338 = vrcp.f32 %v1437_v48  ;;  %v6565_v31 = vmul.f32 %v6199_v37, %v6417_v52 }
 0x171   : > { %vm2881_vm12 = vcmp.lt.s32.totalorder %v6447_v9, %v2880_v43  ;;  %v5024_v7 = vpop.f32.mrb[41].mxu1  ;;  %9332 = vst [vmem:[#allocation128_spill] sm:$0xff] %v6554_v21  ;;  %9333 = vst [vmem:[#allocation129_spill] sm:$0xff] %v6558_v26  ;;  %v2809_v17 = vsel %vm2777_vm13, %v6015_v36, 256  ;;  %v5327_v55 = vpop.eup %5326  ;;  %v1439_v56 = vmax.f32 %v6537_v11, 1.0  ;;  %5340 = vrcp.f32 %v1317_v28 }
 0x172   : > { %v6560_v22 = vadd.f32 %v5024_v7, %v5023_v1  ;;  %v5026_v16 = vpop.f32.mrb[42].mxu1  ;;  %v4929_v35 = vpop.f32.mrb[52].mxu0  ;;  %9334 = vst [vmem:[#allocation130_spill] sm:$0xff] %v6565_v31  ;;  %v6569_v18 = vsel %vm9138_vm1, %v2809_v17, 2147483647  ;;  %v6581_v26 = vsub.f32 256.0, %v6302_v60  ;;  %5342 = vrcp.f32 %v1438_v10 }
 0x173   : > { %v5027_v21 = vpop.f32.mrb[43].mxu1  ;;  %v4930_v44 = vpop.f32.mrb[53].mxu0  ;;  %vm2884_vm2 = vcmp.lt.s32.totalorder %v6467_v13, %v6569_v18  ;;  %v1318_v17 = vmax.f32 %v6520_v5, 1.0  ;;  %v6585_v28 = vsub.f32 256.0, %v6313_v59  ;;  %v1319_v10 = vmax.f32 %v6541_v15, 1.0 }
 0x174   : > { %v6572_v48 = vmul.f32 %v5327_v55, %v6560_v22  ;;  %v6576_v7 = vadd.f32 %v5027_v21, %v5026_v16  ;;  %v6578_v1 = vadd.f32 %v4930_v44, %v4929_v35  ;;  %v4932_v36 = vpop.f32.mrb[54].mxu0  ;;  %v5329_v31 = vpop.eup %5328  ;;  %9337 = vst [vmem:[#allocation133_spill] sm:$0xff] %v6581_v26  ;;  %v6588_v55 = vsub.f32 256.0, %v6328_v6 }
 0x175   : > { %v4933_v37 = vpop.f32.mrb[55].mxu0  ;;  %9338 = vst [vmem:[#allocation134_spill] sm:$0xff] %v6585_v28  ;;  %v9026_v35 = vmov 0   ;;  %v6596_v44 = vpop.eup %5330  ;;  %v6611_v52 = vmul.f32 %v6214_v20, %v6424_v4  ;;  %5344 = vrcp.f32 %v1439_v56 }
 0x176   : > { %9335 = vst [vmem:[#allocation131_spill] sm:$0xff] %v6572_v48  ;;  %9336 = vst [vmem:[#allocation132_spill] sm:$0xff] %v6578_v1  ;;  %v6591_v21 = vmul.f32 %v5329_v31, %v6576_v7  ;;  %vm2778_vm7 = vcmp.ge.f32.partialorder %v6578_v1, 51.0  ;;  %5172 = vset.pattern.permute.xlu0 %v9026_v35  ;;  %5173 = vset.pattern.permute.xlu1 %v9026_v35  ;;  %v6600_v48 = vadd.f32 %v4933_v37, %v4932_v36 }
 0x177   : > { %9339 = vst [vmem:[#allocation135_spill] sm:$0xff] %v6588_v55  ;;  %9341 = vst [vmem:[#allocation137_spill] sm:$0xff] %v6596_v44  ;;  %v2810_v16 = vsel %vm2778_vm7, %v6046_v39, 256  ;;  %v6605_v31 = vsel %vm2881_vm12, %v6447_v9, %v2880_v43  ;;  %v6615_v35 = vmul.f32 %v6230_v63, %v6450_v34  ;;  %v1440_v37 = vmax.f32 %v6581_v26, 1.0 }
 0x178   : > { %9340 = vst [vmem:[#allocation136_spill] sm:$0xff] %v6591_v21  ;;  %9342 = vst [vmem:[#allocation138_spill] sm:$0xff] %v6600_v48  ;;  %v6607_v21 = vpop.eup %5332  ;;  %v5029_v25 = vpop.f32.mrb[44].mxu1  ;;  %v2886_v36 = vsel %vm9138_vm1, %v2810_v16, 2147483647  ;;  %vm2779_vm10 = vcmp.ge.f32.partialorder %v6600_v48, 51.0  ;;  %5346 = vrcp.f32 %v1318_v17  ;;  %v6632_v34 = vmul.f32 %v6239_v47, %v6463_v57 }
 0x179   : > { %9343 = vst [vmem:[#allocation139_spill] sm:$0xff] %v6607_v21  ;;  %9344 = vst [vmem:[#allocation140_spill] sm:$0xff] %v6611_v52  ;;  %vm2887_vm9 = vcmp.lt.s32.totalorder %v6506_v54, %v2886_v36  ;;  %v5030_v9 = vpop.f32.mrb[45].mxu1  ;;  %v6621_v43 = vpop.eup %5334  ;;  %v6624_v39 = vsub.f32 256.0, %v6345_v29  ;;  %v1441_v52 = vmax.f32 %v6585_v28, 1.0  ;;  %v2811_v16 = vsel %vm2779_vm10, %v6049_v42, 256 }
 0x17a   : > { %9345 = vst [vmem:[#allocation141_spill] sm:$0xff] %v6615_v35  ;;  %9346 = vst [vmem:[#allocation142_spill] sm:$0xff] %v6621_v43  ;;  %v6627_v35 = vadd.f32 %v5030_v9, %v5029_v25  ;;  %v5032_v56 = vpop.f32.mrb[46].mxu1  ;;  %v4935_v63 = vpop.f32.mrb[56].mxu0  ;;  %v1442_v17 = vmax.f32 %v6588_v55, 1.0  ;;  %5348 = vrcp.f32 %v1319_v10  ;;  %v6647_v57 = vsub.f32 256.0, %v6365_v53 }
 0x17b   : > { %9347 = vst [vmem:[#allocation143_spill] sm:$0xff] %v6624_v39  ;;  %v5337_v20 = vpop.eup %5336  ;;  %9348 = vst [vmem:[#allocation144_spill] sm:$0xff] %v6632_v34  ;;  %v2889_v4 = vsel %vm9138_vm1, %v2811_v16, 2147483647  ;;  %v5033_v43 = vpop.f32.mrb[47].mxu1  ;;  %5350 = vrcp.f32 %v1440_v37  ;;  %v1320_v16 = vmax.f32 %v6578_v1, 1.0 }
 0x17c   : > { %v4936_v21 = vpop.f32.mrb[57].mxu0  ;;  %v6636_v44 = vpop.eup %5338  ;;  %v6639_v25 = vmul.f32 %v5337_v20, %v6627_v35  ;;  %vm2890_vm3 = vcmp.lt.s32.totalorder %v6527_v41, %v2889_v4  ;;  %v6642_v9 = vadd.f32 %v5033_v43, %v5032_v56  ;;  %9351 = vst [vmem:[#allocation147_spill] sm:$0xff] %v6647_v57  ;;  %v6655_v20 = vsel %vm2884_vm2, %v6467_v13, %v6569_v18 }
 0x17d   : > { %v6644_v42 = vadd.f32 %v4936_v21, %v4935_v63  ;;  %v4938_v47 = vpop.f32.mrb[58].mxu0  ;;  %v5341_v34 = vpop.eup %5340  ;;  %5352 = vrcp.f32 %v1441_v52  ;;  %v1443_v63 = vmax.f32 %v6624_v39, 1.0  ;;  %v6665_v37 = vsub.f32 256.0, %v6386_v12 }
 0x17e   : > { %9349 = vst [vmem:[#allocation145_spill] sm:$0xff] %v6639_v25  ;;  %v4939_v10 = vpop.f32.mrb[59].mxu0  ;;  %v6659_v21 = vmul.f32 %v5341_v34, %v6642_v9  ;;  %v6662_v43 = vpop.eup %5342  ;;  %v1321_v56 = vmax.f32 %v6600_v48, 1.0  ;;  %v6673_v18 = vsel %vm2887_vm9, %v6506_v54, %v2886_v36  ;;  %v6677_v52 = vmul.f32 %v6255_v0, %v6480_v24  ;;  %v9426_v24 = vld [vmem:[#allocation112_spill] sm:$0xff] }
 0x17f   : > { %9350 = vst [vmem:[#allocation146_spill] sm:$0xff] %v6644_v42  ;;  %vm2780_vm4 = vcmp.ge.f32.partialorder %v6644_v42, 51.0  ;;  %9353 = vst [vmem:[#allocation149_spill] sm:$0xff] %v6665_v37  ;;  %v6668_v25 = vadd.f32 %v4939_v10, %v4938_v47  ;;  %v6681_v34 = vmul.f32 %v6265_v19, %v6500_v40  ;;  %v6685_v13 = vmul.f32 %v6278_v8, %v6523_v62  ;;  %v6690_v36 = vpop.eup %5344 }
 0x180   : > { %9352 = vst [vmem:[#allocation148_spill] sm:$0xff] %v6659_v21  ;;  %9355 = vst [vmem:[#allocation151_spill] sm:$0xff] %v6677_v52  ;;  %5354 = vrcp.f32 %v1442_v17  ;;  %v5035_v47 = vpop.f32.mrb[48].mxu1  ;;  %v1444_v10 = vmax.f32 %v6647_v57, 1.0  ;;  %v2812_v21 = vsel %vm2780_vm4, %v6080_v45, 256  ;;  %v6694_v52 = vmul.f32 %v6287_v33, %v6537_v11 }
 0x181   : > { %9354 = vst [vmem:[#allocation150_spill] sm:$0xff] %v6668_v25  ;;  %9356 = vst [vmem:[#allocation152_spill] sm:$0xff] %v6681_v34  ;;  %v5036_v54 = vpop.f32.mrb[49].mxu1  ;;  %vm2781_vm5 = vcmp.ge.f32.partialorder %v6668_v25, 51.0  ;;  %5356 = vrcp.f32 %v1320_v16  ;;  %v6701_v8 = vsel %vm2890_vm3, %v6527_v41, %v2889_v4  ;;  %v6705_v16 = vmul.f32 %v6302_v60, %v6581_v26 }
 0x182   : > { %9357 = vst [vmem:[#allocation153_spill] sm:$0xff] %v6685_v13  ;;  %9358 = vst [vmem:[#allocation154_spill] sm:$0xff] %v6694_v52  ;;  %5358 = vrcp.f32 %v1443_v63  ;;  %v6696_v34 = vadd.f32 %v5036_v54, %v5035_v47  ;;  %v5038_v13 = vpop.f32.mrb[50].mxu1  ;;  %v4941_v17 = vpop.f32.mrb[60].mxu0  ;;  %v1445_v19 = vmax.f32 %v6665_v37, 1.0  ;;  %v2813_v33 = vsel %vm2781_vm5, %v6083_v46, 256 }
 0x183   : > { %v5347_v45 = vpop.eup %5346  ;;  %9359 = vst [vmem:[#allocation155_spill] sm:$0xff] %v6705_v16  ;;  %v5039_v52 = vpop.f32.mrb[51].mxu1  ;;  %5360 = vrcp.f32 %v1321_v56  ;;  %v2892_v41 = vsel %vm9138_vm1, %v2812_v21, 2147483647  ;;  %v6719_v16 = vmul.f32 %v6313_v59, %v6585_v28  ;;  %v1322_v46 = vmax.f32 %v6644_v42, 1.0 }
 0x184   : > { %v4942_v63 = vpop.f32.mrb[61].mxu0  ;;  %v6710_v47 = vmul.f32 %v5347_v45, %v6696_v34  ;;  %v6712_v54 = vadd.f32 %v5039_v52, %v5038_v13  ;;  %v5349_v11 = vpop.eup %5348  ;;  %5362 = vrcp.f32 %v1444_v10  ;;  %vm2893_vm8 = vcmp.lt.s32.totalorder %v6605_v31, %v2892_v41 }
 0x185   : > { %v6714_v0 = vadd.f32 %v4942_v63, %v4941_v17  ;;  %v4944_v4 = vpop.f32.mrb[62].mxu0  ;;  %9362 = vst [vmem:[#allocation158_spill] sm:$0xff] %v6719_v16  ;;  %v6724_v45 = vsub.f32 256.0, %v6407_v51  ;;  %v6727_v56 = vsub.f32 256.0, %v6428_v38  ;;  %v6733_v21 = vpop.eup %5350  ;;  %v1323_v13 = vmax.f32 %v6668_v25, 1.0 }
 0x186   : > { %9360 = vst [vmem:[#allocation156_spill] sm:$0xff] %v6710_v47  ;;  %v4945_v60 = vpop.f32.mrb[63].mxu0  ;;  %v6730_v52 = vmul.f32 %v5349_v11, %v6712_v54  ;;  %9366 = vst [vmem:[#allocation162_spill] sm:$0xff] %v6733_v21  ;;  %v2894_v17 = vsel %vm2893_vm8, %v6605_v31, %v2892_v41  ;;  %v2895_v63 = vsel %vm9138_vm1, %v2813_v33, 2147483647  ;;  %v6744_v59 = vmul.f32 %v6328_v6, %v6588_v55 }
 0x187   : > { %9361 = vst [vmem:[#allocation157_spill] sm:$0xff] %v6714_v0  ;;  %9363 = vst [vmem:[#allocation159_spill] sm:$0xff] %v6724_v45  ;;  %vm2782_vm14 = vcmp.ge.f32.partialorder %v6714_v0, 51.0  ;;  %v6736_v10 = vadd.f32 %v4945_v60, %v4944_v4  ;;  %v6740_v16 = vpop.eup %5352  ;;  %v6748_v11 = vmul.f32 %v6345_v29, %v6624_v39  ;;  %v6752_v28 = vmul.f32 %v6365_v53, %v6647_v57 }
 0x188   : > { %9364 = vst [vmem:[#allocation160_spill] sm:$0xff] %v6727_v56  ;;  %9365 = vst [vmem:[#allocation161_spill] sm:$0xff] %v6730_v52  ;;  %5364 = vrcp.f32 %v1445_v19  ;;  %v5041_v60 = vpop.f32.mrb[52].mxu1  ;;  %v6756_v31 = vmul.f32 %v6386_v12, %v6665_v37  ;;  %v2814_v33 = vsel %vm2782_vm14, %v6114_v49, 256  ;;  %vm2896_vm11 = vcmp.lt.s32.totalorder %v6655_v20, %v2895_v63  ;;  %v9424_v52 = vld [vmem:[#allocation103_spill] sm:$0xff] }
 0x189   : > { %9367 = vst [vmem:[#allocation163_spill] sm:$0xff] %v6736_v10  ;;  %9368 = vst [vmem:[#allocation164_spill] sm:$0xff] %v6740_v16  ;;  %v5042_v4 = vpop.f32.mrb[53].mxu1  ;;  %vm2783_vm0 = vcmp.ge.f32.partialorder %v6736_v10, 51.0  ;;  %5366 = vrcp.f32 %v1322_v46  ;;  %v6771_v49 = vsub.f32 256.0, %v6484_v23  ;;  %v1447_v46 = vmax.f32 %v6727_v56, 1.0 }
 0x18a   : > { %9369 = vst [vmem:[#allocation165_spill] sm:$0xff] %v6744_v59  ;;  %9370 = vst [vmem:[#allocation166_spill] sm:$0xff] %v6748_v11  ;;  %v6760_v41 = vpop.eup %5354  ;;  %v1446_v11 = vmax.f32 %v6724_v45, 1.0  ;;  %v6763_v59 = vadd.f32 %v5042_v4, %v5041_v60  ;;  %v5044_v53 = vpop.f32.mrb[54].mxu1  ;;  %v2815_v19 = vsel %vm2783_vm0, %v6117_v50, 256  ;;  %5368 = vrcp.f32 %v1323_v13  ;;  %v9431_v16 = vld [vmem:[#allocation137_spill] sm:$0xff] }
 0x18b   : > { %9371 = vst [vmem:[#allocation167_spill] sm:$0xff] %v6752_v28  ;;  %9372 = vst [vmem:[#allocation168_spill] sm:$0xff] %v6756_v31  ;;  %v5357_v28 = vpop.eup %5356  ;;  %v6768_v31 = vsub.f32 256.0, %v6460_v61  ;;  %v5045_v12 = vpop.f32.mrb[55].mxu1  ;;  %v2897_v50 = vsel %vm2896_vm11, %v6655_v20, %v2895_v63  ;;  %v2898_v6 = vsel %vm9138_vm1, %v2814_v33, 2147483647 }
 0x18c   : > { %9373 = vst [vmem:[#allocation169_spill] sm:$0xff] %v6760_v41  ;;  %9375 = vst [vmem:[#allocation171_spill] sm:$0xff] %v6771_v49  ;;  %v6774_v29 = vpop.eup %5358  ;;  %v6777_v60 = vmul.f32 %v5357_v28, %v6763_v59  ;;  %v6779_v4 = vadd.f32 %v5045_v12, %v5044_v53  ;;  %v1324_v57 = vmax.f32 %v6714_v0, 1.0  ;;  %vm2899_vm15 = vcmp.lt.s32.totalorder %v6673_v18, %v2898_v6 }
 0x18d   : > { %9374 = vst [vmem:[#allocation170_spill] sm:$0xff] %v6768_v31  ;;  %9376 = vst [vmem:[#allocation172_spill] sm:$0xff] %v6774_v29  ;;  %v5361_v37 = vpop.eup %5360  ;;  %v2901_v39 = vsel %vm9138_vm1, %v2815_v19, 2147483647  ;;  %vm2904_vm6 = vcmp.lt.s32.totalorder %v2894_v17, %v2897_v50  ;;  %v2900_v28 = vsel %vm2899_vm15, %v6673_v18, %v2898_v6  ;;  %v6794_v20 = vsub.f32 256.0, %v6520_v5 }
 0x18e   : > { %9377 = vst [vmem:[#allocation173_spill] sm:$0xff] %v6777_v60  ;;  %v6787_v13 = vmul.f32 %v5361_v37, %v6779_v4  ;;  %vm2902_vm12 = vcmp.lt.s32.totalorder %v6701_v8, %v2901_v39  ;;  %v2905_v53 = vsel %vm2904_vm6, %v2894_v17, %v2897_v50  ;;  %v6791_v12 = vpop.eup %5362  ;;  %5370 = vrcp.f32 %v1446_v11 }
 0x18f   : > { %9379 = vst [vmem:[#allocation175_spill] sm:$0xff] %v6791_v12  ;;  %9380 = vst [vmem:[#allocation176_spill] sm:$0xff] %v6794_v20  ;;  %v1325_v63 = vmax.f32 %v6736_v10, 1.0  ;;  %v2903_v33 = vsel %vm2902_vm12, %v6701_v8, %v2901_v39  ;;  %v6800_v19 = vmul.f32 %v6407_v51, %v6724_v45  ;;  %5372 = vrcp.f32 %v1447_v46  ;;  %v9429_v12 = vld [vmem:[#allocation124_spill] sm:$0xff] }
 0x190   : > { %9378 = vst [vmem:[#allocation174_spill] sm:$0xff] %v6787_v13  ;;  %v6804_v6 = vmul.f32 %v6428_v38, %v6727_v56  ;;  %v5047_v50 = vpop.f32.mrb[56].mxu1  ;;  %vm2906_vm13 = vcmp.lt.s32.totalorder %v2900_v28, %v2903_v33  ;;  %v6807_v37 = vsub.f32 256.0, %v6541_v15  ;;  %v1448_v18 = vmax.f32 %v6768_v31, 1.0 }
 0x191   : > { %9381 = vst [vmem:[#allocation177_spill] sm:$0xff] %v6800_v19  ;;  %v5048_v17 = vpop.f32.mrb[57].mxu1  ;;  %5374 = vrcp.f32 %v1324_v57  ;;  %v2907_v11 = vsel %vm2906_vm13, %v2900_v28, %v2903_v33  ;;  %v6813_v8 = vsub.f32 256.0, %v6578_v1  ;;  %v1449_v46 = vmax.f32 %v6771_v49, 1.0 }
 0x192   : > { %9382 = vst [vmem:[#allocation178_spill] sm:$0xff] %v6804_v6  ;;  %9383 = vst [vmem:[#allocation179_spill] sm:$0xff] %v6807_v37  ;;  %v6810_v39 = vpop.eup %5364  ;;  %v6816_v19 = vadd.f32 %v5048_v17, %v5047_v50  ;;  %v5050_v6 = vpop.f32.mrb[58].mxu1  ;;  %vm2908_vm2 = vcmp.lt.s32.totalorder %v2905_v53, %v2907_v11  ;;  %v6819_v51 = vsub.f32 256.0, %v6600_v48  ;;  %v1450_v56 = vmax.f32 %v6794_v20, 1.0 }
 0x193   : > { %9384 = vst [vmem:[#allocation180_spill] sm:$0xff] %v6810_v39  ;;  %9385 = vst [vmem:[#allocation181_spill] sm:$0xff] %v6813_v8  ;;  %v5367_v38 = vpop.eup %5366  ;;  %5376 = vrcp.f32 %v1325_v63  ;;  %v5051_v57 = vpop.f32.mrb[59].mxu1  ;;  %v2909_v28 = vsel %vm2908_vm2, %v2905_v53, %v2907_v11  ;;  %v6823_v33 = vsub.f32 256.0, %v6644_v42  ;;  %v6832_v26 = vmul.f32 %v6460_v61, %v6768_v31 }
 0x194   : > { %9386 = vst [vmem:[#allocation182_spill] sm:$0xff] %v6819_v51  ;;  %v6826_v45 = vmul.f32 %v5367_v38, %v6816_v19  ;;  %v6828_v55 = vadd.f32 %v5051_v57, %v5050_v6  ;;  %v2910_v50 = vrot.slane %v2909_v28, 4  ;;  %v5369_v17 = vpop.eup %5368  ;;  %5378 = vrcp.f32 %v1448_v18 }
 0x195   : > { %9387 = vst [vmem:[#allocation183_spill] sm:$0xff] %v6823_v33  ;;  %9389 = vst [vmem:[#allocation185_spill] sm:$0xff] %v6832_v26  ;;  %v6835_v62 = vsub.f32 256.0, %v6668_v25  ;;  %v1451_v53 = vmax.f32 %v6807_v37, 1.0  ;;  %v6839_v63 = vsub.f32 256.0, %v6714_v0  ;;  %v1452_v38 = vmax.f32 %v6813_v8, 1.0 }
 0x196   : > { %9388 = vst [vmem:[#allocation184_spill] sm:$0xff] %v6826_v45  ;;  %v6843_v6 = vmul.f32 %v5369_v17, %v6828_v55  ;;  %vm2911_vm7 = vcmp.lt.s32.totalorder %v2909_v28, %v2910_v50  ;;  %5380 = vrcp.f32 %v1449_v46  ;;  %v6846_v18 = vsub.f32 256.0, %v6736_v10 }
 0x197   : > { %9390 = vst [vmem:[#allocation186_spill] sm:$0xff] %v6835_v62  ;;  %9391 = vst [vmem:[#allocation187_spill] sm:$0xff] %v6839_v63  ;;  %v1453_v11 = vmax.f32 %v6819_v51, 1.0  ;;  %v2912_v57 = vsel %vm2911_vm7, %v2909_v28, %v2910_v50  ;;  %v6851_v26 = vmul.f32 %v6484_v23, %v6771_v49  ;;  %5382 = vrcp.f32 %v1450_v56 }
 0x198   : > { %9392 = vst [vmem:[#allocation188_spill] sm:$0xff] %v6843_v6  ;;  %9393 = vst [vmem:[#allocation189_spill] sm:$0xff] %v6846_v18  ;;  %v1454_v61 = vmax.f32 %v6823_v33, 1.0  ;;  %v5053_v31 = vpop.f32.mrb[60].mxu1  ;;  %v2913_v45 = vrot.slane %v2912_v57, 2  ;;  %v6854_v13 = vpop.eup %5370  ;;  %v6858_v46 = vmul.f32 %v6520_v5, %v6794_v20  ;;  %5384 = vrcp.f32 %v1451_v53 }
 0x199   : > { %9394 = vst [vmem:[#allocation190_spill] sm:$0xff] %v6851_v26  ;;  %9395 = vst [vmem:[#allocation191_spill] sm:$0xff] %v6854_v13  ;;  %v6862_v17 = vmul.f32 %v6541_v15, %v6807_v37  ;;  %v1455_v28 = vmax.f32 %v6835_v62, 1.0  ;;  %v5054_v50 = vpop.f32.mrb[61].mxu1  ;;  %v6865_v26 = vpop.eup %5372  ;;  %5386 = vrcp.f32 %v1452_v38  ;;  %v1456_v23 = vmax.f32 %v6839_v63, 1.0 }
 0x19a   : > { %9396 = vst [vmem:[#allocation192_spill] sm:$0xff] %v6858_v46  ;;  %9398 = vst [vmem:[#allocation194_spill] sm:$0xff] %v6865_v26  ;;  %v6867_v56 = vadd.f32 %v5054_v50, %v5053_v31  ;;  %v5056_v49 = vpop.f32.mrb[62].mxu1  ;;  %vm2914_vm9 = vcmp.lt.s32.totalorder %v2912_v57, %v2913_v45  ;;  %v6872_v53 = vmul.f32 %v6578_v1, %v6813_v8  ;;  %v1457_v46 = vmax.f32 %v6846_v18, 1.0  ;;  %v9422_v1 = vld [vmem:[#allocation94_spill] sm:$0xff] }
 0x19b   : > { %9397 = vst [vmem:[#allocation193_spill] sm:$0xff] %v6862_v17  ;;  %v5375_v6 = vpop.eup %5374  ;;  %5388 = vrcp.f32 %v1453_v11  ;;  %v5057_v17 = vpop.f32.mrb[63].mxu1  ;;  %v2915_v15 = vsel %vm2914_vm9, %v2912_v57, %v2913_v45  ;;  %v6882_v37 = vmul.f32 %v6600_v48, %v6819_v51  ;;  %v6890_v45 = vmul.f32 %v6668_v25, %v6835_v62  ;;  %v9416_v25 = vld [vmem:[#allocation71_spill] sm:$0xff]  ;;  %v9420_v48 = vld [vmem:[#allocation85_spill] sm:$0xff] }
 0x19c   : > { %9399 = vst [vmem:[#allocation195_spill] sm:$0xff] %v6872_v53  ;;  %5390 = vrcp.f32 %v1454_v61  ;;  %v6876_v5 = vmul.f32 %v5375_v6, %v6867_v56  ;;  %v6878_v31 = vadd.f32 %v5057_v17, %v5056_v49  ;;  %v2916_v38 = vrot.slane %v2915_v15, 1 }
 0x19d   : > { %v5377_v50 = vpop.eup %5376  ;;  %9401 = vst [vmem:[#allocation197_spill] sm:$0xff] %v6882_v37  ;;  %v6886_v53 = vmul.f32 %v6644_v42, %v6823_v33  ;;  %5392 = vrcp.f32 %v1455_v28  ;;  %9403 = vst [vmem:[#allocation199_spill] sm:$0xff] %v6890_v45  ;;  %v9405_v49 = vsub.s32 7, %v5574_v2  ;;  %v6904_v57 = vmul.f32 %v6714_v0, %v6839_v63  ;;  %v9410_v2 = vld [vmem:[#allocation53_spill] sm:$0xff]  ;;  %v9421_v33 = vld [vmem:[#allocation87_spill] sm:$0xff] }
 0x19e   : > { %9400 = vst [vmem:[#allocation196_spill] sm:$0xff] %v6876_v5  ;;  %5394 = vrcp.f32 %v1456_v23  ;;  %v6893_v61 = vmul.f32 %v5377_v50, %v6878_v31  ;;  %vm2917_vm10 = vcmp.lt.s32.totalorder %v2915_v15, %v2916_v38  ;;  %v6900_v11 = vpop.eup %5378  ;;  %v6908_v17 = vmul.f32 %v6736_v10, %v6846_v18  ;;  %v9409_v50 = vld [vmem:[#allocation49_spill] sm:$0xff] }
 0x19f   : > { %9402 = vst [vmem:[#allocation198_spill] sm:$0xff] %v6886_v53  ;;  %v6898_v6 = vrot.slane %v6878_v31, %v9405_v49  ;;  %9406 = vst [vmem:[#allocation201_spill] sm:$0xff] %v6900_v11  ;;  %5396 = vrcp.f32 %v1457_v46  ;;  %v2918_v23 = vsel %vm2917_vm10, %v2915_v15, %v2916_v38  ;;  %v9411_v53 = vld [vmem:[#allocation55_spill] sm:$0xff]  ;;  %v9413_v10 = vld [vmem:[#allocation61_spill] sm:$0xff] }
 0x1a0   : > { %9404 = vst [vmem:[#allocation200_spill] sm:$0xff] %v6893_v61  ;;  %9407 = vst [vmem:[#allocation202_spill] sm:$0xff] %v6904_v57  ;;  %2920 = vperm.xlu0 %5172, %v2918_v23   ;;  %v5381_v57 = vpop.eup %5380  ;;  %v9412_v46 = vld [vmem:[#allocation59_spill] sm:$0xff]  ;;  %v9414_v38 = vld [vmem:[#allocation65_spill] sm:$0xff] }
 0x1a1   : > { %9408 = vst [vmem:[#allocation203_spill] sm:$0xff] %v6908_v17  ;;  %v1394_v28 = vsub.f32 %v6898_v6, %v6189_v14  ;;  %v1395_v49 = vsub.f32 %v6898_v6, %v9409_v50  ;;  %v1396_v45 = vsub.f32 %v6898_v6, %v9410_v2  ;;  %v1397_v37 = vsub.f32 %v6898_v6, %v9411_v53  ;;  %v9415_v17 = vld [vmem:[#allocation67_spill] sm:$0xff]  ;;  %v5383_v18 = vpop.eup %5382  ;;  %v9417_v63 = vld [vmem:[#allocation73_spill] sm:$0xff] }
 0x1a2   : > { %v1398_v0 = vsub.f32 %v6898_v6, %v9412_v46  ;;  %v1399_v15 = vsub.f32 %v6898_v6, %v9413_v10  ;;  %v1400_v14 = vsub.f32 %v6898_v6, %v9414_v38  ;;  %v1401_v50 = vsub.f32 %v6898_v6, %v9415_v17  ;;  %v9418_v23 = vld [vmem:[#allocation77_spill] sm:$0xff]  ;;  %v9419_v46 = vld [vmem:[#allocation79_spill] sm:$0xff]  ;;  %v5385_v10 = vpop.eup %5384 }
 0x1a3   : > { %v1402_v2 = vsub.f32 %v6898_v6, %v9416_v25  ;;  %v1403_v53 = vsub.f32 %v6898_v6, %v9417_v63  ;;  %v1404_v42 = vsub.f32 %v6898_v6, %v9418_v23  ;;  %v1405_v62 = vsub.f32 %v6898_v6, %v9419_v46  ;;  %v9423_v25 = vld [vmem:[#allocation96_spill] sm:$0xff]  ;;  %v5387_v63 = vpop.eup %5386  ;;  %v9427_v11 = vld [vmem:[#allocation115_spill] sm:$0xff] }
 0x1a4   : > { %v1406_v38 = vsub.f32 %v6898_v6, %v9420_v48  ;;  %v1407_v17 = vsub.f32 %v6898_v6, %v9421_v33  ;;  %v1408_v51 = vsub.f32 %v6898_v6, %v9422_v1  ;;  %v1409_v8 = vsub.f32 %v6898_v6, %v9423_v25 }
 0x1a5   : > { %v1410_v23 = vsub.f32 %v6898_v6, %v6443_v27  ;;  %v1411_v46 = vsub.f32 %v6898_v6, %v6458_v58  ;;  %v1412_v20 = vsub.f32 %v6898_v6, %v6502_v32  ;;  %v1413_v48 = vsub.f32 %v6898_v6, %v6518_v30  ;;  %v5389_v33 = vpop.eup %5388 }
 0x1a6   : > { %v1414_v1 = vsub.f32 %v6898_v6, %v6560_v22  ;;  %v1415_v25 = vsub.f32 %v6898_v6, %v6576_v7  ;;  %v1416_v61 = vsub.f32 %v6898_v6, %v6627_v35  ;;  %v1417_v27 = vsub.f32 %v6898_v6, %v6642_v9  ;;  %v5391_v58 = vpop.eup %5390 }
 0x1a7   : > { %v1418_v32 = vsub.f32 %v6898_v6, %v6696_v34  ;;  %v1419_v30 = vsub.f32 %v6898_v6, %v6712_v54  ;;  %v1420_v5 = vsub.f32 %v6898_v6, %v6763_v59  ;;  %v1421_v22 = vsub.f32 %v6898_v6, %v6779_v4  ;;  %v5393_v7 = vpop.eup %5392  ;;  %v9425_v59 = vld [vmem:[#allocation105_spill] sm:$0xff] }
 0x1a8   : > { %v1422_v35 = vsub.f32 %v6898_v6, %v6816_v19  ;;  %v1423_v9 = vsub.f32 %v6898_v6, %v6828_v55  ;;  %v1424_v60 = vsub.f32 %v6898_v6, %v6867_v56  ;;  %v1425_v34 = vsub.f32 %v6898_v6, %v6878_v31  ;;  %v5395_v54 = vpop.eup %5394  ;;  %v9428_v19 = vld [vmem:[#allocation117_spill] sm:$0xff]  ;;  %v9430_v56 = vld [vmem:[#allocation128_spill] sm:$0xff]  ;;  %v9432_v6 = vld [vmem:[#allocation139_spill] sm:$0xff] }
 0x1a9   : > { %v1459_v47 = vmul.f32 %v9424_v52, %v1394_v28  ;;  %v1461_v40 = vmul.f32 %v9425_v59, %v1395_v49  ;;  %v1463_v4 = vmul.f32 %v9426_v24, %v1396_v45  ;;  %v1465_v26 = vmul.f32 %v9427_v11, %v1397_v37  ;;  %v5397_v13 = vpop.eup %5396  ;;  %v9433_v52 = vld [vmem:[#allocation142_spill] sm:$0xff]  ;;  %v9435_v11 = vld [vmem:[#allocation164_spill] sm:$0xff]  ;;  %v9438_v59 = vld [vmem:[#allocation175_spill] sm:$0xff] }
 0x1aa   : > { %v1467_v39 = vmul.f32 %v9428_v19, %v1398_v0  ;;  %v1469_v55 = vmul.f32 %v9429_v12, %v1399_v15  ;;  %v1471_v29 = vmul.f32 %v6543_v3, %v1400_v14  ;;  %v1473_v41 = vmul.f32 %v9430_v56, %v1401_v50  ;;  %v9434_v45 = vld [vmem:[#allocation162_spill] sm:$0xff]  ;;  %v9436_v15 = vld [vmem:[#allocation169_spill] sm:$0xff]  ;;  %v9437_v14 = vld [vmem:[#allocation172_spill] sm:$0xff] }
 0x1ab   : > { %v1475_v31 = vmul.f32 %v9431_v16, %v1402_v2  ;;  %v1477_v21 = vmul.f32 %v9432_v6, %v1403_v53  ;;  %v1479_v28 = vmul.f32 %v9433_v52, %v1404_v42  ;;  %v1481_v49 = vmul.f32 %v6636_v44, %v1405_v62  ;;  %v9439_v2 = vld [vmem:[#allocation180_spill] sm:$0xff]  ;;  %v9440_v19 = vld [vmem:[#allocation191_spill] sm:$0xff]  ;;  %v9441_v56 = vld [vmem:[#allocation194_spill] sm:$0xff] }
 0x1ac   : > { %v1483_v24 = vmul.f32 %v6662_v43, %v1406_v38  ;;  %v1485_v37 = vmul.f32 %v6690_v36, %v1407_v17  ;;  %v1487_v0 = vmul.f32 %v9434_v45, %v1408_v51  ;;  %v1489_v12 = vmul.f32 %v9435_v11, %v1409_v8  ;;  %v9442_v44 = vld [vmem:[#allocation201_spill] sm:$0xff] }
 0x1ad   : > { %v1491_v3 = vmul.f32 %v9436_v15, %v1410_v23  ;;  %v1493_v50 = vmul.f32 %v9437_v14, %v1411_v46  ;;  %v1495_v16 = vmul.f32 %v9438_v59, %v1412_v20  ;;  %v1497_v53 = vmul.f32 %v9439_v2, %v1413_v48  ;;  %v9443_v46 = vld [vmem:[#allocation48_spill] sm:$0xff]  ;;  %v9444_v20 = vld [vmem:[#allocation51_spill] sm:$0xff] }
 0x1ae   : > { %v1499_v42 = vmul.f32 %v9440_v19, %v1414_v1  ;;  %v1501_v62 = vmul.f32 %v9441_v56, %v1415_v25  ;;  %v1503_v43 = vmul.f32 %v9442_v44, %v1416_v61  ;;  %v1505_v38 = vmul.f32 %v5381_v57, %v1417_v27  ;;  %v9445_v1 = vld [vmem:[#allocation54_spill] sm:$0xff]  ;;  %v9446_v25 = vld [vmem:[#allocation57_spill] sm:$0xff]  ;;  %v9452_v27 = vld [vmem:[#allocation75_spill] sm:$0xff] }
 0x1af   : > { %v1507_v36 = vmul.f32 %v5383_v18, %v1418_v32  ;;  %v1509_v17 = vmul.f32 %v5385_v10, %v1419_v30  ;;  %v1511_v51 = vmul.f32 %v5387_v63, %v1420_v5  ;;  %v1513_v6 = vmul.f32 %v5389_v33, %v1421_v22  ;;  %v9447_v18 = vld [vmem:[#allocation60_spill] sm:$0xff]  ;;  %v9448_v5 = vld [vmem:[#allocation63_spill] sm:$0xff]  ;;  %v9455_v22 = vld [vmem:[#allocation86_spill] sm:$0xff] }
 0x1b0   : > { %v1515_v8 = vmul.f32 %v5391_v58, %v1422_v35  ;;  %v1517_v52 = vmul.f32 %v5393_v7, %v1423_v9  ;;  %v1519_v23 = vmul.f32 %v5395_v54, %v1424_v60  ;;  %v1521_v45 = vmul.f32 %v5397_v13, %v1425_v34  ;;  %v9449_v60 = vld [vmem:[#allocation66_spill] sm:$0xff]  ;;  %v9458_v34 = vld [vmem:[#allocation100_spill] sm:$0xff]  ;;  %v9466_v59 = vld [vmem:[#allocation123_spill] sm:$0xff] }
 0x1b1   : > { %v6998_v11 = vsub.f32 %v9443_v46, %v1459_v47  ;;  %v7001_v48 = vsub.f32 %v9444_v20, %v1461_v40  ;;  %v7004_v15 = vsub.f32 %v9445_v1, %v1463_v4  ;;  %v7007_v61 = vsub.f32 %v9446_v25, %v1465_v26  ;;  %v9450_v47 = vld [vmem:[#allocation69_spill] sm:$0xff]  ;;  %v9451_v40 = vld [vmem:[#allocation72_spill] sm:$0xff]  ;;  %v9453_v26 = vld [vmem:[#allocation78_spill] sm:$0xff] }
 0x1b2   : > { %v7010_v57 = vsub.f32 %v9447_v18, %v1467_v39  ;;  %v7013_v10 = vsub.f32 %v9448_v5, %v1469_v55  ;;  %v7016_v13 = vsub.f32 %v9449_v60, %v1471_v29  ;;  %v7019_v63 = vsub.f32 %v9450_v47, %v1473_v41  ;;  %v9454_v39 = vld [vmem:[#allocation82_spill] sm:$0xff]  ;;  %v9456_v29 = vld [vmem:[#allocation91_spill] sm:$0xff]  ;;  %v9461_v55 = vld [vmem:[#allocation89_spill] sm:$0xff] }
 0x1b3   : > { %v7022_v33 = vsub.f32 %v9451_v40, %v1475_v31  ;;  %v7025_v58 = vsub.f32 %v9452_v27, %v1477_v21  ;;  %v7028_v32 = vsub.f32 %v9453_v26, %v1479_v28  ;;  %v7031_v30 = vsub.f32 %v9454_v39, %v1481_v49  ;;  %v9457_v41 = vld [vmem:[#allocation95_spill] sm:$0xff]  ;;  %v9459_v21 = vld [vmem:[#allocation81_spill] sm:$0xff]  ;;  %v9462_v31 = vld [vmem:[#allocation90_spill] sm:$0xff] }
 0x1b4   : > { %v7034_v7 = vsub.f32 %v9455_v22, %v1483_v24  ;;  %v7037_v35 = vsub.f32 %v9456_v29, %v1485_v37  ;;  %v7040_v9 = vsub.f32 %v9457_v41, %v1487_v0  ;;  %v7043_v54 = vsub.f32 %v9458_v34, %v1489_v12  ;;  %v9460_v4 = vld [vmem:[#allocation83_spill] sm:$0xff]  ;;  %v9465_v14 = vld [vmem:[#allocation120_spill] sm:$0xff]  ;;  %v9468_v19 = vld [vmem:[#allocation98_spill] sm:$0xff] }
 0x1b5   : > { %vm1554_vm3 = vcmp.gt.f32.partialorder %v9459_v21, 0.5  ;;  %vm1555_vm4 = vcmp.gt.f32.partialorder %v9460_v4, 0.5  ;;  %vm1556_vm5 = vcmp.gt.f32.partialorder %v9461_v55, 0.5  ;;  %vm1557_vm8 = vcmp.gt.f32.partialorder %v9462_v31, 0.5  ;;  %v9463_v28 = vld [vmem:[#allocation107_spill] sm:$0xff]  ;;  %v9467_v2 = vld [vmem:[#allocation92_spill] sm:$0xff] }
 0x1b6   : > { %v7050_v49 = vsub.f32 %v9463_v28, %v1491_v3  ;;  %v9464_v24 = vld [vmem:[#allocation111_spill] sm:$0xff]  ;;  %v7056_v0 = vsub.f32 %v9465_v14, %v1495_v16  ;;  %v7059_v12 = vsub.f32 %v9466_v59, %v1497_v53  ;;  %v9470_v44 = vld [vmem:[#allocation101_spill] sm:$0xff]  ;;  %v9472_v20 = vld [vmem:[#allocation136_spill] sm:$0xff] }
 0x1b7   : > { %v7053_v37 = vsub.f32 %v9464_v24, %v1493_v50  ;;  %v9469_v56 = vld [vmem:[#allocation99_spill] sm:$0xff]  ;;  %v7069_v50 = vsub.f32 %v9472_v20, %v1501_v62  ;;  %v9473_v1 = vld [vmem:[#allocation145_spill] sm:$0xff]  ;;  %v9474_v25 = vld [vmem:[#allocation148_spill] sm:$0xff]  ;;  %v7157_v20 = vmul.f32 %v7016_v13, %v7016_v13  ;;  %v7174_v13 = vmul.f32 %v7025_v58, %v7025_v58 }
 0x1b8   : > { %v9471_v46 = vld [vmem:[#allocation131_spill] sm:$0xff]  ;;  %v7072_v16 = vsub.f32 %v9473_v1, %v1503_v43  ;;  %v7075_v53 = vsub.f32 %v9474_v25, %v1505_v38  ;;  %v9475_v18 = vld [vmem:[#allocation42_spill] sm:$0xff]  ;;  %v9477_v60 = vld [vmem:[#allocation44_spill] sm:$0xff]  ;;  %v7193_v58 = vmul.f32 %v7037_v35, %v7037_v35 }
 0x1b9   : > { %v7066_v3 = vsub.f32 %v9471_v46, %v1499_v42  ;;  %vm1522_vm6 = vcmp.gt.f32.partialorder %v9475_v18, 0.5  ;;  %v9476_v5 = vld [vmem:[#allocation43_spill] sm:$0xff]  ;;  %vm1524_vm13 = vcmp.gt.f32.partialorder %v9477_v60, 0.5  ;;  %v9478_v47 = vld [vmem:[#allocation45_spill] sm:$0xff]  ;;  %v9479_v40 = vld [vmem:[#allocation106_spill] sm:$0xff]  ;;  %v7211_v35 = vmul.f32 %v7053_v37, %v7053_v37 }
 0x1ba   : > { %vm1523_vm12 = vcmp.gt.f32.partialorder %v9476_v5, 0.5  ;;  %vm1525_vm2 = vcmp.gt.f32.partialorder %v9478_v47, 0.5  ;;  %v9480_v42 = vld [vmem:[#allocation109_spill] sm:$0xff]  ;;  %v9483_v43 = vld [vmem:[#allocation156_spill] sm:$0xff]  ;;  %v9486_v41 = vld [vmem:[#allocation174_spill] sm:$0xff]  ;;  %v7229_v37 = vmul.f32 %v7069_v50, %v7069_v50 }
 0x1bb   : > { %v9481_v62 = vld [vmem:[#allocation113_spill] sm:$0xff]  ;;  %v7086_v26 = vsub.f32 %v9483_v43, %v1507_v36  ;;  %v7095_v34 = vsub.f32 %v9486_v41, %v1513_v6  ;;  %v9487_v28 = vld [vmem:[#allocation46_spill] sm:$0xff]  ;;  %v9488_v24 = vld [vmem:[#allocation47_spill] sm:$0xff] }
 0x1bc   : > { %v9484_v38 = vld [vmem:[#allocation161_spill] sm:$0xff]  ;;  %v9489_v14 = vld [vmem:[#allocation50_spill] sm:$0xff]  ;;  %v9490_v59 = vld [vmem:[#allocation52_spill] sm:$0xff] }
 0x1bd   : > { %v7089_v39 = vsub.f32 %v9484_v38, %v1509_v17  ;;  %v9485_v22 = vld [vmem:[#allocation173_spill] sm:$0xff]  ;;  %v9496_v6 = vld [vmem:[#allocation188_spill] sm:$0xff]  ;;  %v9500_v46 = vld [vmem:[#allocation58_spill] sm:$0xff]  ;;  %vm9546_vm0 = vcmp.gt.f32.partialorder %v9489_v14, 0.5 }
 0x1be   : > { %v7092_v29 = vsub.f32 %v9485_v22, %v1511_v51  ;;  %v9495_v51 = vld [vmem:[#allocation184_spill] sm:$0xff]  ;;  %v7109_v25 = vsub.f32 %v9496_v6, %v1517_v52  ;;  %vm1531_vm11 = vcmp.gt.f32.partialorder %v9500_v46, 0.5  ;;  %v9501_v36 = vld [vmem:[#allocation62_spill] sm:$0xff]  ;;  %v7135_v6 = vmul.f32 %v7004_v15, %v7004_v15  ;;  %vm7261_vm1 = vmand %vm1522_vm6, %vm1554_vm3 }
 0x1bf   : > { %v7106_v1 = vsub.f32 %v9495_v51, %v1515_v8  ;;  %v9497_v43 = vld [vmem:[#allocation196_spill] sm:$0xff]  ;;  %v7149_v15 = vmul.f32 %v7010_v57, %v7010_v57  ;;  %v7161_v51 = vmul.f32 %v7019_v63, %v7019_v63  ;;  %v7178_v63 = vmul.f32 %v7028_v32, %v7028_v32  ;;  %v9525_v57 = vld [vmem:[#allocation121_spill] sm:$0xff]  ;;  %vm7269_vm7 = vmand %vm1523_vm12, %vm1555_vm4 }
 0x1c0   : > { %v7112_v38 = vsub.f32 %v9497_v43, %v1519_v23  ;;  %v9498_v22 = vld [vmem:[#allocation200_spill] sm:$0xff]  ;;  %v7127_v23 = vmul.f32 %v6998_v11, %v6998_v11  ;;  %v7139_v43 = vmul.f32 %v7007_v61, %v7007_v61  ;;  %v7153_v61 = vmul.f32 %v7013_v10, %v7013_v10  ;;  %vm7277_vm10 = vmand %vm1524_vm13, %vm1556_vm5  ;;  %v9535_v18 = vld [vmem:[#allocation126_spill] sm:$0xff] }
 0x1c1   : > { %v7115_v41 = vsub.f32 %v9498_v22, %v1521_v45  ;;  %v9499_v27 = vld [vmem:[#allocation56_spill] sm:$0xff]  ;;  %v7131_v45 = vmul.f32 %v7001_v48, %v7001_v48  ;;  %v7170_v10 = vmul.f32 %v7022_v33, %v7022_v33  ;;  %v7182_v8 = vmul.f32 %v7031_v30, %v7031_v30  ;;  %v9524_v48 = vld [vmem:[#allocation179_spill] sm:$0xff]  ;;  %vm7285_vm3 = vmand %vm1525_vm2, %vm1557_vm8 }
 0x1c2   : > { %vm1530_vm15 = vcmp.gt.f32.partialorder %v9499_v27, 0.5  ;;  %v9502_v17 = vld [vmem:[#allocation64_spill] sm:$0xff]  ;;  %v7189_v33 = vmul.f32 %v7034_v7, %v7034_v7  ;;  %v7197_v32 = vmul.f32 %v7040_v9, %v7040_v9  ;;  %v7201_v30 = vmul.f32 %v7043_v54, %v7043_v54  ;;  %v9536_v5 = vld [vmem:[#allocation182_spill] sm:$0xff] }
 0x1c3   : > { %v9507_v22 = vld [vmem:[#allocation68_spill] sm:$0xff]  ;;  %v7207_v7 = vmul.f32 %v7050_v49, %v7050_v49  ;;  %v7215_v9 = vmul.f32 %v7056_v0, %v7056_v0  ;;  %v7219_v54 = vmul.f32 %v7059_v12, %v7059_v12  ;;  %v7225_v49 = vmul.f32 %v7066_v3, %v7066_v3  ;;  %v9556_v14 = vld [vmem:[#allocation110_spill] sm:$0xff] }
 0x1c4   : > { %v9513_v11 = vld [vmem:[#allocation80_spill] sm:$0xff]  ;;  %v7233_v0 = vmul.f32 %v7072_v16, %v7072_v16  ;;  %v7237_v12 = vmul.f32 %v7075_v53, %v7075_v53  ;;  %v7243_v3 = vmul.f32 %v7086_v26, %v7086_v26  ;;  %v7247_v50 = vmul.f32 %v7089_v39, %v7089_v39  ;;  %v9569_v27 = vld [vmem:[#allocation118_spill] sm:$0xff] }
 0x1c5   : > { %v7251_v16 = vmul.f32 %v7092_v29, %v7092_v29  ;;  %v7255_v53 = vmul.f32 %v7095_v34, %v7095_v34  ;;  %v7293_v55 = vmul.f32 %v7106_v1, %v7106_v1  ;;  %v7297_v60 = vmul.f32 %v7109_v25, %v7109_v25  ;;  %v9553_v34 = vld [vmem:[#allocation132_spill] sm:$0xff]  ;;  %v9574_v46 = vld [vmem:[#allocation138_spill] sm:$0xff] }
 0x1c6   : > { %v7301_v31 = vmul.f32 %v7112_v38, %v7112_v38  ;;  %v7305_v47 = vmul.f32 %v7115_v41, %v7115_v41  ;;  %vm9537_vm5 = vcmp.gt.f32.partialorder %v9467_v2, 0.5  ;;  %vm9538_vm8 = vcmp.gt.f32.partialorder %v9487_v28, 0.5  ;;  %v9554_v28 = vld [vmem:[#allocation183_spill] sm:$0xff]  ;;  %v9557_v25 = vld [vmem:[#allocation116_spill] sm:$0xff] }
 0x1c7   : > { %vm7311_vm12 = vmand %vm9538_vm8, %vm9537_vm5  ;;  %vm9541_vm13 = vcmp.gt.f32.partialorder %v9468_v19, 0.5  ;;  %vm9542_vm2 = vcmp.gt.f32.partialorder %v9488_v24, 0.5  ;;  %vm9545_vm4 = vcmp.gt.f32.partialorder %v9469_v56, 0.5  ;;  %vm9549_vm5 = vcmp.gt.f32.partialorder %v9470_v44, 0.5  ;;  %v9555_v24 = vld [vmem:[#allocation104_spill] sm:$0xff]  ;;  %v9558_v44 = vld [vmem:[#allocation119_spill] sm:$0xff] }
 0x1c8   : > { %vm7319_vm6 = vmand %vm9542_vm2, %vm9541_vm13  ;;  %vm9550_vm8 = vcmp.gt.f32.partialorder %v9490_v59, 0.5  ;;  %v9551_v19 = vmov 0  ;;  %v1714_v56 = vmul.f32 %v7127_v23, %v9555_v24  ;;  %v1715_v1 = vmul.f32 %v7131_v45, %v9556_v14  ;;  %v9578_v24 = vld [vmem:[#allocation130_spill] sm:$0xff]  ;;  %v9586_v45 = vld [vmem:[#allocation125_spill] sm:$0xff] }
 0x1c9   : > { %vm7327_vm14 = vmand %vm9546_vm0, %vm9545_vm4  ;;  %v1716_v38 = vmul.f32 %v7135_v6, %v9557_v25  ;;  %v1717_v59 = vmul.f32 %v7139_v43, %v9558_v44  ;;  %vm9559_vm0 = vcmp.gt.f32.partialorder %v9479_v40, 0.5  ;;  %v9560_v41 = vmov 0  ;;  %v9576_v6 = vld [vmem:[#allocation127_spill] sm:$0xff]  ;;  %v9579_v25 = vld [vmem:[#allocation140_spill] sm:$0xff] }
 0x1ca   : > { %vm7335_vm9 = vmand %vm9550_vm8, %vm9549_vm5  ;;  %vm9562_vm5 = vcmp.gt.f32.partialorder %v9480_v42, 0.5  ;;  %v9563_v23 = vmov 0  ;;  %vm9565_vm2 = vcmp.gt.f32.partialorder %v9481_v62, 0.5  ;;  %vm9566_vm13 = vcmp.gt.f32.partialorder %v9501_v36, 0.5  ;;  %v9577_v36 = vld [vmem:[#allocation129_spill] sm:$0xff]  ;;  %v9580_v44 = vld [vmem:[#allocation122_spill] sm:$0xff] }
 0x1cb   : > { %v9552_v19 = vsel %vm7335_vm9, 4294967295, %v9551_v19  ;;  %vm7353_vm4 = vmand %vm1530_vm15, %vm9559_vm0  ;;  %v9567_v40 = vmov 0  ;;  %vm9570_vm15 = vcmp.gt.f32.partialorder %v9569_v27, 0.5  ;;  %vm9571_vm0 = vcmp.gt.f32.partialorder %v9502_v17, 0.5 }
 0x1cc   : > { %v9561_v41 = vsel %vm7353_vm4, 4294967295, %v9560_v41  ;;  %vm7361_vm8 = vmand %vm1531_vm11, %vm9562_vm5  ;;  %v9572_v42 = vmov 0  ;;  %v1718_v62 = vmul.f32 %v7149_v15, %v9576_v6  ;;  %v1719_v43 = vmul.f32 %v7153_v61, %v9577_v36  ;;  %v9588_v15 = vld [vmem:[#allocation70_spill] sm:$0xff]  ;;  %v9602_v36 = vld [vmem:[#allocation76_spill] sm:$0xff] }
 0x1cd   : > { %v9564_v23 = vsel %vm7361_vm8, 4294967295, %v9563_v23  ;;  %vm7369_vm9 = vmand %vm9566_vm13, %vm9565_vm2  ;;  %v1720_v14 = vmul.f32 %v7157_v20, %v9578_v24  ;;  %v1721_v17 = vmul.f32 %v7161_v51, %v9579_v25  ;;  %vm9581_vm13 = vcmp.gt.f32.partialorder %v9580_v44, 0.5  ;;  %v9593_v20 = vld [vmem:[#allocation133_spill] sm:$0xff]  ;;  %v9595_v6 = vld [vmem:[#allocation74_spill] sm:$0xff] }
 0x1ce   : > { %v9568_v40 = vsel %vm7369_vm9, 4294967295, %v9567_v40  ;;  %vm7377_vm4 = vmand %vm9571_vm0, %vm9570_vm15  ;;  %vm9582_vm2 = vcmp.gt.f32.partialorder %v9507_v22, 0.5  ;;  %v9583_v27 = vmov 0  ;;  %vm9587_vm0 = vcmp.gt.f32.partialorder %v9586_v45, 0.5  ;;  %v9600_v22 = vld [vmem:[#allocation134_spill] sm:$0xff]  ;;  %v9609_v44 = vld [vmem:[#allocation141_spill] sm:$0xff] }
 0x1cf   : > { %v9573_v42 = vsel %vm7377_vm4, 4294967295, %v9572_v42  ;;  %vm7395_vm15 = vmand %vm9582_vm2, %vm9581_vm13  ;;  %vm9589_vm5 = vcmp.gt.f32.partialorder %v9588_v15, 0.5  ;;  %v9590_v61 = vmov 0  ;;  %vm9594_vm4 = vcmp.gt.f32.partialorder %v9593_v20, 0.5  ;;  %v9610_v20 = vld [vmem:[#allocation144_spill] sm:$0xff]  ;;  %v9619_v25 = vld [vmem:[#allocation143_spill] sm:$0xff] }
 0x1d0   : > { %v9584_v27 = vsel %vm7395_vm15, 4294967295, %v9583_v27  ;;  %vm7403_vm11 = vmand %vm9589_vm5, %vm9587_vm0  ;;  %vm9596_vm9 = vcmp.gt.f32.partialorder %v9595_v6, 0.5  ;;  %v9597_v51 = vmov 0  ;;  %vm9601_vm13 = vcmp.gt.f32.partialorder %v9600_v22, 0.5  ;;  %v9612_v22 = vld [vmem:[#allocation152_spill] sm:$0xff]  ;;  %v9648_v24 = vld [vmem:[#allocation97_spill] sm:$0xff] }
 0x1d1   : > { %9585 = vst [vmem:[#allocation49_spill] sm:$0xff] %v9584_v27  ;;  %v9591_v61 = vsel %vm7403_vm11, 4294967295, %v9590_v61  ;;  %vm7411_vm8 = vmand %vm9596_vm9, %vm9594_vm4  ;;  %vm9603_vm2 = vcmp.gt.f32.partialorder %v9602_v36, 0.5  ;;  %v9604_v45 = vmov 0  ;;  %v1722_v15 = vmul.f32 %v7170_v10, %v9609_v44  ;;  %v9613_v27 = vld [vmem:[#allocation135_spill] sm:$0xff]  ;;  %v9621_v10 = vld [vmem:[#allocation84_spill] sm:$0xff] }
 0x1d2   : > { %9592 = vst [vmem:[#allocation53_spill] sm:$0xff] %v9591_v61  ;;  %v9598_v51 = vsel %vm7411_vm8, 4294967295, %v9597_v51  ;;  %vm7419_vm15 = vmand %vm9603_vm2, %vm9601_vm13  ;;  %v1723_v6 = vmul.f32 %v7174_v13, %v9610_v20  ;;  %v9611_v61 = vld [vmem:[#allocation151_spill] sm:$0xff]  ;;  %v1725_v36 = vmul.f32 %v7182_v8, %v9612_v22  ;;  %vm9614_vm9 = vcmp.gt.f32.partialorder %v9613_v27, 0.5  ;;  %v9635_v27 = vld [vmem:[#allocation93_spill] sm:$0xff] }
 0x1d3   : > { %9599 = vst [vmem:[#allocation55_spill] sm:$0xff] %v9598_v51  ;;  %v9605_v45 = vsel %vm7419_vm15, 4294967295, %v9604_v45  ;;  %v1724_v51 = vmul.f32 %v7178_v63, %v9611_v61  ;;  %vm9615_vm4 = vcmp.gt.f32.partialorder %v9513_v11, 0.5  ;;  %vm9620_vm2 = vcmp.gt.f32.partialorder %v9619_v25, 0.5  ;;  %v9626_v63 = vld [vmem:[#allocation147_spill] sm:$0xff]  ;;  %v9628_v61 = vld [vmem:[#allocation88_spill] sm:$0xff] }
 0x1d4   : > { %9606 = vst [vmem:[#allocation59_spill] sm:$0xff] %v9605_v45  ;;  %vm7437_vm13 = vmand %vm9615_vm4, %vm9614_vm9  ;;  %v9616_v45 = vmov 0  ;;  %vm9622_vm0 = vcmp.gt.f32.partialorder %v9621_v10, 0.5  ;;  %v9623_v13 = vmov 0  ;;  %vm9627_vm15 = vcmp.gt.f32.partialorder %v9626_v63, 0.5  ;;  %v9633_v11 = vld [vmem:[#allocation149_spill] sm:$0xff] }
 0x1d5   : > { %v9617_v45 = vsel %vm7437_vm13, 4294967295, %v9616_v45  ;;  %vm7445_vm5 = vmand %vm9622_vm0, %vm9620_vm2  ;;  %vm9629_vm8 = vcmp.gt.f32.partialorder %v9628_v61, 0.5  ;;  %v9630_v8 = vmov 0  ;;  %vm9634_vm9 = vcmp.gt.f32.partialorder %v9633_v11, 0.5  ;;  %v9640_v44 = vld [vmem:[#allocation150_spill] sm:$0xff]  ;;  %v9642_v22 = vld [vmem:[#allocation153_spill] sm:$0xff] }
 0x1d6   : > { %9618 = vst [vmem:[#allocation61_spill] sm:$0xff] %v9617_v45  ;;  %v9624_v13 = vsel %vm7445_vm5, 4294967295, %v9623_v13  ;;  %vm7453_vm11 = vmand %vm9629_vm8, %vm9627_vm15  ;;  %vm9636_vm4 = vcmp.gt.f32.partialorder %v9635_v27, 0.5  ;;  %v9637_v25 = vmov 0  ;;  %v1726_v10 = vmul.f32 %v7189_v33, %v9642_v22  ;;  %v9643_v63 = vld [vmem:[#allocation154_spill] sm:$0xff]  ;;  %v9646_v45 = vld [vmem:[#allocation159_spill] sm:$0xff] }
 0x1d7   : > { %9625 = vst [vmem:[#allocation65_spill] sm:$0xff] %v9624_v13  ;;  %v9631_v8 = vsel %vm7453_vm11, 4294967295, %v9630_v8  ;;  %vm7461_vm13 = vmand %vm9636_vm4, %vm9634_vm9  ;;  %v1727_v61 = vmul.f32 %v7193_v58, %v9643_v63  ;;  %v9644_v13 = vld [vmem:[#allocation155_spill] sm:$0xff]  ;;  %v9645_v11 = vld [vmem:[#allocation158_spill] sm:$0xff]  ;;  %vm9647_vm8 = vcmp.gt.f32.partialorder %v9646_v45, 0.5  ;;  %vm9649_vm15 = vcmp.gt.f32.partialorder %v9648_v24, 0.5 }
 0x1d8   : > { %9632 = vst [vmem:[#allocation67_spill] sm:$0xff] %v9631_v8  ;;  %v9638_v25 = vsel %vm7461_vm13, 4294967295, %v9637_v25  ;;  %v1728_v8 = vmul.f32 %v7197_v32, %v9644_v13  ;;  %v1729_v27 = vmul.f32 %v7201_v30, %v9645_v11  ;;  %vm7479_vm9 = vmand %vm9649_vm15, %vm9647_vm8  ;;  %v9653_v20 = vld [vmem:[#allocation160_spill] sm:$0xff]  ;;  %v9655_v33 = vld [vmem:[#allocation102_spill] sm:$0xff]  ;;  %v9657_v58 = vmov 0 }
 0x1d9   : > { %9639 = vst [vmem:[#allocation71_spill] sm:$0xff] %v9638_v25  ;;  %v9650_v25 = vmov 0  ;;  %vm9654_vm4 = vcmp.gt.f32.partialorder %v9653_v20, 0.5  ;;  %vm9656_vm2 = vcmp.gt.f32.partialorder %v9655_v33, 0.5  ;;  %v9661_v13 = vld [vmem:[#allocation165_spill] sm:$0xff]  ;;  %v9662_v45 = vld [vmem:[#allocation166_spill] sm:$0xff] }
 0x1da   : > { %v9651_v25 = vsel %vm7479_vm9, 4294967295, %v9650_v25  ;;  %vm7487_vm0 = vmand %vm9656_vm2, %vm9654_vm4  ;;  %v1730_v30 = vmul.f32 %v7207_v7, %v9661_v13  ;;  %v1731_v24 = vmul.f32 %v7211_v35, %v9662_v45  ;;  %v9663_v22 = vld [vmem:[#allocation167_spill] sm:$0xff]  ;;  %v9664_v11 = vld [vmem:[#allocation168_spill] sm:$0xff]  ;;  %v7583_v26 = vsel %vm7311_vm12, %v1718_v62, -1.0 }
 0x1db   : > { %9652 = vst [vmem:[#allocation73_spill] sm:$0xff] %v9651_v25  ;;  %v9658_v58 = vsel %vm7487_vm0, 4294967295, %v9657_v58  ;;  %v1732_v63 = vmul.f32 %v7215_v9, %v9663_v22  ;;  %v1733_v20 = vmul.f32 %v7219_v54, %v9664_v11  ;;  %v9665_v25 = vld [vmem:[#allocation170_spill] sm:$0xff]  ;;  %v9667_v33 = vld [vmem:[#allocation108_spill] sm:$0xff]  ;;  %v9673_v7 = vld [vmem:[#allocation177_spill] sm:$0xff]  ;;  %v7587_v21 = vsel %vm7319_vm6, %v1719_v43, -1.0 }
 0x1dc   : > { %9659 = vst [vmem:[#allocation77_spill] sm:$0xff] %v9658_v58  ;;  %vm9666_vm8 = vcmp.gt.f32.partialorder %v9665_v25, 0.5  ;;  %vm9668_vm2 = vcmp.gt.f32.partialorder %v9667_v33, 0.5  ;;  %v9669_v58 = vmov 0  ;;  %v1734_v13 = vmul.f32 %v7225_v49, %v9673_v7  ;;  %v9674_v35 = vld [vmem:[#allocation178_spill] sm:$0xff]  ;;  %v9675_v9 = vld [vmem:[#allocation185_spill] sm:$0xff] }
 0x1dd   : > { %vm7504_vm15 = vmand %vm9668_vm2, %vm9666_vm8  ;;  %v1735_v45 = vmul.f32 %v7229_v37, %v9674_v35  ;;  %v1736_v22 = vmul.f32 %v7233_v0, %v9675_v9  ;;  %v9676_v54 = vld [vmem:[#allocation190_spill] sm:$0xff]  ;;  %v9677_v11 = vld [vmem:[#allocation171_spill] sm:$0xff]  ;;  %v7591_v4 = vsel %vm7327_vm14, %v1720_v14, -1.0  ;;  %vm9710_vm12 = vnez %v9561_v41 }
 0x1de   : > { %v9670_v58 = vsel %vm7504_vm15, 4294967295, %v9669_v58  ;;  %v1737_v25 = vmul.f32 %v7237_v12, %v9676_v54  ;;  %vm9678_vm13 = vcmp.gt.f32.partialorder %v9677_v11, 0.5  ;;  %v9679_v33 = vld [vmem:[#allocation114_spill] sm:$0xff]  ;;  %v9683_v32 = vld [vmem:[#allocation192_spill] sm:$0xff]  ;;  %v9684_v7 = vld [vmem:[#allocation193_spill] sm:$0xff]  ;;  %vm9689_vm15 = vcmp.gt.f32.partialorder %v9525_v57, 0.5 }
 0x1df   : > { %9671 = vst [vmem:[#allocation79_spill] sm:$0xff] %v9670_v58  ;;  %vm9680_vm8 = vcmp.gt.f32.partialorder %v9679_v33, 0.5  ;;  %v9681_v58 = vmov 0  ;;  %v1738_v49 = vmul.f32 %v7243_v3, %v9683_v32  ;;  %v1739_v37 = vmul.f32 %v7247_v50, %v9684_v7  ;;  %v9685_v35 = vld [vmem:[#allocation195_spill] sm:$0xff]  ;;  %v9686_v9 = vld [vmem:[#allocation197_spill] sm:$0xff]  ;;  %v9687_v54 = vld [vmem:[#allocation176_spill] sm:$0xff] }
 0x1e0   : > { %vm7521_vm2 = vmand %vm9680_vm8, %vm9678_vm13  ;;  %v1740_v0 = vmul.f32 %v7251_v16, %v9685_v35  ;;  %v1741_v12 = vmul.f32 %v7255_v53, %v9686_v9  ;;  %vm9688_vm4 = vcmp.gt.f32.partialorder %v9687_v54, 0.5  ;;  %v9692_v33 = vld [vmem:[#allocation198_spill] sm:$0xff]  ;;  %v9693_v32 = vld [vmem:[#allocation199_spill] sm:$0xff]  ;;  %vm9696_vm8 = vcmp.gt.f32.partialorder %v9524_v48, 0.5 }
 0x1e1   : > { %v9682_v58 = vsel %vm7521_vm2, 4294967295, %v9681_v58  ;;  %vm7537_vm13 = vmand %vm9689_vm15, %vm9688_vm4  ;;  %v1742_v3 = vmul.f32 %v7293_v55, %v9692_v33  ;;  %v1743_v50 = vmul.f32 %v7297_v60, %v9693_v32  ;;  %v9694_v7 = vld [vmem:[#allocation202_spill] sm:$0xff]  ;;  %v9695_v35 = vld [vmem:[#allocation203_spill] sm:$0xff]  ;;  %vm9697_vm2 = vcmp.gt.f32.partialorder %v9535_v18, 0.5 }
 0x1e2   : > { %v1744_v16 = vmul.f32 %v7301_v31, %v9694_v7  ;;  %v1745_v53 = vmul.f32 %v7305_v47, %v9695_v35  ;;  %vm7553_vm15 = vmand %vm9697_vm2, %vm9696_vm8  ;;  %v7559_v55 = vsel %vm7261_vm1, %v1714_v56, -1.0  ;;  %v7563_v60 = vsel %vm7269_vm7, %v1715_v1, -1.0  ;;  %v9700_v18 = vld [vmem:[#allocation181_spill] sm:$0xff]  ;;  %v9749_v33 = vld [vmem:[#allocation163_spill] sm:$0xff] }
 0x1e3   : > { %v7567_v31 = vsel %vm7277_vm10, %v1716_v38, -1.0  ;;  %v7571_v48 = vsel %vm7285_vm3, %v1717_v59, -1.0  ;;  %vm9701_vm4 = vcmp.gt.f32.partialorder %v9700_v18, 0.5  ;;  %vm9702_vm2 = vcmp.gt.f32.partialorder %v9553_v34, 0.5  ;;  %v9715_v34 = vld [vmem:[#allocation146_spill] sm:$0xff]  ;;  %v9719_v1 = vld [vmem:[#allocation49_spill] sm:$0xff] }
 0x1e4   : > { %vm7577_vm8 = vmand %vm9702_vm2, %vm9701_vm4  ;;  %vm9705_vm1 = vnez %v9552_v19  ;;  %vm9706_vm7 = vcmp.gt.f32.partialorder %v9536_v5, 0.5  ;;  %vm9707_vm10 = vcmp.gt.f32.partialorder %v9574_v46, 0.5  ;;  %v7607_v29 = vsel %vm9710_vm12, %v1722_v15, -1.0  ;;  %v9721_v59 = vld [vmem:[#allocation53_spill] sm:$0xff]  ;;  %v9727_v46 = vld [vmem:[#allocation186_spill] sm:$0xff] }
 0x1e5   : > { %v7595_v47 = vsel %vm9705_vm1, %v1721_v17, -1.0  ;;  %vm7601_vm3 = vmand %vm9707_vm10, %vm9706_vm7  ;;  %vm9711_vm6 = vnez %v9564_v23  ;;  %vm9712_vm14 = vnez %v9568_v40  ;;  %vm9713_vm4 = vnez %v9573_v42  ;;  %v9723_v23 = vld [vmem:[#allocation55_spill] sm:$0xff]  ;;  %v9732_v43 = vld [vmem:[#allocation61_spill] sm:$0xff] }
 0x1e6   : > { %v7611_v2 = vsel %vm9711_vm6, %v1723_v6, -1.0  ;;  %v7615_v19 = vsel %vm9712_vm14, %v1724_v51, -1.0  ;;  %v7619_v5 = vsel %vm9713_vm4, %v1725_v36, -1.0  ;;  %vm9714_vm2 = vcmp.gt.f32.partialorder %v9554_v28, 0.5  ;;  %v9725_v42 = vld [vmem:[#allocation59_spill] sm:$0xff]  ;;  %v9747_v54 = vld [vmem:[#allocation189_spill] sm:$0xff] }
 0x1e7   : > { %vm9716_vm1 = vcmp.gt.f32.partialorder %v9715_v34, 0.5  ;;  %vm9720_vm10 = vnez %v9719_v1  ;;  %vm9722_vm12 = vnez %v9721_v59  ;;  %vm9724_vm6 = vnez %v9723_v23  ;;  %v9736_v36 = vld [vmem:[#allocation71_spill] sm:$0xff] }
 0x1e8   : > { %vm7625_vm7 = vmand %vm9716_vm1, %vm9714_vm2  ;;  %v7631_v38 = vsel %vm9720_vm10, %v1726_v10, -1.0  ;;  %v7635_v41 = vsel %vm9722_vm12, %v1727_v61, -1.0  ;;  %v7639_v40 = vsel %vm9724_vm6, %v1728_v8, -1.0  ;;  %vm9726_vm14 = vnez %v9725_v42  ;;  %v9740_v10 = vld [vmem:[#allocation157_spill] sm:$0xff]  ;;  %v9744_v9 = vld [vmem:[#allocation79_spill] sm:$0xff] }
 0x1e9   : > { %v7643_v28 = vsel %vm9726_vm14, %v1729_v27, -1.0  ;;  %vm9728_vm4 = vcmp.gt.f32.partialorder %v9727_v46, 0.5  ;;  %vm9729_vm2 = vcmp.gt.f32.partialorder %v9640_v44, 0.5  ;;  %vm9733_vm10 = vnez %v9732_v43  ;;  %v9738_v44 = vld [vmem:[#allocation187_spill] sm:$0xff] }
 0x1ea   : > { %vm7649_vm1 = vmand %vm9729_vm2, %vm9728_vm4  ;;  %v7655_v14 = vsel %vm9733_vm10, %v1730_v30, -1.0  ;;  %v7659_v51 = vsel %vm7445_vm5, %v1731_v24, -1.0  ;;  %v7663_v6 = vsel %vm7453_vm11, %v1732_v63, -1.0  ;;  %vm9737_vm12 = vnez %v9736_v36 }
 0x1eb   : > { %v7667_v8 = vsel %vm9737_vm12, %v1733_v20, -1.0  ;;  %vm9739_vm6 = vcmp.gt.f32.partialorder %v9738_v44, 0.5  ;;  %vm9741_vm14 = vcmp.gt.f32.partialorder %v9740_v10, 0.5  ;;  %v7675_v27 = vsel %vm7479_vm9, %v1734_v13, -1.0 }
 0x1ec   : > { %vm1616_vm4 = vmand %vm9741_vm14, %vm9739_vm6  ;;  %v7679_v24 = vsel %vm7487_vm0, %v1735_v45, -1.0  ;;  %vm9745_vm11 = vnez %v9744_v9  ;;  %vm9746_vm5 = vnez %v9682_v58  ;;  %vm9748_vm2 = vcmp.gt.f32.partialorder %v9747_v54, 0.5 }
 0x1ed   : > { %v7683_v63 = vsel %vm9745_vm11, %v1736_v22, -1.0  ;;  %v7687_v20 = vsel %vm9746_vm5, %v1737_v25, -1.0  ;;  %vm9750_vm10 = vcmp.gt.f32.partialorder %v9749_v33, 0.5  ;;  %v7695_v13 = vsel %vm7537_vm13, %v1738_v49, -1.0 }
 0x1ee   : > { %vm1617_vm12 = vmand %vm9750_vm10, %vm9748_vm2  ;;  %v7699_v45 = vsel %vm7553_vm15, %v1739_v37, -1.0  ;;  %v7703_v22 = vsel %vm7577_vm8, %v1740_v0, -1.0  ;;  %v7707_v58 = vsel %vm7601_vm3, %v1741_v12, -1.0  ;;  %v7711_v25 = vsel %vm7625_vm7, %v1742_v3, -1.0 }
 0x1ef   : > { %v7715_v49 = vsel %vm7649_vm1, %v1743_v50, -1.0  ;;  %v7717_v11 = vsel %vm1616_vm4, %v1744_v16, -1.0  ;;  %v7719_v37 = vsel %vm1617_vm12, %v1745_v53, -1.0  ;;  %vm9751_vm0 = vcmask 7168  }
 0x1f0   : > { %v1779_v0 = vsel %vm9751_vm0, %v7559_v55, -inf  ;;  %vm9752_vm9 = vmmov %vm9751_vm0  ;;  %v1807_v30 = vsel %vm9751_vm0, %v7655_v14, -inf }
 0x1f1   : > { %v1780_v32 = vsel %vm9752_vm9, %v7563_v60, -inf  ;;  %vm9753_vm13 = vmmov %vm9751_vm0 }
 0x1f2   : > { %v1781_v12 = vsel %vm9753_vm13, %v7567_v31, -inf  ;;  %vm9754_vm15 = vmmov %vm9751_vm0 }
 0x1f3   : > { %v1782_v3 = vsel %vm9754_vm15, %v7571_v48, -inf  ;;  %vm9755_vm8 = vmmov %vm9751_vm0 }
 0x1f4   : > { %v1783_v50 = vsel %vm9755_vm8, %v7583_v26, -inf  ;;  %vm9756_vm3 = vmmov %vm9751_vm0 }
 0x1f5   : > { %v1785_v7 = vsel %vm9756_vm3, %v7587_v21, -inf  ;;  %vm9757_vm7 = vmmov %vm9751_vm0  ;;  %v1784_v53 = vmax.f32 %v1779_v0, %v1783_v50 }
 0x1f6   : > { %v1787_v16 = vsel %vm9757_vm7, %v7591_v4, -inf  ;;  %vm9758_vm1 = vmmov %vm9751_vm0  ;;  %v1786_v57 = vmax.f32 %v1780_v32, %v1785_v7 }
 0x1f7   : > { %v1789_v35 = vsel %vm9758_vm1, %v7595_v47, -inf  ;;  %v1788_v18 = vmax.f32 %v1781_v12, %v1787_v16  ;;  %vm9759_vm6 = vmmov %vm9751_vm0 }
 0x1f8   : > { %v1790_v52 = vmax.f32 %v1782_v3, %v1789_v35  ;;  %v1791_v39 = vsel %vm9759_vm6, %v7607_v29, -inf  ;;  %vm9760_vm14 = vmmov %vm9751_vm0 }
 0x1f9   : > { %v1793_v34 = vsel %vm9760_vm14, %v7611_v2, -inf  ;;  %vm9761_vm4 = vmmov %vm9751_vm0  ;;  %v1792_v59 = vmax.f32 %v1784_v53, %v1791_v39 }
 0x1fa   : > { %v1795_v56 = vsel %vm9761_vm4, %v7615_v19, -inf  ;;  %vm9762_vm11 = vmmov %vm9751_vm0  ;;  %v1794_v23 = vmax.f32 %v1786_v57, %v1793_v34 }
 0x1fb   : > { %v1797_v1 = vsel %vm9762_vm11, %v7619_v5, -inf  ;;  %v1796_v42 = vmax.f32 %v1788_v18, %v1795_v56  ;;  %vm9763_vm5 = vmmov %vm9751_vm0 }
 0x1fc   : > { %v1798_v46 = vmax.f32 %v1790_v52, %v1797_v1  ;;  %v1799_v62 = vsel %vm9763_vm5, %v7631_v38, -inf  ;;  %vm9764_vm2 = vmmov %vm9751_vm0 }
 0x1fd   : > { %v1801_v43 = vsel %vm9764_vm2, %v7635_v41, -inf  ;;  %vm9765_vm10 = vmmov %vm9751_vm0  ;;  %v1800_v36 = vmax.f32 %v1792_v59, %v1799_v62 }
 0x1fe   : > { %v1803_v17 = vsel %vm9765_vm10, %v7639_v40, -inf  ;;  %vm9766_vm12 = vmmov %vm9751_vm0  ;;  %v1802_v44 = vmax.f32 %v1794_v23, %v1801_v43 }
 0x1ff   : > { %v1805_v15 = vsel %vm9766_vm12, %v7643_v28, -inf  ;;  %v1804_v10 = vmax.f32 %v1796_v42, %v1803_v17  ;;  %vm9767_vm9 = vmmov %vm9751_vm0  ;;  %v1808_v0 = vmax.f32 %v1800_v36, %v1807_v30 }
 0x200   : > { %v1806_v61 = vmax.f32 %v1798_v46, %v1805_v15  ;;  %v1809_v9 = vsel %vm9767_vm9, %v7659_v51, -inf  ;;  %vm9768_vm13 = vmmov %vm9751_vm0 }
 0x201   : > { %v1811_v54 = vsel %vm9768_vm13, %v7663_v6, -inf  ;;  %vm9769_vm15 = vmmov %vm9751_vm0  ;;  %v1810_v32 = vmax.f32 %v1802_v44, %v1809_v9 }
 0x202   : > { %v1813_v33 = vsel %vm9769_vm15, %v7667_v8, -inf  ;;  %v1812_v12 = vmax.f32 %v1804_v10, %v1811_v54  ;;  %vm9770_vm8 = vmmov %vm9751_vm0 }
 0x203   : > { %v1814_v3 = vmax.f32 %v1806_v61, %v1813_v33  ;;  %v1815_v50 = vsel %vm9770_vm8, %v7675_v27, -inf  ;;  %vm9771_vm3 = vmmov %vm9751_vm0 }
 0x204   : > { %v1817_v7 = vsel %vm9771_vm3, %v7679_v24, -inf  ;;  %vm9772_vm7 = vmmov %vm9751_vm0  ;;  %v1816_v53 = vmax.f32 %v1808_v0, %v1815_v50 }
 0x205   : > { %v1819_v16 = vsel %vm9772_vm7, %v7683_v63, -inf  ;;  %vm9773_vm1 = vmmov %vm9751_vm0  ;;  %v1818_v57 = vmax.f32 %v1810_v32, %v1817_v7 }
 0x206   : > { %v1821_v35 = vsel %vm9773_vm1, %v7687_v20, -inf  ;;  %v1820_v18 = vmax.f32 %v1812_v12, %v1819_v16  ;;  %vm9774_vm6 = vmmov %vm9751_vm0 }
 0x207   : > { %v1822_v52 = vmax.f32 %v1814_v3, %v1821_v35  ;;  %v1823_v39 = vsel %vm9774_vm6, %v7695_v13, -inf  ;;  %vm9775_vm14 = vmmov %vm9751_vm0  ;;  %v9782_v3 = vlaneseq }
 0x208   : > { %v1825_v34 = vsel %vm9775_vm14, %v7699_v45, -inf  ;;  %vm9776_vm4 = vmmov %vm9751_vm0  ;;  %v1824_v59 = vmax.f32 %v1816_v53, %v1823_v39 }
 0x209   : > { %v1827_v56 = vsel %vm9776_vm4, %v7703_v22, -inf  ;;  %vm9777_vm11 = vmmov %vm9751_vm0  ;;  %v1826_v23 = vmax.f32 %v1818_v57, %v1825_v34  ;;  %v2944_v50 = vand.u32 127, %v9782_v3  ;;  %v5465_v57 = vmov 1966171168  }
 0x20a   : > { %v1829_v1 = vsel %vm9777_vm11, %v7707_v58, -inf  ;;  %v1828_v42 = vmax.f32 %v1820_v18, %v1827_v56  ;;  %vm9778_vm5 = vmmov %vm9751_vm0  ;;  %v7790_v18 = vunpack.c.l.s4 %v5465_v57  ;;  %v9786_v56 = vld [vmem:[#allocation25_spill] sm:$0xff] }
 0x20b   : > { %v1830_v46 = vmax.f32 %v1822_v52, %v1829_v1  ;;  %v1831_v62 = vsel %vm9778_vm5, %v7711_v25, -inf  ;;  %vm9779_vm2 = vmmov %vm9751_vm0  ;;  %v2945_v35 = vadd.s32 128, %v2944_v50  ;;  %v7788_v53 = vcvt.s32.f32 %v2944_v50  ;;  %v9784_v52 = vld [vmem:[#allocation14_spill] sm:$0xff]  ;;  %v9787_v1 = vld [vmem:[#allocation29_spill] sm:$0xff] }
 0x20c   : > { %v1833_v43 = vsel %vm9779_vm2, %v7715_v49, -inf  ;;  %vm9780_vm10 = vmmov %vm9751_vm0  ;;  %v1832_v36 = vmax.f32 %v1824_v59, %v1831_v62  ;;  %v5466_v50 = vmov 0.0  }
 0x20d   : > { %v1835_v17 = vsel %vm9780_vm10, %v7717_v11, -inf  ;;  %vm9781_vm12 = vmmov %vm9751_vm0  ;;  %v1834_v44 = vmax.f32 %v1826_v23, %v1833_v43  ;;  %v9792_v43 = vld [vmem:[#allocation41_spill] sm:$0xff]  ;;  %vm2950_vm10 = vcmp.le.f32.partialorder %v7788_v53, 127.0 }
 0x20e   : > { %v1837_v15 = vsel %vm9781_vm12, %v7719_v37, -inf  ;;  %v1836_v10 = vmax.f32 %v1828_v42, %v1835_v17  ;;  %v7814_v42 = vcvt.s32.f32 %v2945_v35  ;;  %vm9790_vm6 = vmmov %vm9779_vm2  ;;  %v9798_v35 = vld [vmem:[#allocation5_spill] sm:$0xff] }
 0x20f   : > { %v1838_v61 = vmax.f32 %v1830_v46, %v1837_v15  ;;  %v1839_v30 = vmax.f32 %v1832_v36, %v1834_v44  ;;  %vm9791_vm14 = vmmov %vm9779_vm2 }
 0x210   : > { %vm9793_vm5 = vmmov %vm9779_vm2 }
 0x211   : > { %v1840_v9 = vmax.f32 %v1836_v10, %v1838_v61  ;;  %vm9794_vm12 = vmmov %vm9779_vm2 }
 0x213   : > { %v1841_v54 = vmax.f32 %v1839_v30, %v1840_v9 }
 0x215   : > { %v1842_v33 = vrot.slane %v1841_v54, 4 }
 0x217   : > { %v1843_v0 = vmax.f32 %v1841_v54, %v1842_v33 }
 0x219   : > { %v1844_v32 = vrot.slane %v1843_v0, 2 }
 0x21b   : > { %v1845_v12 = vmax.f32 %v1843_v0, %v1844_v32 }
 0x21d   : > { %v1846_v7 = vrot.slane %v1845_v12, 1 }
 0x21f   : > { %v7786_v16 = vmax.f32 %v1845_v12, %v1846_v7  ;;  %v7880_v7 = vsel %vm2950_vm10, 1.0, %v5466_v50 }
 0x221   : > { %vm1851_vm0 = vcmp.eq.f32.partialorder %v7571_v48, %v7786_v16  ;;  %vm1855_vm9 = vcmp.eq.f32.partialorder %v7595_v47, %v7786_v16  ;;  %vm1859_vm13 = vcmp.eq.f32.partialorder %v7619_v5, %v7786_v16  ;;  %vm1863_vm15 = vcmp.eq.f32.partialorder %v7643_v28, %v7786_v16  ;;  %v9783_v48 = vld [vmem:[#allocation10_spill] sm:$0xff]  ;;  %v9785_v5 = vld [vmem:[#allocation21_spill] sm:$0xff] }
 0x222   : > { %vm1867_vm8 = vcmp.eq.f32.partialorder %v7667_v8, %v7786_v16  ;;  %vm1871_vm3 = vcmp.eq.f32.partialorder %v7687_v20, %v7786_v16  ;;  %vm1875_vm7 = vcmp.eq.f32.partialorder %v7707_v58, %v7786_v16  ;;  %vm1879_vm1 = vcmp.eq.f32.partialorder %v7719_v37, %v7786_v16  ;;  %v9788_v8 = vld [vmem:[#allocation33_spill] sm:$0xff] }
 0x223   : > { %v1883_v47 = vsel %vm1851_vm0, %v9783_v48, 256  ;;  %v1887_v39 = vsel %vm1855_vm9, %v9784_v52, 256  ;;  %v1891_v34 = vsel %vm1859_vm13, %v9785_v5, 256  ;;  %v1895_v28 = vsel %vm1863_vm15, %v9786_v56, 256  ;;  %v9789_v58 = vld [vmem:[#allocation37_spill] sm:$0xff]  ;;  %vm9795_vm0 = vmmov %vm9779_vm2  ;;  %v9799_v48 = vld [vmem:[#allocation8_spill] sm:$0xff] }
 0x224   : > { %v1899_v59 = vsel %vm1867_vm8, %v9787_v1, 256  ;;  %v1903_v23 = vsel %vm1871_vm3, %v9788_v8, 256  ;;  %v2961_v20 = vunpack.c.0.s8 %v7790_v18  ;;  %v1907_v46 = vsel %vm1875_vm7, %v9789_v58, 256  ;;  %v9806_v8 = vld [vmem:[#allocation19_spill] sm:$0xff] }
 0x225   : > { %v1915_v37 = vsel %vm9790_vm6, %v1883_v47, 2147483647  ;;  %v1925_v62 = vsel %vm9791_vm14, %v1887_v39, 2147483647  ;;  %vm1848_vm4 = vcmp.eq.f32.partialorder %v7559_v55, %v7786_v16  ;;  %v1911_v17 = vsel %vm1879_vm1, %v9792_v43, 256  ;;  %v9800_v39 = vld [vmem:[#allocation9_spill] sm:$0xff] }
 0x226   : > { %vm1926_vm11 = vcmp.lt.s32.totalorder %v1915_v37, %v1925_v62  ;;  %v1937_v15 = vsel %vm9793_vm5, %v1891_v34, 2147483647  ;;  %v1949_v36 = vsel %vm9779_vm2, %v1895_v28, 2147483647  ;;  %v1961_v10 = vsel %vm9794_vm12, %v1899_v59, 2147483647 }
 0x227   : > { %v1927_v44 = vsel %vm1926_vm11, %v1915_v37, %v1925_v62  ;;  %v1973_v61 = vsel %vm9795_vm0, %v1903_v23, 2147483647  ;;  %vm1849_vm9 = vcmp.eq.f32.partialorder %v7563_v60, %v7786_v16  ;;  %vm1850_vm15 = vcmp.eq.f32.partialorder %v7567_v31, %v7786_v16  ;;  %v9801_v34 = vld [vmem:[#allocation11_spill] sm:$0xff]  ;;  %v9802_v55 = vld [vmem:[#allocation12_spill] sm:$0xff]  ;;  %v9803_v60 = vld [vmem:[#allocation13_spill] sm:$0xff] }
 0x228   : > { %vm1938_vm13 = vcmp.lt.s32.totalorder %v1927_v44, %v1937_v15  ;;  %vm1852_vm8 = vcmp.eq.f32.partialorder %v7583_v26, %v7786_v16  ;;  %vm1853_vm3 = vcmp.eq.f32.partialorder %v7587_v21, %v7786_v16  ;;  %vm1854_vm7 = vcmp.eq.f32.partialorder %v7591_v4, %v7786_v16  ;;  %v9804_v59 = vld [vmem:[#allocation18_spill] sm:$0xff]  ;;  %v9808_v23 = vld [vmem:[#allocation20_spill] sm:$0xff]  ;;  %v9812_v58 = vld [vmem:[#allocation23_spill] sm:$0xff] }
 0x229   : > { %v1939_v30 = vsel %vm1938_vm13, %v1927_v44, %v1937_v15  ;;  %vm1874_vm11 = vcmp.eq.f32.partialorder %v7703_v22, %v7786_v16  ;;  %vm1876_vm5 = vcmp.eq.f32.partialorder %v7711_v25, %v7786_v16  ;;  %vm1877_vm2 = vcmp.eq.f32.partialorder %v7715_v49, %v7786_v16  ;;  %v9816_v37 = vld [vmem:[#allocation26_spill] sm:$0xff]  ;;  %v9818_v62 = vld [vmem:[#allocation27_spill] sm:$0xff]  ;;  %v9820_v43 = vld [vmem:[#allocation28_spill] sm:$0xff] }
 0x22a   : > { %vm1950_vm14 = vcmp.lt.s32.totalorder %v1939_v30, %v1949_v36  ;;  %v7883_v57 = vsub.s32 %v2961_v20, %v9798_v35  ;;  %v1880_v18 = vsel %vm1848_vm4, %v9798_v35, 256  ;;  %v1881_v47 = vsel %vm1849_vm9, %v9799_v48, 256  ;;  %v9810_v20 = vld [vmem:[#allocation22_spill] sm:$0xff] }
 0x22b   : > { %v1951_v9 = vsel %vm1950_vm14, %v1939_v30, %v1949_v36  ;;  %vm1878_vm14 = vcmp.eq.f32.partialorder %v7717_v11, %v7786_v16  ;;  %v1882_v5 = vsel %vm1850_vm15, %v9800_v39, 256  ;;  %v1884_v56 = vsel %vm1852_vm8, %v9801_v34, 256  ;;  %v9838_v48 = vld [vmem:[#allocation38_spill] sm:$0xff]  ;;  %v9840_v39 = vld [vmem:[#allocation40_spill] sm:$0xff] }
 0x22c   : > { %vm1962_vm6 = vcmp.lt.s32.totalorder %v1951_v9, %v1961_v10  ;;  %v1885_v28 = vsel %vm1853_vm3, %v9802_v55, 256  ;;  %v1886_v1 = vsel %vm1854_vm7, %v9803_v60, 256  ;;  %vm9805_vm4 = vcmp.eq.f32.partialorder %v7607_v29, %v7786_v16 }
 0x22d   : > { %v1963_v54 = vsel %vm1962_vm6, %v1951_v9, %v1961_v10  ;;  %vm9796_vm6 = vmmov %vm9795_vm0  ;;  %vm2951_vm0 = vcmp.le.f32.partialorder %v7814_v42, 127.0  ;;  %v1888_v31 = vsel %vm9805_vm4, %v9804_v59, 256  ;;  %vm9807_vm10 = vcmp.eq.f32.partialorder %v7611_v2, %v7786_v16  ;;  %v9826_v10 = vld [vmem:[#allocation30_spill] sm:$0xff] }
 0x22e   : > { %vm1974_vm12 = vcmp.lt.s32.totalorder %v1963_v54, %v1973_v61  ;;  %v1985_v0 = vsel %vm9796_vm6, %v1907_v46, 2147483647  ;;  %vm9797_vm13 = vmmov %vm9796_vm6  ;;  %v7894_v52 = vsel %vm2951_vm0, 1.0, %v5466_v50  ;;  %v1889_v26 = vsel %vm9807_vm10, %v9806_v8, 256  ;;  %v9814_v46 = vld [vmem:[#allocation24_spill] sm:$0xff] }
 0x22f   : > { %v1975_v33 = vsel %vm1974_vm12, %v1963_v54, %v1973_v61  ;;  %v1997_v12 = vsel %vm9797_vm13, %v1911_v17, 2147483647  ;;  %vm9809_vm9 = vcmp.eq.f32.partialorder %v7615_v19, %v7786_v16  ;;  %vm9811_vm15 = vcmp.eq.f32.partialorder %v7631_v38, %v7786_v16  ;;  %vm9822_vm13 = vmmov %vm9796_vm6  ;;  %v9828_v61 = vld [vmem:[#allocation31_spill] sm:$0xff]  ;;  %v9831_v54 = vld [vmem:[#allocation32_spill] sm:$0xff] }
 0x230   : > { %vm1986_vm1 = vcmp.lt.s32.totalorder %v1975_v33, %v1985_v0  ;;  %v1890_v21 = vsel %vm9809_vm9, %v9808_v23, 256  ;;  %v1892_v4 = vsel %vm9811_vm15, %v9810_v20, 256  ;;  %vm9813_vm8 = vcmp.eq.f32.partialorder %v7635_v41, %v7786_v16  ;;  %vm9823_vm4 = vmmov %vm9796_vm6 }
 0x231   : > { %v1987_v32 = vsel %vm1986_vm1, %v1975_v33, %v1985_v0  ;;  %v1893_v29 = vsel %vm9813_vm8, %v9812_v58, 256  ;;  %vm9815_vm3 = vcmp.eq.f32.partialorder %v7639_v40, %v7786_v16  ;;  %vm9817_vm7 = vcmp.eq.f32.partialorder %v7655_v14, %v7786_v16  ;;  %vm9824_vm10 = vmmov %vm9823_vm4  ;;  %v9833_v0 = vld [vmem:[#allocation34_spill] sm:$0xff] }
 0x232   : > { %vm1998_vm12 = vcmp.lt.s32.totalorder %v1987_v32, %v1997_v12  ;;  %v1894_v2 = vsel %vm9815_vm3, %v9814_v46, 256  ;;  %v1896_v19 = vsel %vm9817_vm7, %v9816_v37, 256  ;;  %vm9819_vm1 = vcmp.eq.f32.partialorder %v7659_v51, %v7786_v16  ;;  %vm9825_vm9 = vmmov %vm9823_vm4 }
 0x233   : > { %v1897_v38 = vsel %vm9819_vm1, %v9818_v62, 256  ;;  %vm9821_vm0 = vcmp.eq.f32.partialorder %v7663_v6, %v7786_v16  ;;  %v1912_v17 = vsel %vm9822_vm13, %v1880_v18, 2147483647  ;;  %v1913_v40 = vsel %vm9796_vm6, %v1881_v47, 2147483647  ;;  %v9839_v47 = vld [vmem:[#allocation39_spill] sm:$0xff] }
 0x234   : > { %v1898_v41 = vsel %vm9821_vm0, %v9820_v43, 256  ;;  %v7951_v15 = vsel %vm1998_vm12, %v1987_v32, %v1997_v12  ;;  %v1914_v14 = vsel %vm9823_vm4, %v1882_v5, 2147483647  ;;  %v1916_v36 = vsel %vm9824_vm10, %v1884_v56, 2147483647  ;;  %vm9830_vm12 = vmmov %vm9823_vm4 }
 0x235   : > { %v1919_v44 = vsel %vm9825_vm9, %v1885_v28, 2147483647  ;;  %v2958_v51 = vcombine.low %v7880_v7, %v7894_v52  ;;  %vm9827_vm15 = vcmp.eq.f32.partialorder %v7675_v27, %v7786_v16  ;;  %vm9829_vm8 = vcmp.eq.f32.partialorder %v7679_v24, %v7786_v16  ;;  %v9835_v27 = vld [vmem:[#allocation35_spill] sm:$0xff]  ;;  %v9837_v24 = vld [vmem:[#allocation36_spill] sm:$0xff]  ;;  %vm9841_vm10 = vmmov %vm9823_vm4 }
 0x236   : > { %v1900_v6 = vsel %vm9827_vm15, %v9826_v10, 256  ;;  %v1901_v30 = vsel %vm9829_vm8, %v9828_v61, 256  ;;  %v1922_v9 = vsel %vm9830_vm12, %v1886_v1, 2147483647  ;;  %vm1917_vm3 = vcmp.lt.s32.totalorder %v1912_v17, %v1916_v36  ;;  %vm9843_vm9 = vmmov %vm9823_vm4 }
 0x237   : > { %vm9832_vm7 = vcmp.eq.f32.partialorder %v7683_v63, %v7786_v16  ;;  %vm9834_vm1 = vcmp.eq.f32.partialorder %v7695_v13, %v7786_v16  ;;  %vm9836_vm0 = vcmp.eq.f32.partialorder %v7699_v45, %v7786_v16  ;;  %vm1920_vm13 = vcmp.lt.s32.totalorder %v1913_v40, %v1919_v44  ;;  %vm9845_vm15 = vmmov %vm9823_vm4 }
 0x238   : > { %v1902_v33 = vsel %vm9832_vm7, %v9831_v54, 256  ;;  %v1904_v32 = vsel %vm9834_vm1, %v9833_v0, 256  ;;  %v1905_v12 = vsel %vm9836_vm0, %v9835_v27, 256  ;;  %v1906_v18 = vsel %vm1874_vm11, %v9837_v24, 256  ;;  %vm9842_vm11 = vmmov %vm9823_vm4  ;;  %v8022_v27 = vpop.permute.xlu0 %2920  ;;  %v9860_v24 = vld [vmem:[#allocation7_spill] sm:$0xff] }
 0x239   : > { %v1908_v63 = vsel %vm1876_vm5, %v9838_v48, 256  ;;  %v1909_v13 = vsel %vm1877_vm2, %v9839_v47, 256  ;;  %vm1923_vm6 = vcmp.lt.s32.totalorder %v1914_v14, %v1922_v9  ;;  %v1910_v45 = vsel %vm1878_vm14, %v9840_v39, 256  ;;  %vm9844_vm5 = vmmov %vm9823_vm4 }
 0x23a   : > { %v1928_v5 = vsel %vm9823_vm4, %v1888_v31, 2147483647  ;;  %v1931_v22 = vsel %vm9841_vm10, %v1889_v26, 2147483647  ;;  %v1918_v34 = vsel %vm1917_vm3, %v1912_v17, %v1916_v36  ;;  %v1934_v56 = vsel %vm9842_vm11, %v1890_v21, 2147483647  ;;  %vm9846_vm2 = vmmov %vm9823_vm4 }
 0x23b   : > { %v1940_v25 = vsel %vm9843_vm9, %v1892_v4, 2147483647  ;;  %v1943_v55 = vsel %vm9844_vm5, %v1893_v29, 2147483647  ;;  %v1921_v28 = vsel %vm1920_vm13, %v1913_v40, %v1919_v44  ;;  %v1946_v49 = vsel %vm9845_vm15, %v1894_v2, 2147483647  ;;  %vm9847_vm8 = vmmov %vm9846_vm2 }
 0x23c   : > { %v1952_v60 = vsel %vm9846_vm2, %v1896_v19, 2147483647  ;;  %v1955_v1 = vsel %vm9847_vm8, %v1897_v38, 2147483647  ;;  %v1924_v11 = vsel %vm1923_vm6, %v1914_v14, %v1922_v9  ;;  %vm9848_vm14 = vmmov %vm9846_vm2  ;;  %vm1929_vm12 = vcmp.lt.s32.totalorder %v1918_v34, %v1928_v5 }
 0x23d   : > { %v1958_v16 = vsel %vm9848_vm14, %v1898_v41, 2147483647  ;;  %vm1932_vm7 = vcmp.lt.s32.totalorder %v1921_v28, %v1931_v22  ;;  %vm1935_vm1 = vcmp.lt.s32.totalorder %v1924_v11, %v1934_v56  ;;  %vm9849_vm3 = vmmov %vm9846_vm2  ;;  %v1930_v31 = vsel %vm1929_vm12, %v1918_v34, %v1928_v5 }
 0x23e   : > { %v1964_v59 = vsel %vm9849_vm3, %v1900_v6, 2147483647  ;;  %v1933_v8 = vsel %vm1932_vm7, %v1921_v28, %v1931_v22  ;;  %v1936_v26 = vsel %vm1935_vm1, %v1924_v11, %v1934_v56  ;;  %vm9850_vm0 = vmmov %vm9846_vm2  ;;  %vm1941_vm13 = vcmp.lt.s32.totalorder %v1930_v31, %v1940_v25 }
 0x23f   : > { %v1967_v23 = vsel %vm9850_vm0, %v1901_v30, 2147483647  ;;  %vm1944_vm4 = vcmp.lt.s32.totalorder %v1933_v8, %v1943_v55  ;;  %vm1947_vm10 = vcmp.lt.s32.totalorder %v1936_v26, %v1946_v49  ;;  %vm9851_vm11 = vmmov %vm9850_vm0  ;;  %v1942_v20 = vsel %vm1941_vm13, %v1930_v31, %v1940_v25 }
 0x240   : > { %v1970_v21 = vsel %vm9851_vm11, %v1902_v33, 2147483647  ;;  %v1945_v4 = vsel %vm1944_vm4, %v1933_v8, %v1943_v55  ;;  %v1948_v58 = vsel %vm1947_vm10, %v1936_v26, %v1946_v49  ;;  %vm9852_vm6 = vmmov %vm9850_vm0  ;;  %vm1953_vm9 = vcmp.lt.s32.totalorder %v1942_v20, %v1952_v60 }
 0x241   : > { %v1976_v29 = vsel %vm9852_vm6, %v1904_v32, 2147483647  ;;  %vm1956_vm5 = vcmp.lt.s32.totalorder %v1945_v4, %v1955_v1  ;;  %vm1959_vm15 = vcmp.lt.s32.totalorder %v1948_v58, %v1958_v16  ;;  %vm9853_vm2 = vmmov %vm9850_vm0  ;;  %v1954_v2 = vsel %vm1953_vm9, %v1942_v20, %v1952_v60 }
 0x242   : > { %v1979_v46 = vsel %vm9853_vm2, %v1905_v12, 2147483647  ;;  %v1957_v37 = vsel %vm1956_vm5, %v1945_v4, %v1955_v1  ;;  %v1960_v19 = vsel %vm1959_vm15, %v1948_v58, %v1958_v16  ;;  %vm9854_vm8 = vmmov %vm9850_vm0  ;;  %vm1965_vm14 = vcmp.lt.s32.totalorder %v1954_v2, %v1964_v59  ;;  %v9858_v12 = vld [vmem:[#allocation15_spill] sm:$0xff] }
 0x243   : > { %v1982_v62 = vsel %vm9854_vm8, %v1906_v18, 2147483647  ;;  %vm1968_vm12 = vcmp.lt.s32.totalorder %v1957_v37, %v1967_v23  ;;  %vm1971_vm7 = vcmp.lt.s32.totalorder %v1960_v19, %v1970_v21  ;;  %vm9855_vm1 = vmmov %vm9850_vm0  ;;  %v1966_v43 = vsel %vm1965_vm14, %v1954_v2, %v1964_v59 }
 0x244   : > { %v1988_v38 = vsel %vm9855_vm1, %v1908_v63, 2147483647  ;;  %v1969_v41 = vsel %vm1968_vm12, %v1957_v37, %v1967_v23  ;;  %v1972_v17 = vsel %vm1971_vm7, %v1960_v19, %v1970_v21  ;;  %vm9856_vm3 = vmmov %vm9850_vm0  ;;  %vm1977_vm0 = vcmp.lt.s32.totalorder %v1966_v43, %v1976_v29 }
 0x245   : > { %v1991_v40 = vsel %vm9856_vm3, %v1909_v13, 2147483647  ;;  %vm1980_vm13 = vcmp.lt.s32.totalorder %v1969_v41, %v1979_v46  ;;  %vm1983_vm4 = vcmp.lt.s32.totalorder %v1972_v17, %v1982_v62  ;;  %vm9857_vm10 = vmmov %vm9855_vm1  ;;  %v1978_v36 = vsel %vm1977_vm0, %v1966_v43, %v1976_v29 }
 0x246   : > { %v1994_v14 = vsel %vm9857_vm10, %v1910_v45, 2147483647  ;;  %v1981_v44 = vsel %vm1980_vm13, %v1969_v41, %v1979_v46  ;;  %v1984_v10 = vsel %vm1983_vm4, %v1972_v17, %v1982_v62  ;;  %vm1989_vm11 = vcmp.lt.s32.totalorder %v1978_v36, %v1988_v38 }
 0x247   : > { %vm1992_vm6 = vcmp.lt.s32.totalorder %v1981_v44, %v1991_v40  ;;  %vm1995_vm9 = vcmp.lt.s32.totalorder %v1984_v10, %v1994_v14  ;;  %v1990_v6 = vsel %vm1989_vm11, %v1978_v36, %v1988_v38  ;;  %v2965_v9 = vrot.slane %v2958_v51, %v7883_v57 }
 0x248   : > { %v1993_v61 = vsel %vm1992_vm6, %v1981_v44, %v1991_v40  ;;  %v1996_v30 = vsel %vm1995_vm9, %v1984_v10, %v1994_v14  ;;  %vm9150_vm8 = vcmp.lt.s32.totalorder %v9858_v12, %v8022_v27  ;;  %vm2923_vm14 = vcmp.eq.s32.totalorder %v9858_v12, %v8022_v27 }
 0x249   : > { %vm2000_vm5 = vcmp.lt.s32.totalorder %v1990_v6, %v1993_v61  ;;  %vm2002_vm15 = vcmp.lt.s32.totalorder %v1996_v30, %v7951_v15  ;;  %v2972_v32 = vrot.slane %v2965_v9, %v7883_v57  ;;  %v4643_v7 = vsel %vm9150_vm8, 1.0, %v5466_v50 }
 0x24a   : > { %v2001_v54 = vsel %vm2000_vm5, %v1990_v6, %v1993_v61  ;;  %v2003_v33 = vsel %vm2002_vm15, %v1996_v30, %v7951_v15  ;;  %v8036_v52 = vsel %vm2923_vm14, 1.0, %v5466_v50  ;;  %vm533_vm12 = vcmask 1040384   ;;  %v9859_v15 = vld [vmem:[#allocation6_spill] sm:$0xff] }
 0x24b   : > { %vm2004_vm2 = vcmp.lt.s32.totalorder %v2001_v54, %v2003_v33  ;;  %v2930_v51 = vrot.slane %v4643_v7, %v9859_v15  ;;  %v2934_v18 = vrot.slane %v4643_v7, %v9860_v24  ;;  %v2974_v48 = vmul.f32 %v8036_v52, %v2972_v32 }
 0x24c   : > { %v8019_v0 = vsel %vm2004_vm2, %v2001_v54, %v2003_v33  ;;  %v5467_v28 = vmov 255.0   ;;  %v5468_v60 = vmov 128.0  }
 0x24d   : > { %v2937_v63 = vsel %vm533_vm12, %v2930_v51, 0.0  ;;  %v2938_v47 = vsel %vm533_vm12, %v2934_v18, 0.0  ;;  %v2979_v13 = vrot.slane %v2974_v48, %v9859_v15  ;;  %v2983_v39 = vrot.slane %v2974_v48, %v9860_v24 }
 0x24e   : > { %v2939_v45 = vadd.f32 %v2938_v47, %v2937_v63 }
 0x24f   : > { %v2986_v5 = vsel %vm533_vm12, %v2979_v13, 0.0  ;;  %v2987_v22 = vsel %vm533_vm12, %v2983_v39, 0.0 }
 0x250   : > { %2940 = vadd.xlane.f32.xlu0 %v2939_v45  ;;  %v2988_v34 = vadd.f32 %v2987_v22, %v2986_v5 }
 0x252   : > { %2989 = vadd.xlane.f32.xlu1 %v2988_v34 }
 0x2dd   : > { %v2941_v56 = vpop.xlane.xlu0 %2940 }
 0x2de   : > { %v8047_v25 = vsub.f32 51.0, %v2941_v56 }
 0x2df   : > { %v2990_v55 = vpop.xlane.xlu1 %2989 }
 0x2e0   : > { %vm2991_vm7 = vcmp.ge.f32.partialorder %v2990_v55, %v8047_v25 }
 0x2e1   : > { %v2992_v49 = vsel %vm2991_vm7, 127.0, %v5467_v28  ;;  %v2993_v1 = vsel %vm2991_vm7, 0.0, %v5468_v60 }
 0x2e2   : > { %v2994_v11 = vadd.f32 %v2993_v1, %v2992_v49 }
 0x2e4   : > { %v2995_v16 = vmul.f32 0.5, %v2994_v11  ;;  %v5176_v11 = vld [vmem:[%s8942_s6 + $0x4] ss:$8 sps:$4 sm:$0xff]  }
 0x2e5   : > { %2231 = vmatprep.subr.bf16.mxu0 %v5176_v11 }
 0x2e6   : > { %v2996_v59 = vfloor.f32 %v2995_v16  ;;  %v5179_v16 = vld [vmem:[%s8942_s6 + $0x14] ss:$8 sps:$4 sm:$0xff]  }
 0x2e8   : > { %vm2997_vm1 = vcmp.le.f32.partialorder %v7788_v53, %v2996_v59  ;;  %vm2998_vm3 = vcmp.le.f32.partialorder %v7814_v42, %v2996_v59  ;;  %v3040_v37 = vadd.f32 1.0, %v2996_v59 }
 0x2e9   : > { %v4647_v31 = vsel %vm2997_vm1, 1.0, %v5466_v50  ;;  %v4648_v8 = vsel %vm2998_vm3, 1.0, %v5466_v50 }
 0x2ea   : > { %v3005_v26 = vcombine.low %v4647_v31, %v4648_v8  ;;  %v5182_v31 = vld [vmem:[%s8942_s6 + $0x24] ss:$8 sps:$4 sm:$0xff]   ;;  %v5180_v8 = vld [vmem:[%s8942_s6 + $0x20] ss:$8 sps:$4 sm:$0xff]  }
 0x2ec   : > { %v3012_v23 = vrot.slane %v3005_v26, %v7883_v57  ;;  %v5185_v26 = vld [vmem:[%s8942_s6 + $0x34] ss:$8 sps:$4 sm:$0xff]  }
 0x2ee   : > { %v3019_v21 = vrot.slane %v3012_v23, %v7883_v57  ;;  %v5183_v23 = vld [vmem:[%s8942_s6 + $0x30] ss:$8 sps:$4 sm:$0xff]  }
 0x2f0   : > { %v3021_v20 = vmul.f32 %v8036_v52, %v3019_v21  ;;  %v5188_v21 = vld [vmem:[%s8942_s6 + $0x44] ss:$8 sps:$4 sm:$0xff]  }
 0x2f2   : > { %v3026_v4 = vrot.slane %v3021_v20, %v9859_v15  ;;  %v3030_v58 = vrot.slane %v3021_v20, %v9860_v24  ;;  %v5186_v20 = vld [vmem:[%s8942_s6 + $0x40] ss:$8 sps:$4 sm:$0xff]  }
 0x2f4   : > { %v3033_v29 = vsel %vm533_vm12, %v3026_v4, 0.0  ;;  %v3034_v46 = vsel %vm533_vm12, %v3030_v58, 0.0  ;;  %v5191_v4 = vld [vmem:[%s8942_s6 + $0x54] ss:$8 sps:$4 sm:$0xff]   ;;  %v5189_v58 = vld [vmem:[%s8942_s6 + $0x50] ss:$8 sps:$4 sm:$0xff]  }
 0x2f5   : > { %v3035_v2 = vadd.f32 %v3034_v46, %v3033_v29  ;;  %v5194_v29 = vld [vmem:[%s8942_s6 + $0x64] ss:$8 sps:$4 sm:$0xff]   ;;  %v5192_v46 = vld [vmem:[%s8942_s6 + $0x60] ss:$8 sps:$4 sm:$0xff]  }
 0x2f7   : > { %3036 = vadd.xlane.f32.xlu1 %v3035_v2  ;;  %v5197_v2 = vld [vmem:[%s8942_s6 + $0x74] ss:$8 sps:$4 sm:$0xff]  }
 0x384   : > { %v3037_v19 = vpop.xlane.xlu1 %3036 }
 0x385   : > { %vm3038_vm0 = vcmp.ge.f32.partialorder %v3037_v19, %v8047_v25  ;;  %v5200_v19 = vld [vmem:[%s8942_s6 + $0x84] ss:$8 sps:$4 sm:$0xff]  }
 0x386   : > { %v3039_v62 = vsel %vm3038_vm0, %v2996_v59, %v2992_v49  ;;  %v3041_v38 = vsel %vm3038_vm0, %v2993_v1, %v3040_v37  ;;  %v5174_v1 = vld [vmem:[%s8942_s6] ss:$8 sps:$4 sm:$0xff]   ;;  %v5177_v59 = vld [vmem:[%s8942_s6 + $0x10] ss:$8 sps:$4 sm:$0xff]  }
 0x387   : > { %v3042_v43 = vadd.f32 %v3041_v38, %v3039_v62  ;;  %2232 = vmatpush1.bf16.msra.mxu0 %v5174_v1  ;;  %v5195_v37 = vld [vmem:[%s8942_s6 + $0x70] ss:$8 sps:$4 sm:$0xff]  }
 0x388   : > { %2233 = vmatprep.subr.bf16.mxu0 %v5179_v16  ;;  %v5216_v16 = vld [vmem:[%s8942_s6 + $0xe0] ss:$8 sps:$4 sm:$0xff]  }
 0x389   : > { %v3043_v41 = vmul.f32 0.5, %v3042_v43  ;;  %v5201_v43 = vld [vmem:[%s8942_s6 + $0x90] ss:$8 sps:$4 sm:$0xff]  }
 0x38b   : > { %v3044_v17 = vfloor.f32 %v3043_v41  ;;  %2234 = vmatpush1.bf16.msra.mxu0 %v5177_v59  ;;  %v5206_v41 = vld [vmem:[%s8942_s6 + $0xa4] ss:$8 sps:$4 sm:$0xff]  }
 0x38c   : > { %2235 = vmatprep.subr.bf16.mxu0 %v5182_v31  ;;  %v5218_v59 = vld [vmem:[%s8942_s6 + $0xe4] ss:$8 sps:$4 sm:$0xff]  }
 0x38d   : > { %vm3045_vm13 = vcmp.le.f32.partialorder %v7788_v53, %v3044_v17  ;;  %vm3046_vm4 = vcmp.le.f32.partialorder %v7814_v42, %v3044_v17  ;;  %v3088_v32 = vadd.f32 1.0, %v3044_v17  ;;  %v459_v31 = vld [vmem:[%s8212_s28 + $0x8] sm:$0xff] }
 0x38e   : > { %v4649_v40 = vsel %vm3045_vm13, 1.0, %v5466_v50  ;;  %v4650_v14 = vsel %vm3046_vm4, 1.0, %v5466_v50 }
 0x38f   : > { %v3053_v36 = vcombine.low %v4649_v40, %v4650_v14  ;;  %2236 = vmatpush1.bf16.msra.mxu0 %v5180_v8  ;;  %v5209_v40 = vld [vmem:[%s8942_s6 + $0xb4] ss:$8 sps:$4 sm:$0xff]   ;;  %v5207_v14 = vld [vmem:[%s8942_s6 + $0xb0] ss:$8 sps:$4 sm:$0xff]  }
 0x390   : > { %2237 = vmatprep.subr.bf16.mxu0 %v5185_v26  ;;  %v5221_v8 = vld [vmem:[%s8942_s6 + $0xf4] ss:$8 sps:$4 sm:$0xff]  }
 0x391   : > { %v3060_v44 = vrot.slane %v3053_v36, %v7883_v57  ;;  %v5212_v36 = vld [vmem:[%s8942_s6 + $0xc4] ss:$8 sps:$4 sm:$0xff]   ;;  %v497_v26 = vld [vmem:[%s8224_s25 + $0x30] sm:$0xff] }
 0x393   : > { %v3067_v10 = vrot.slane %v3060_v44, %v7883_v57  ;;  %2238 = vmatpush1.bf16.msra.mxu0 %v5183_v23  ;;  %v5210_v44 = vld [vmem:[%s8942_s6 + $0xc0] ss:$8 sps:$4 sm:$0xff]   ;;  %v5219_v23 = vld [vmem:[%s8942_s6 + $0xf0] ss:$8 sps:$4 sm:$0xff]  }
 0x394   : > { %2239 = vmatprep.subr.bf16.mxu0 %v5188_v21  ;;  %v462_v21 = vld [vmem:[%s8212_s28 + $0x20] sm:$0xff] }
 0x395   : > { %v3069_v6 = vmul.f32 %v8036_v52, %v3067_v10  ;;  %v5215_v10 = vld [vmem:[%s8942_s6 + $0xd4] ss:$8 sps:$4 sm:$0xff]  }
 0x397   : > { %v3074_v61 = vrot.slane %v3069_v6, %v9859_v15  ;;  %v3078_v30 = vrot.slane %v3069_v6, %v9860_v24  ;;  %2240 = vmatpush1.bf16.msra.mxu0 %v5186_v20  ;;  %v5213_v6 = vld [vmem:[%s8942_s6 + $0xd0] ss:$8 sps:$4 sm:$0xff]   ;;  %v499_v20 = vld [vmem:[%s8224_s25 + $0x40] sm:$0xff] }
 0x398   : > { %2241 = vmatprep.subr.bf16.mxu0 %v5191_v4  ;;  %v464_v4 = vld [vmem:[%s8212_s28 + $0x30] sm:$0xff] }
 0x399   : > { %v3081_v9 = vsel %vm533_vm12, %v3074_v61, 0.0  ;;  %v3082_v54 = vsel %vm533_vm12, %v3078_v30, 0.0 }
 0x39a   : > { %v3083_v33 = vadd.f32 %v3082_v54, %v3081_v9  ;;  %v2006_v9 = vrot.slane %v8019_v0, 4 }
 0x39b   : > { %2242 = vmatpush1.bf16.msra.mxu0 %v5189_v58  ;;  %v501_v58 = vld [vmem:[%s8224_s25 + $0x50] sm:$0xff] }
 0x39c   : > { %3084 = vadd.xlane.f32.xlu1 %v3083_v33  ;;  %2243 = vmatprep.subr.bf16.mxu0 %v5194_v29  ;;  %vm2007_vm5 = vcmp.lt.s32.totalorder %v8019_v0, %v2006_v9  ;;  %v466_v29 = vld [vmem:[%s8212_s28 + $0x40] sm:$0xff] }
 0x39f   : > { %2244 = vmatpush1.bf16.msra.mxu0 %v5192_v46  ;;  %v503_v46 = vld [vmem:[%s8224_s25 + $0x60] sm:$0xff] }
 0x3a0   : > { %2245 = vmatprep.subr.bf16.mxu0 %v5197_v2  ;;  %v468_v2 = vld [vmem:[%s8212_s28 + $0x50] sm:$0xff] }
 0x3a3   : > { %2246 = vmatpush1.bf16.msra.mxu0 %v5195_v37  ;;  %v505_v37 = vld [vmem:[%s8224_s25 + $0x70] sm:$0xff] }
 0x3a4   : > { %2247 = vmatprep.subr.bf16.mxu0 %v5200_v19  ;;  %v470_v19 = vld [vmem:[%s8212_s28 + $0x60] sm:$0xff] }
 0x429   : > { %v3085_v7 = vpop.xlane.xlu1 %3084 }
 0x42a   : > { %vm3086_vm10 = vcmp.ge.f32.partialorder %v3085_v7, %v8047_v25 }
 0x42b   : > { %v8074_v51 = vsel %vm3086_vm10, %v3044_v17, %v3039_v62  ;;  %v8076_v18 = vsel %vm3086_vm10, %v3041_v38, %v3088_v32  ;;  %v5198_v62 = vld [vmem:[%s8942_s6 + $0x80] ss:$8 sps:$4 sm:$0xff]   ;;  %v5203_v38 = vld [vmem:[%s8942_s6 + $0x94] ss:$8 sps:$4 sm:$0xff]  }
 0x42c   : > { %v3090_v48 = vadd.f32 %v8076_v18, %v8074_v51  ;;  %2248 = vmatpush1.bf16.msra.mxu0 %v5198_v62  ;;  %v5204_v17 = vld [vmem:[%s8942_s6 + $0xa0] ss:$8 sps:$4 sm:$0xff]  }
 0x42d   : > { %2249 = vmatprep.subr.bf16.mxu0 %v5203_v38  ;;  %v507_v62 = vld [vmem:[%s8224_s25 + $0x80] sm:$0xff]  ;;  %v472_v38 = vld [vmem:[%s8212_s28 + $0x70] sm:$0xff] }
 0x42e   : > { %v3091_v63 = vmul.f32 0.5, %v3090_v48 }
 0x430   : > { %v8080_v47 = vfloor.f32 %v3091_v63  ;;  %2250 = vmatpush1.bf16.msra.mxu0 %v5201_v43  ;;  %v2008_v63 = vsel %vm2007_vm5, %v8019_v0, %v2006_v9  ;;  %v509_v43 = vld [vmem:[%s8224_s25 + $0x90] sm:$0xff] }
 0x431   : > { %2251 = vmatprep.subr.bf16.mxu0 %v5206_v41 }
 0x432   : > { %vm3093_vm11 = vcmp.le.f32.partialorder %v7788_v53, %v8080_v47  ;;  %vm3094_vm6 = vcmp.le.f32.partialorder %v7814_v42, %v8080_v47  ;;  %v3136_v61 = vadd.f32 1.0, %v8080_v47 }
 0x433   : > { %v4651_v13 = vsel %vm3093_vm11, 1.0, %v5466_v50  ;;  %v4652_v39 = vsel %vm3094_vm6, 1.0, %v5466_v50 }
 0x434   : > { %v3101_v45 = vcombine.low %v4651_v13, %v4652_v39  ;;  %2252 = vmatpush1.bf16.msra.mxu0 %v5204_v17  ;;  %v2009_v13 = vrot.slane %v2008_v63, 2 }
 0x435   : > { %2253 = vmatprep.subr.bf16.mxu0 %v5209_v40 }
 0x436   : > { %v3108_v5 = vrot.slane %v3101_v45, %v7883_v57  ;;  %vm2010_vm7 = vcmp.lt.s32.totalorder %v2008_v63, %v2009_v13 }
 0x437   : > { %v2011_v0 = vsel %vm2010_vm7, %v2008_v63, %v2009_v13 }
 0x438   : > { %v3115_v22 = vrot.slane %v3108_v5, %v7883_v57  ;;  %2254 = vmatpush1.bf16.msra.mxu0 %v5207_v14 }
 0x439   : > { %2255 = vmatprep.subr.bf16.mxu0 %v5212_v36 }
 0x43a   : > { %v3117_v34 = vmul.f32 %v8036_v52, %v3115_v22 }
 0x43c   : > { %v3122_v56 = vrot.slane %v3117_v34, %v9859_v15  ;;  %v3126_v55 = vrot.slane %v3117_v34, %v9860_v24  ;;  %2256 = vmatpush1.bf16.msra.mxu0 %v5210_v44 }
 0x43d   : > { %2257 = vmatprep.subr.bf16.mxu0 %v5215_v10 }
 0x43e   : > { %v3129_v28 = vsel %vm533_vm12, %v3122_v56, 0.0  ;;  %v3130_v49 = vsel %vm533_vm12, %v3126_v55, 0.0 }
 0x43f   : > { %v3131_v60 = vadd.f32 %v3130_v49, %v3129_v28  ;;  %v2012_v28 = vrot.slane %v2011_v0, 1 }
 0x440   : > { %2258 = vmatpush1.bf16.msra.mxu0 %v5213_v6 }
 0x441   : > { %3132 = vadd.xlane.f32.xlu1 %v3131_v60  ;;  %vm2013_vm1 = vcmp.lt.s32.totalorder %v2011_v0, %v2012_v28  ;;  %2259 = vmatprep.subr.bf16.mxu0 %v5218_v59  ;;  %v500_v59 = vld [vmem:[%s8224_s25 + $0x48] sm:$0xff] }
 0x442   : > { %v2014_v60 = vsel %vm2013_vm1, %v2011_v0, %v2012_v28  ;;  %v491_v0 = vld [vmem:[%s8224_s25] sm:$0xff] }
 0x443   : > { %vm2015_vm3 = vcmp.gt.s32.totalorder %v2014_v60, 1  ;;  %v495_v28 = vld [vmem:[%s8224_s25 + $0x20] sm:$0xff] }
 0x444   : > { %v2016_v1 = vsel %vm2015_vm3, %v2014_v60, 1  ;;  %2260 = vmatpush1.bf16.msra.mxu0 %v5216_v16  ;;  %v460_v60 = vld [vmem:[%s8212_s28 + $0x10] sm:$0xff]  ;;  %v463_v16 = vld [vmem:[%s8212_s28 + $0x28] sm:$0xff] }
 0x445   : > { %vm2017_vm0 = vcmp.lt.s32.totalorder %v2016_v1, 254  ;;  %2261 = vmatprep.subr.bf16.mxu0 %v5221_v8  ;;  %v502_v8 = vld [vmem:[%s8224_s25 + $0x58] sm:$0xff] }
 0x446   : > { %v2018_v11 = vsel %vm2017_vm0, %v2016_v1, 254  ;;  %v461_v1 = vld [vmem:[%s8212_s28 + $0x18] sm:$0xff] }
 0x448   : > { %2262 = vmatpush1.bf16.msra.mxu0 %v5219_v23  ;;  %v504_v23 = vld [vmem:[%s8224_s25 + $0x68] sm:$0xff] }
 0x4ce   : > { %v3133_v30 = vpop.xlane.xlu1 %3132 }
 0x4cf   : > { %vm3134_vm9 = vcmp.ge.f32.partialorder %v3133_v30, %v8047_v25 }
 0x4d0   : > { %v8184_v54 = vsel %vm3134_vm9, %v8080_v47, %v8074_v51  ;;  %v8187_v33 = vsel %vm3134_vm9, %v8076_v18, %v3136_v61 }
 0x4d1   : > { %v3138_v32 = vadd.f32 %v8187_v33, %v8184_v54 }
 0x4d3   : > { %v3139_v7 = vmul.f32 0.5, %v3138_v32 }
 0x4d5   : > { %v8192_v48 = vfloor.f32 %v3139_v7 }
 0x4d7   : > { %vm3141_vm15 = vcmp.le.f32.partialorder %v7788_v53, %v8192_v48  ;;  %vm3142_vm2 = vcmp.le.f32.partialorder %v7814_v42, %v8192_v48  ;;  %v3184_v41 = vadd.f32 1.0, %v8192_v48 }
 0x4d8   : > { %v4653_v51 = vsel %vm3141_vm15, 1.0, %v5466_v50  ;;  %v4654_v18 = vsel %vm3142_vm2, 1.0, %v5466_v50 }
 0x4d9   : > { %v3149_v47 = vcombine.low %v4653_v51, %v4654_v18 }
 0x4db   : > { %v3156_v39 = vrot.slane %v3149_v47, %v7883_v57 }
 0x4dd   : > { %v3163_v45 = vrot.slane %v3156_v39, %v7883_v57 }
 0x4df   : > { %v3165_v5 = vmul.f32 %v8036_v52, %v3163_v45 }
 0x4e1   : > { %v3170_v22 = vrot.slane %v3165_v5, %v9859_v15  ;;  %v3174_v34 = vrot.slane %v3165_v5, %v9860_v24 }
 0x4e3   : > { %v3177_v56 = vsel %vm533_vm12, %v3170_v22, 0.0  ;;  %v3178_v55 = vsel %vm533_vm12, %v3174_v34, 0.0  ;;  %v492_v22 = vld [vmem:[%s8224_s25 + $0x8] sm:$0xff]  ;;  %v493_v34 = vld [vmem:[%s8224_s25 + $0x10] sm:$0xff] }
 0x4e4   : > { %v3179_v49 = vadd.f32 %v3178_v55, %v3177_v56  ;;  %v494_v56 = vld [vmem:[%s8224_s25 + $0x18] sm:$0xff]  ;;  %v458_v55 = vld [vmem:[%s8212_s28] sm:$0xff] }
 0x4e6   : > { %3180 = vadd.xlane.f32.xlu1 %v3179_v49  ;;  %v496_v49 = vld [vmem:[%s8224_s25 + $0x28] sm:$0xff] }
 0x4f7   : > { %2020 = vperm.xlu1 %5173, %v2018_v11   ;;  %v498_v11 = vld [vmem:[%s8224_s25 + $0x38] sm:$0xff] }
 0x4fb   : > { %2313 = vperm.xlu1 %5173, %v459_v31   ;;  %v465_v31 = vld [vmem:[%s8212_s28 + $0x38] sm:$0xff] }
 0x4ff   : > { %3384 = vperm.xlu1 %5173, %v497_v26   ;;  %v467_v26 = vld [vmem:[%s8212_s28 + $0x48] sm:$0xff] }
 0x503   : > { %2328 = vperm.xlu1 %5173, %v462_v21   ;;  %v469_v21 = vld [vmem:[%s8212_s28 + $0x58] sm:$0xff] }
 0x507   : > { %3394 = vperm.xlu1 %5173, %v499_v20   ;;  %v506_v20 = vld [vmem:[%s8224_s25 + $0x78] sm:$0xff] }
 0x50b   : > { %2338 = vperm.xlu1 %5173, %v464_v4   ;;  %v471_v4 = vld [vmem:[%s8212_s28 + $0x68] sm:$0xff] }
 0x50f   : > { %3404 = vperm.xlu1 %5173, %v501_v58   ;;  %v508_v58 = vld [vmem:[%s8224_s25 + $0x88] sm:$0xff] }
 0x513   : > { %2348 = vperm.xlu1 %5173, %v466_v29   ;;  %v473_v29 = vld [vmem:[%s8212_s28 + $0x78] sm:$0xff] }
 0x517   : > { %3414 = vperm.xlu1 %5173, %v503_v46   ;;  %v510_v46 = vld [vmem:[%s8224_s25 + $0x98] sm:$0xff] }
 0x51b   : > { %2358 = vperm.xlu1 %5173, %v468_v2   ;;  %v475_v2 = vld [vmem:[%s8212_s28 + $0x88] sm:$0xff] }
 0x51f   : > { %3424 = vperm.xlu1 %5173, %v505_v37   ;;  %v511_v37 = vld [vmem:[%s8224_s25 + $0xa0] sm:$0xff] }
 0x523   : > { %2368 = vperm.xlu1 %5173, %v470_v19   ;;  %v512_v19 = vld [vmem:[%s8224_s25 + $0xa8] sm:$0xff] }
 0x527   : > { %3434 = vperm.xlu1 %5173, %v507_v62   ;;  %v476_v62 = vld [vmem:[%s8212_s28 + $0x90] sm:$0xff] }
 0x52b   : > { %2378 = vperm.xlu1 %5173, %v472_v38   ;;  %v477_v38 = vld [vmem:[%s8212_s28 + $0x98] sm:$0xff] }
 0x52f   : > { %3444 = vperm.xlu1 %5173, %v509_v43   ;;  %v513_v43 = vld [vmem:[%s8224_s25 + $0xb0] sm:$0xff] }
 0x573   : > { %v3181_v17 = vpop.xlane.xlu1 %3180 }
 0x574   : > { %vm3182_vm13 = vcmp.ge.f32.partialorder %v3181_v17, %v8047_v25  ;;  %v478_v17 = vld [vmem:[%s8212_s28 + $0xa0] sm:$0xff] }
 0x575   : > { %v8250_v40 = vsel %vm3182_vm13, %v8192_v48, %v8184_v54  ;;  %v8253_v14 = vsel %vm3182_vm13, %v8187_v33, %v3184_v41  ;;  %v514_v41 = vld [vmem:[%s8224_s25 + $0xb8] sm:$0xff] }
 0x576   : > { %v3186_v36 = vadd.f32 %v8253_v14, %v8250_v40 }
 0x577   : > { %v2021_v44 = vpop.permute.xlu1 %2020 }
 0x578   : > { %v3187_v10 = vmul.f32 0.5, %v3186_v36  ;;  %vm2022_vm4 = vcmp.gt.s32.totalorder %v9858_v12, %v2021_v44  ;;  %v479_v36 = vld [vmem:[%s8212_s28 + $0xa8] sm:$0xff] }
 0x579   : > { %v4477_v6 = vsel %vm2022_vm4, 1.0, %v5466_v50 }
 0x57a   : > { %v8259_v61 = vfloor.f32 %v3187_v10  ;;  %v8262_v30 = vrot.slane %v4477_v6, %v9859_v15  ;;  %v8265_v9 = vrot.slane %v4477_v6, %v9860_v24 }
 0x57c   : > { %vm3189_vm10 = vcmp.le.f32.partialorder %v7788_v53, %v8259_v61  ;;  %vm3190_vm11 = vcmp.le.f32.partialorder %v7814_v42, %v8259_v61  ;;  %v2069_v54 = vpack.c.bf16 %v8262_v30, %v8262_v30  ;;  %v2070_v33 = vpack.c.bf16 %v8265_v9, %v8265_v9 }
 0x57d   : > { %v4655_v32 = vsel %vm3189_vm10, 1.0, %v5466_v50  ;;  %v4656_v7 = vsel %vm3190_vm11, 1.0, %v5466_v50  ;;  %v3232_v44 = vadd.f32 1.0, %v8259_v61 }
 0x57e   : > { %2263 = vmatprep.mubr.bf16.mxu0 %v2070_v33  ;;  %v3197_v48 = vcombine.low %v4655_v32, %v4656_v7  ;;  %v515_v33 = vld [vmem:[%s8224_s25 + $0xc0] sm:$0xff] }
 0x57f   : > { %2264 = vmatmul.mubr.bf16.vlgmr.msra.gmra.mrb[64].mxu0 %v2069_v54 }
 0x580   : > { %v3204_v63 = vrot.slane %v3197_v48, %v7883_v57  ;;  %v490_v48 = vld [vmem:[%s416_s17] sm:$0x3]  ;;  %s4834_s17 = sshll.u32 %s5542_s13, 5  ;;  %s4138_s13 = scalar_lea.sflag [#allocation3], %s392_s23 }
 0x582   : > { %v3211_v51 = vrot.slane %v3204_v63, %v7883_v57  ;;  %v480_v63 = vld [vmem:[%s8212_s28 + $0xb0] sm:$0xff] }
 0x584   : > { %v3213_v18 = vmul.f32 %v8036_v52, %v3211_v51 }
 0x586   : > { %v3218_v47 = vrot.slane %v3213_v18, %v9859_v15  ;;  %v3222_v13 = vrot.slane %v3213_v18, %v9860_v24  ;;  %v481_v18 = vld [vmem:[%s8212_s28 + $0xb8] sm:$0xff] }
 0x588   : > { %v3225_v39 = vsel %vm533_vm12, %v3218_v47, 0.0  ;;  %v3226_v45 = vsel %vm533_vm12, %v3222_v13, 0.0 }
 0x589   : > { %v3227_v5 = vadd.f32 %v3226_v45, %v3225_v39  ;;  %v2314_v39 = vpop.permute.xlu1 %2313 }
 0x58b   : > { %3228 = vadd.xlane.f32.xlu0 %v3227_v5 }
 0x5a1   : > { %3354 = vperm.xlu0 %5172, %v491_v0  }
 0x5a5   : > { %3359 = vperm.xlu0 %5172, %v492_v22   ;;  %v517_v22 = vld [vmem:[%s8224_s25 + $0xd0] sm:$0xff] }
 0x5a9   : > { %3364 = vperm.xlu0 %5172, %v493_v34   ;;  %v9861_v34 = vmov 1.0|1.0  }
 0x5ad   : > { %3369 = vperm.xlu0 %5172, %v494_v56  }
 0x5b1   : > { %2308 = vperm.xlu0 %5172, %v458_v55  }
 0x5b5   : > { %3374 = vperm.xlu0 %5172, %v495_v28   ;;  %v457_v28 = vld [vmem:[%s407_s26] sm:$0x3] }
 0x5b9   : > { %3379 = vperm.xlu0 %5172, %v496_v49   ;;  %v8360_v49 = vpop.permute.xlu1 %3384 }
 0x5bd   : > { %2318 = vperm.xlu0 %5172, %v460_v60  }
 0x5c1   : > { %2323 = vperm.xlu0 %5172, %v461_v1   ;;  %v518_v1 = vld [vmem:[%s8224_s25 + $0xd8] sm:$0xff] }
 0x5c5   : > { %3389 = vperm.xlu0 %5172, %v498_v11  }
 0x5c9   : > { %2333 = vperm.xlu0 %5172, %v463_v16  }
 0x5cd   : > { %3399 = vperm.xlu0 %5172, %v500_v59   ;;  %v8367_v59 = vrot.slane %v457_v28, %v9860_v24 }
 0x5d1   : > { %2343 = vperm.xlu0 %5172, %v465_v31  }
 0x5d5   : > { %3409 = vperm.xlu0 %5172, %v502_v8  }
 0x5d9   : > { %2353 = vperm.xlu0 %5172, %v467_v26  }
 0x5dd   : > { %3419 = vperm.xlu0 %5172, %v504_v23   ;;  %v8375_v23 = vrot.slane %v457_v28, %v9859_v15 }
 0x5e1   : > { %2363 = vperm.xlu0 %5172, %v469_v21  }
 0x5e5   : > { %3429 = vperm.xlu0 %5172, %v506_v20   ;;  %v483_v20 = vld [vmem:[%s8212_s28 + $0xc8] sm:$0xff] }
 0x5e9   : > { %2373 = vperm.xlu0 %5172, %v471_v4   ;;  %v8379_v4 = vpop.permute.xlu1 %2328 }
 0x5ed   : > { %3439 = vperm.xlu0 %5172, %v508_v58  }
 0x5f1   : > { %2383 = vperm.xlu0 %5172, %v473_v29   ;;  %v520_v29 = vld [vmem:[%s8224_s25 + $0xe8] sm:$0xff] }
 0x5f5   : > { %3449 = vperm.xlu0 %5172, %v510_v46  }
 0x5f9   : > { %2393 = vperm.xlu0 %5172, %v475_v2   ;;  %v8390_v2 = vpop.permute.xlu1 %3394 }
 0x5fd   : > { %3454 = vperm.xlu0 %5172, %v511_v37   ;;  %v485_v37 = vld [vmem:[%s8212_s28 + $0xd8] sm:$0xff] }
 0x601   : > { %3459 = vperm.xlu0 %5172, %v512_v19  }
 0x605   : > { %2398 = vperm.xlu0 %5172, %v476_v62   ;;  %v521_v62 = vld [vmem:[%s8224_s25 + $0xf0] sm:$0xff] }
 0x609   : > { %2403 = vperm.xlu0 %5172, %v477_v38   ;;  %v8398_v38 = vpop.permute.xlu1 %2338 }
 0x60d   : > { %3464 = vperm.xlu0 %5172, %v513_v43  }
 0x611   : > { %3469 = vperm.xlu0 %5172, %v514_v41   ;;  %v522_v41 = vld [vmem:[%s8224_s25 + $0xf8] sm:$0xff] }
 0x615   : > { %2408 = vperm.xlu0 %5172, %v478_v17   ;;  %v474_v17 = vld [vmem:[%s8212_s28 + $0x80] sm:$0xff] }
 0x618   : > { %v3229_v10 = vpop.xlane.xlu0 %3228 }
 0x619   : > { %vm3230_vm6 = vcmp.ge.f32.partialorder %v3229_v10, %v8047_v25  ;;  %2413 = vperm.xlu0 %5172, %v479_v36   ;;  %v486_v10 = vld [vmem:[%s8212_s28 + $0xe0] sm:$0xff] }
 0x61a   : > { %v8319_v6 = vsel %vm3230_vm6, %v8259_v61, %v8250_v40  ;;  %v8322_v54 = vsel %vm3230_vm6, %v8253_v14, %v3232_v44  ;;  %v8335_v61 = vrot.slane %v490_v48, %v9860_v24  ;;  %v8342_v14 = vrot.slane %v490_v48, %v9859_v15  ;;  %v8404_v44 = vpop.permute.xlu1 %3404  ;;  %v482_v48 = vld [vmem:[%s8212_s28 + $0xc0] sm:$0xff] }
 0x61b   : > { %v3234_v32 = vadd.f32 %v8322_v54, %v8319_v6 }
 0x61d   : > { %v3235_v7 = vmul.f32 0.5, %v3234_v32  ;;  %3474 = vperm.xlu0 %5172, %v515_v33   ;;  %v516_v33 = vld [vmem:[%s8224_s25 + $0xc8] sm:$0xff] }
 0x61f   : > { %v8332_v51 = vfloor.f32 %v3235_v7  ;;  %v487_v7 = vld [vmem:[%s8212_s28 + $0xe8] sm:$0xff] }
 0x620   : > { %v3355_v40 = vpop.permute.xlu0 %3354 }
 0x621   : > { %vm3237_vm9 = vcmp.le.f32.partialorder %v7788_v53, %v8332_v51  ;;  %vm3238_vm5 = vcmp.le.f32.partialorder %v7814_v42, %v8332_v51  ;;  %2418 = vperm.xlu0 %5172, %v480_v63   ;;  %vm3524_vm15 = vcmp.lt.f32.partialorder %v3355_v40, %v8335_v61  ;;  %vm3523_vm1 = vcmp.lt.f32.partialorder %v3355_v40, %v8342_v14  ;;  %v2349_v63 = vpop.permute.xlu1 %2348 }
 0x622   : > { %v4657_v47 = vsel %vm3237_vm9, 1.0, %v5466_v50  ;;  %v4658_v13 = vsel %vm3238_vm5, 1.0, %v5466_v50  ;;  %vm2480_vm5 = vcmp.lt.f32.partialorder %v2314_v39, %v8367_v59 }
 0x623   : > { %v3245_v45 = vcombine.low %v4657_v47, %v4658_v13  ;;  %v519_v47 = vld [vmem:[%s8224_s25 + $0xe0] sm:$0xff]  ;;  %s8894_s25 = scalar_lea.hbm %s8945_s9, %s4834_s17 }
 0x624   : > { %v3360_v5 = vpop.permute.xlu0 %3359 }
 0x625   : > { %vm3525_vm2 = vcmp.lt.f32.partialorder %v3360_v5, %v8342_v14  ;;  %vm3526_vm7 = vcmp.lt.f32.partialorder %v3360_v5, %v8335_v61  ;;  %2423 = vperm.xlu0 %5172, %v481_v18   ;;  %v3252_v0 = vrot.slane %v3245_v45, %v7883_v57  ;;  %v488_v18 = vld [vmem:[%s8212_s28 + $0xf0] sm:$0xff]  ;;  %v489_v45 = vld [vmem:[%s8212_s28 + $0xf8] sm:$0xff] }
 0x626   : > { %vm4726_vm3 = vmpackc.low %vm3526_vm7, %vm3524_vm15  ;;  %vm2479_vm7 = vcmp.lt.f32.partialorder %v2314_v39, %v8375_v23  ;;  %v3415_v39 = vpop.permute.xlu1 %3414 }
 0x627   : > { %vm4728_vm0 = vmpackc.low %vm3525_vm2, %vm3523_vm1  ;;  %4727 = vmatprep.subr.msk.bf16.mxu0 %vm4726_vm3, %v9861_v34  ;;  %v3259_v56 = vrot.slane %v3252_v0, %v7883_v57 }
 0x628   : > { %v3365_v55 = vpop.permute.xlu0 %3364  ;;  %4729 = vmatpush1.bf16.msk.msra.mxu0 %vm4728_vm0, %v9861_v34 }
 0x629   : > { %3484 = vperm.xlu0 %5172, %v517_v22   ;;  %v3261_v60 = vmul.f32 %v8036_v52, %v3259_v56  ;;  %vm3528_vm13 = vcmp.lt.f32.partialorder %v3365_v55, %v8335_v61  ;;  %vm3527_vm11 = vcmp.lt.f32.partialorder %v3365_v55, %v8342_v14 }
 0x62a   : > { %v2359_v22 = vpop.permute.xlu1 %2358 }
 0x62b   : > { %v3266_v11 = vrot.slane %v3261_v60, %v9859_v15  ;;  %v3270_v16 = vrot.slane %v3261_v60, %v9860_v24 }
 0x62c   : > { %v3370_v31 = vpop.permute.xlu0 %3369 }
 0x62d   : > { %vm3529_vm4 = vcmp.lt.f32.partialorder %v3370_v31, %v8342_v14  ;;  %vm3530_vm10 = vcmp.lt.f32.partialorder %v3370_v31, %v8335_v61  ;;  %3489 = vperm.xlu0 %5172, %v518_v1   ;;  %v3273_v8 = vsel %vm533_vm12, %v3266_v11, 0.0  ;;  %v3274_v26 = vsel %vm533_vm12, %v3270_v16, 0.0 }
 0x62e   : > { %vm4730_vm6 = vmpackc.low %vm3530_vm10, %vm3528_vm13  ;;  %v3275_v21 = vadd.f32 %v3274_v26, %v3273_v8  ;;  %v3425_v1 = vpop.permute.xlu1 %3424 }
 0x62f   : > { %vm4732_vm9 = vmpackc.low %vm3529_vm4, %vm3527_vm11  ;;  %4731 = vmatprep.subr.msk.bf16.mxu0 %vm4730_vm6, %v9861_v34 }
 0x630   : > { %v2309_v58 = vpop.permute.xlu0 %2308  ;;  %3276 = vadd.xlane.f32.xlu1 %v3275_v21  ;;  %4733 = vmatpush1.bf16.msk.msra.mxu0 %vm4732_vm9, %v9861_v34 }
 0x631   : > { %vm2477_vm15 = vcmp.lt.f32.partialorder %v2309_v58, %v8375_v23  ;;  %vm2478_vm2 = vcmp.lt.f32.partialorder %v2309_v58, %v8367_v59  ;;  %2433 = vperm.xlu0 %5172, %v483_v20  }
 0x632   : > { %vm4577_vm1 = vmpackc.low %vm2480_vm5, %vm2478_vm2  ;;  %v2369_v16 = vpop.permute.xlu1 %2368 }
 0x633   : > { %vm4579_vm3 = vmpackc.low %vm2479_vm7, %vm2477_vm15  ;;  %4578 = vmatprep.subr.msk.bf16.mxu1 %vm4577_vm1, %v9861_v34 }
 0x634   : > { %v3375_v46 = vpop.permute.xlu0 %3374  ;;  %4580 = vmatpush1.bf16.msk.msra.mxu1 %vm4579_vm3, %v9861_v34  ;;  %vm3536_vm3 = vcmp.lt.f32.partialorder %v8360_v49, %v8335_v61 }
 0x635   : > { %3499 = vperm.xlu0 %5172, %v520_v29   ;;  %vm3532_vm0 = vcmp.lt.f32.partialorder %v3375_v46, %v8335_v61  ;;  %vm3531_vm10 = vcmp.lt.f32.partialorder %v3375_v46, %v8342_v14 }
 0x636   : > { %v3435_v26 = vpop.permute.xlu1 %3434 }
 0x638   : > { %v3380_v19 = vpop.permute.xlu0 %3379 }
 0x639   : > { %vm3533_vm13 = vcmp.lt.f32.partialorder %v3380_v19, %v8342_v14  ;;  %vm3534_vm4 = vcmp.lt.f32.partialorder %v3380_v19, %v8335_v61  ;;  %2443 = vperm.xlu0 %5172, %v485_v37  }
 0x63a   : > { %vm4734_vm11 = vmpackc.low %vm3534_vm4, %vm3532_vm0  ;;  %vm3535_vm4 = vcmp.lt.f32.partialorder %v8360_v49, %v8342_v14  ;;  %v2379_v20 = vpop.permute.xlu1 %2378 }
 0x63b   : > { %vm4736_vm6 = vmpackc.low %vm3533_vm13, %vm3531_vm10  ;;  %4735 = vmatprep.subr.msk.bf16.mxu0 %vm4734_vm11, %v9861_v34 }
 0x63c   : > { %v2319_v43 = vpop.permute.xlu0 %2318  ;;  %4737 = vmatpush1.bf16.msk.msra.mxu0 %vm4736_vm6, %v9861_v34  ;;  %vm2486_vm6 = vcmp.lt.f32.partialorder %v8379_v4, %v8367_v59 }
 0x63d   : > { %3504 = vperm.xlu0 %5172, %v521_v62   ;;  %vm2482_vm9 = vcmp.lt.f32.partialorder %v2319_v43, %v8367_v59  ;;  %vm2481_vm2 = vcmp.lt.f32.partialorder %v2319_v43, %v8375_v23 }
 0x63e   : > { %v3445_v29 = vpop.permute.xlu1 %3444 }
 0x640   : > { %v2324_v36 = vpop.permute.xlu0 %2323 }
 0x641   : > { %vm2483_vm5 = vcmp.lt.f32.partialorder %v2324_v36, %v8375_v23  ;;  %vm2484_vm15 = vcmp.lt.f32.partialorder %v2324_v36, %v8367_v59  ;;  %3509 = vperm.xlu0 %5172, %v522_v41   ;;  %2388 = vperm.xlu1 %5173, %v474_v17  }
 0x642   : > { %vm4581_vm7 = vmpackc.low %vm2484_vm15, %vm2482_vm9  ;;  %vm2485_vm15 = vcmp.lt.f32.partialorder %v8379_v4, %v8375_v23 }
 0x643   : > { %vm4583_vm1 = vmpackc.low %vm2483_vm5, %vm2481_vm2  ;;  %4582 = vmatprep.subr.msk.bf16.mxu1 %vm4581_vm7, %v9861_v34 }
 0x644   : > { %v3390_v32 = vpop.permute.xlu0 %3389  ;;  %4584 = vmatpush1.bf16.msk.msra.mxu1 %vm4583_vm1, %v9861_v34  ;;  %vm3540_vm1 = vcmp.lt.f32.partialorder %v8390_v2, %v8335_v61 }
 0x645   : > { %vm3537_vm0 = vcmp.lt.f32.partialorder %v3390_v32, %v8342_v14  ;;  %vm3538_vm13 = vcmp.lt.f32.partialorder %v3390_v32, %v8335_v61  ;;  %2448 = vperm.xlu0 %5172, %v486_v10   ;;  %3479 = vperm.xlu1 %5173, %v516_v33  }
 0x646   : > { %vm4738_vm10 = vmpackc.low %vm3538_vm13, %vm3536_vm3  ;;  %vm3539_vm13 = vcmp.lt.f32.partialorder %v8390_v2, %v8342_v14 }
 0x647   : > { %vm4740_vm11 = vmpackc.low %vm3537_vm0, %vm3535_vm4  ;;  %4739 = vmatprep.subr.msk.bf16.mxu0 %vm4738_vm10, %v9861_v34 }
 0x648   : > { %v2334_v40 = vpop.permute.xlu0 %2333  ;;  %4741 = vmatpush1.bf16.msk.msra.mxu0 %vm4740_vm11, %v9861_v34  ;;  %vm2490_vm11 = vcmp.lt.f32.partialorder %v8398_v38, %v8367_v59 }
 0x649   : > { %vm2487_vm9 = vcmp.lt.f32.partialorder %v2334_v40, %v8375_v23  ;;  %vm2488_vm5 = vcmp.lt.f32.partialorder %v2334_v40, %v8367_v59  ;;  %2453 = vperm.xlu0 %5172, %v487_v7   ;;  %2428 = vperm.xlu1 %5173, %v482_v48   ;;  %v3280_v40 = vadd.f32 1.0, %v8332_v51 }
 0x64a   : > { %vm4585_vm2 = vmpackc.low %vm2488_vm5, %vm2486_vm6  ;;  %vm2489_vm5 = vcmp.lt.f32.partialorder %v8398_v38, %v8375_v23 }
 0x64b   : > { %vm4587_vm7 = vmpackc.low %vm2487_vm9, %vm2485_vm15  ;;  %4586 = vmatprep.subr.msk.bf16.mxu1 %vm4585_vm2, %v9861_v34 }
 0x64c   : > { %v3400_v13 = vpop.permute.xlu0 %3399  ;;  %4588 = vmatpush1.bf16.msk.msra.mxu1 %vm4587_vm7, %v9861_v34  ;;  %vm3544_vm7 = vcmp.lt.f32.partialorder %v8404_v44, %v8335_v61 }
 0x64d   : > { %vm3541_vm3 = vcmp.lt.f32.partialorder %v3400_v13, %v8342_v14  ;;  %vm3542_vm0 = vcmp.lt.f32.partialorder %v3400_v13, %v8335_v61  ;;  %2458 = vperm.xlu0 %5172, %v488_v18   ;;  %3494 = vperm.xlu1 %5173, %v519_v47  }
 0x64e   : > { %vm4742_vm4 = vmpackc.low %vm3542_vm0, %vm3540_vm1  ;;  %vm3543_vm0 = vcmp.lt.f32.partialorder %v8404_v44, %v8342_v14 }
 0x64f   : > { %vm4744_vm10 = vmpackc.low %vm3541_vm3, %vm3539_vm13  ;;  %4743 = vmatprep.subr.msk.bf16.mxu0 %vm4742_vm4, %v9861_v34 }
 0x650   : > { %v2344_v5 = vpop.permute.xlu0 %2343  ;;  %4745 = vmatpush1.bf16.msk.msra.mxu0 %vm4744_vm10, %v9861_v34  ;;  %vm2494_vm10 = vcmp.lt.f32.partialorder %v2349_v63, %v8367_v59 }
 0x651   : > { %vm2491_vm6 = vcmp.lt.f32.partialorder %v2344_v5, %v8375_v23  ;;  %vm2492_vm9 = vcmp.lt.f32.partialorder %v2344_v5, %v8367_v59  ;;  %2463 = vperm.xlu0 %5172, %v489_v45  }
 0x652   : > { %vm4589_vm15 = vmpackc.low %vm2492_vm9, %vm2490_vm11  ;;  %v8449_v0 = vpop.f32.mrb[64].mxu0  ;;  %vm2493_vm9 = vcmp.lt.f32.partialorder %v2349_v63, %v8375_v23 }
 0x653   : > { %vm4591_vm2 = vmpackc.low %vm2491_vm6, %vm2489_vm5  ;;  %v8451_v56 = vpop.f32.mrb[65].mxu0  ;;  %4590 = vmatprep.subr.msk.bf16.mxu1 %vm4589_vm15, %v9861_v34 }
 0x654   : > { %v3410_v55 = vpop.permute.xlu0 %3409  ;;  %v2269_v28 = vpop.f32.mrb[66].mxu0  ;;  %4592 = vmatpush1.bf16.msk.msra.mxu1 %vm4591_vm2, %v9861_v34  ;;  %vm3548_vm2 = vcmp.lt.f32.partialorder %v3415_v39, %v8335_v61 }
 0x655   : > { %vm3545_vm1 = vcmp.lt.f32.partialorder %v3410_v55, %v8342_v14  ;;  %vm3546_vm3 = vcmp.lt.f32.partialorder %v3410_v55, %v8335_v61  ;;  %v2270_v49 = vpop.f32.mrb[67].mxu0 }
 0x656   : > { %vm4746_vm13 = vmpackc.low %vm3546_vm3, %vm3544_vm7  ;;  %vm3547_vm3 = vcmp.lt.f32.partialorder %v3415_v39, %v8342_v14 }
 0x657   : > { %vm4748_vm4 = vmpackc.low %vm3545_vm1, %vm3543_vm0  ;;  %4747 = vmatprep.subr.msk.bf16.mxu0 %vm4746_vm13, %v9861_v34 }
 0x658   : > { %v2354_v60 = vpop.permute.xlu0 %2353  ;;  %4749 = vmatpush1.bf16.msk.msra.mxu0 %vm4748_vm4, %v9861_v34  ;;  %vm2498_vm4 = vcmp.lt.f32.partialorder %v2359_v22, %v8367_v59 }
 0x659   : > { %vm2495_vm11 = vcmp.lt.f32.partialorder %v2354_v60, %v8375_v23  ;;  %vm2496_vm6 = vcmp.lt.f32.partialorder %v2354_v60, %v8367_v59 }
 0x65a   : > { %vm4593_vm5 = vmpackc.low %vm2496_vm6, %vm2494_vm10  ;;  %vm2497_vm6 = vcmp.lt.f32.partialorder %v2359_v22, %v8375_v23 }
 0x65b   : > { %vm4595_vm15 = vmpackc.low %vm2495_vm11, %vm2493_vm9  ;;  %4594 = vmatprep.subr.msk.bf16.mxu1 %vm4593_vm5, %v9861_v34 }
 0x65c   : > { %v3420_v11 = vpop.permute.xlu0 %3419  ;;  %4596 = vmatpush1.bf16.msk.msra.mxu1 %vm4595_vm15, %v9861_v34  ;;  %vm3552_vm15 = vcmp.lt.f32.partialorder %v3425_v1, %v8335_v61 }
 0x65d   : > { %vm3549_vm7 = vcmp.lt.f32.partialorder %v3420_v11, %v8342_v14  ;;  %vm3550_vm1 = vcmp.lt.f32.partialorder %v3420_v11, %v8335_v61 }
 0x65e   : > { %vm4750_vm0 = vmpackc.low %vm3550_vm1, %vm3548_vm2  ;;  %vm3551_vm1 = vcmp.lt.f32.partialorder %v3425_v1, %v8342_v14 }
 0x65f   : > { %vm4752_vm13 = vmpackc.low %vm3549_vm7, %vm3547_vm3  ;;  %4751 = vmatprep.subr.msk.bf16.mxu0 %vm4750_vm0, %v9861_v34 }
 0x660   : > { %v2364_v31 = vpop.permute.xlu0 %2363  ;;  %4753 = vmatpush1.bf16.msk.msra.mxu0 %vm4752_vm13, %v9861_v34  ;;  %vm2502_vm13 = vcmp.lt.f32.partialorder %v2369_v16, %v8367_v59 }
 0x661   : > { %vm2499_vm10 = vcmp.lt.f32.partialorder %v2364_v31, %v8375_v23  ;;  %vm2500_vm11 = vcmp.lt.f32.partialorder %v2364_v31, %v8367_v59 }
 0x662   : > { %vm4597_vm9 = vmpackc.low %vm2500_vm11, %vm2498_vm4  ;;  %vm2501_vm11 = vcmp.lt.f32.partialorder %v2369_v16, %v8375_v23 }
 0x663   : > { %vm4599_vm5 = vmpackc.low %vm2499_vm10, %vm2497_vm6  ;;  %4598 = vmatprep.subr.msk.bf16.mxu1 %vm4597_vm9, %v9861_v34 }
 0x664   : > { %v3430_v8 = vpop.permute.xlu0 %3429  ;;  %4600 = vmatpush1.bf16.msk.msra.mxu1 %vm4599_vm5, %v9861_v34  ;;  %vm3556_vm5 = vcmp.lt.f32.partialorder %v3435_v26, %v8335_v61 }
 0x665   : > { %vm3553_vm2 = vcmp.lt.f32.partialorder %v3430_v8, %v8342_v14  ;;  %vm3554_vm7 = vcmp.lt.f32.partialorder %v3430_v8, %v8335_v61 }
 0x666   : > { %vm4754_vm3 = vmpackc.low %vm3554_vm7, %vm3552_vm15  ;;  %vm3555_vm7 = vcmp.lt.f32.partialorder %v3435_v26, %v8342_v14 }
 0x667   : > { %vm4756_vm0 = vmpackc.low %vm3553_vm2, %vm3551_vm1  ;;  %4755 = vmatprep.subr.msk.bf16.mxu0 %vm4754_vm3, %v9861_v34 }
 0x668   : > { %v2374_v21 = vpop.permute.xlu0 %2373  ;;  %4757 = vmatpush1.bf16.msk.msra.mxu0 %vm4756_vm0, %v9861_v34  ;;  %vm2506_vm0 = vcmp.lt.f32.partialorder %v2379_v20, %v8367_v59 }
 0x669   : > { %vm2503_vm4 = vcmp.lt.f32.partialorder %v2374_v21, %v8375_v23  ;;  %vm2504_vm10 = vcmp.lt.f32.partialorder %v2374_v21, %v8367_v59  ;;  %v5227_v21 = vld [vmem:[%s8943_s7 + $0x14] ss:$8 sps:$4 sm:$0xff]  }
 0x66a   : > { %vm4601_vm6 = vmpackc.low %vm2504_vm10, %vm2502_vm13  ;;  %vm2505_vm10 = vcmp.lt.f32.partialorder %v2379_v20, %v8375_v23 }
 0x66b   : > { %vm4603_vm9 = vmpackc.low %vm2503_vm4, %vm2501_vm11  ;;  %4602 = vmatprep.subr.msk.bf16.mxu1 %vm4601_vm6, %v9861_v34 }
 0x66c   : > { %v3440_v4 = vpop.permute.xlu0 %3439  ;;  %4604 = vmatpush1.bf16.msk.msra.mxu1 %vm4603_vm9, %v9861_v34  ;;  %vm3560_vm9 = vcmp.lt.f32.partialorder %v3445_v29, %v8335_v61 }
 0x66d   : > { %vm3557_vm15 = vcmp.lt.f32.partialorder %v3440_v4, %v8342_v14  ;;  %vm3558_vm2 = vcmp.lt.f32.partialorder %v3440_v4, %v8335_v61 }
 0x66e   : > { %vm4758_vm1 = vmpackc.low %vm3558_vm2, %vm3556_vm5  ;;  %vm3559_vm2 = vcmp.lt.f32.partialorder %v3445_v29, %v8342_v14 }
 0x66f   : > { %vm4760_vm3 = vmpackc.low %vm3557_vm15, %vm3555_vm7  ;;  %4759 = vmatprep.subr.msk.bf16.mxu0 %vm4758_vm1, %v9861_v34 }
 0x670   : > { %v2384_v58 = vpop.permute.xlu0 %2383  ;;  %4761 = vmatpush1.bf16.msk.msra.mxu0 %vm4760_vm3, %v9861_v34 }
 0x671   : > { %vm2507_vm13 = vcmp.lt.f32.partialorder %v2384_v58, %v8375_v23  ;;  %vm2508_vm4 = vcmp.lt.f32.partialorder %v2384_v58, %v8367_v59 }
 0x672   : > { %vm4605_vm11 = vmpackc.low %vm2508_vm4, %vm2506_vm0 }
 0x673   : > { %vm4607_vm6 = vmpackc.low %vm2507_vm13, %vm2505_vm10  ;;  %4606 = vmatprep.subr.msk.bf16.mxu1 %vm4605_vm11, %v9861_v34 }
 0x674   : > { %v3450_v46 = vpop.permute.xlu0 %3449  ;;  %4608 = vmatpush1.bf16.msk.msra.mxu1 %vm4607_vm6, %v9861_v34 }
 0x675   : > { %vm3561_vm5 = vcmp.lt.f32.partialorder %v3450_v46, %v8342_v14  ;;  %vm3562_vm15 = vcmp.lt.f32.partialorder %v3450_v46, %v8335_v61  ;;  %v484_v46 = vld [vmem:[%s8212_s28 + $0xd0] sm:$0xff]  ;;  %s5398_s28 = scalar_lea.vmem %s8896_s24, 32 }
 0x676   : > { %vm4762_vm7 = vmpackc.low %vm3562_vm15, %vm3560_vm9  ;;  %p5399_p11 = scmp.ne.s32.totalorder %s8896_s24, %s5398_s28  ;;  %p5406_p1 = scmp.lt.s32.totalorder %s5404_s14, %s5398_s28 }
 0x677   : > { %vm4764_vm1 = vmpackc.low %vm3561_vm5, %vm3559_vm2  ;;  %4763 = vmatprep.subr.msk.bf16.mxu0 %vm4762_vm7, %v9861_v34 }
 0x678   : > { %v2394_v2 = vpop.permute.xlu0 %2393  ;;  %4765 = vmatpush1.bf16.msk.msra.mxu0 %vm4764_vm1, %v9861_v34  ;;  %p5400_p12 = pnand %p5399_p11, %p5559_p5  ;;  %p5407_p2 = por %p5406_p1, %p5405_p0 }
 0x67a   : > { %p5401_p13 = pneg %p5400_p12 }
 0x67c   : > { %v3455_v37 = vpop.permute.xlu0 %3454  ;;  %p5408_p3 = pnand %p5407_p2, %p5401_p13 }
 0x67d   : > { %vm3564_vm3 = vcmp.lt.f32.partialorder %v3455_v37, %v8335_v61  ;;  %vm3563_vm4 = vcmp.lt.f32.partialorder %v3455_v37, %v8342_v14 }
 0x680   : > { %v3460_v19 = vpop.permute.xlu0 %3459 }
 0x681   : > { %vm3565_vm0 = vcmp.lt.f32.partialorder %v3460_v19, %v8342_v14  ;;  %vm3566_vm13 = vcmp.lt.f32.partialorder %v3460_v19, %v8335_v61 }
 0x682   : > { %vm4766_vm10 = vmpackc.low %vm3566_vm13, %vm3564_vm3 }
 0x683   : > { %vm4768_vm11 = vmpackc.low %vm3565_vm0, %vm3563_vm4  ;;  %4767 = vmatprep.subr.msk.bf16.mxu0 %vm4766_vm10, %v9861_v34  ;;  %vm2512_vm10 = vcmp.lt.f32.partialorder %v2394_v2, %v8367_v59 }
 0x684   : > { %v2399_v62 = vpop.permute.xlu0 %2398  ;;  %4769 = vmatpush1.bf16.msk.msra.mxu0 %vm4768_vm11, %v9861_v34 }
 0x685   : > { %vm2514_vm0 = vcmp.lt.f32.partialorder %v2399_v62, %v8367_v59 }
 0x688   : > { %v2404_v38 = vpop.permute.xlu0 %2403 }
 0x689   : > { %vm2516_vm3 = vcmp.lt.f32.partialorder %v2404_v38, %v8367_v59  ;;  %vm2515_vm11 = vcmp.lt.f32.partialorder %v2404_v38, %v8375_v23 }
 0x68c   : > { %v3465_v43 = vpop.permute.xlu0 %3464 }
 0x68d   : > { %vm3568_vm6 = vcmp.lt.f32.partialorder %v3465_v43, %v8335_v61  ;;  %vm3567_vm15 = vcmp.lt.f32.partialorder %v3465_v43, %v8342_v14 }
 0x690   : > { %v3470_v41 = vpop.permute.xlu0 %3469 }
 0x691   : > { %vm3569_vm9 = vcmp.lt.f32.partialorder %v3470_v41, %v8342_v14  ;;  %vm3570_vm5 = vcmp.lt.f32.partialorder %v3470_v41, %v8335_v61 }
 0x692   : > { %vm4770_vm2 = vmpackc.low %vm3570_vm5, %vm3568_vm6 }
 0x693   : > { %vm4772_vm7 = vmpackc.low %vm3569_vm9, %vm3567_vm15  ;;  %4771 = vmatprep.subr.msk.bf16.mxu0 %vm4770_vm2, %v9861_v34  ;;  %vm2511_vm9 = vcmp.lt.f32.partialorder %v2394_v2, %v8375_v23  ;;  %vm2513_vm15 = vcmp.lt.f32.partialorder %v2399_v62, %v8375_v23  ;;  %v2057_v2 = vld [vmem:[%s8944_s8] sm:$0x3] }
 0x694   : > { %v8522_v17 = vpop.permute.xlu0 %2408  ;;  %4773 = vmatpush1.bf16.msk.msra.mxu0 %vm4772_vm7, %v9861_v34  ;;  %vm8553_vm6 = vmpackc.low %vm2516_vm3, %vm2514_vm0 }
 0x695   : > { %vm8567_vm3 = vmpackc.low %vm2515_vm11, %vm2513_vm15 }
 0x698   : > { %v2414_v36 = vpop.permute.xlu0 %2413 }
 0x69c   : > { %v3475_v44 = vpop.permute.xlu0 %3474 }
 0x69d   : > { %vm3572_vm2 = vcmp.lt.f32.partialorder %v3475_v44, %v8335_v61 }
 0x6a0   : > { %v8525_v10 = vpop.permute.xlu0 %2418 }
 0x6a4   : > { %v8527_v33 = vpop.permute.xlu0 %2423 }
 0x6a8   : > { %v8529_v32 = vpop.permute.xlu0 %3484 }
 0x6a9   : > { %vm3576_vm15 = vcmp.lt.f32.partialorder %v8529_v32, %v8335_v61 }
 0x6ac   : > { %v8531_v7 = vpop.permute.xlu0 %3489 }
 0x6ad   : > { %vm3578_vm7 = vcmp.lt.f32.partialorder %v8531_v7, %v8335_v61 }
 0x6b0   : > { %v8533_v48 = vpop.permute.xlu0 %2433 }
 0x6b4   : > { %v8535_v63 = vpop.permute.xlu0 %3499 }
 0x6b8   : > { %v8539_v47 = vpop.permute.xlu0 %2443 }
 0x6bd   : > { %v3277_v18 = vpop.xlane.xlu1 %3276 }
 0x6be   : > { %vm3278_vm1 = vcmp.ge.f32.partialorder %v3277_v18, %v8047_v25 }
 0x6bf   : > { %v8543_v13 = vsel %vm3278_vm1, %v8332_v51, %v8319_v6  ;;  %v3281_v39 = vsel %vm3278_vm1, %v8322_v54, %v3280_v40  ;;  %v8564_v51 = vpop.permute.xlu0 %3504 }
 0x6c0   : > { %v3282_v45 = vadd.f32 %v3281_v39, %v8543_v13 }
 0x6c1   : > { %v2389_v5 = vpop.permute.xlu1 %2388 }
 0x6c2   : > { %v3283_v22 = vmul.f32 0.5, %v3282_v45  ;;  %vm2509_vm13 = vcmp.lt.f32.partialorder %v2389_v5, %v8375_v23  ;;  %vm2510_vm4 = vcmp.lt.f32.partialorder %v2389_v5, %v8367_v59 }
 0x6c3   : > { %vm4609_vm5 = vmpackc.low %vm2512_vm10, %vm2510_vm4  ;;  %v3510_v31 = vpop.permute.xlu0 %3509 }
 0x6c4   : > { %v8558_v54 = vfloor.f32 %v3283_v22  ;;  %vm4611_vm1 = vmpackc.low %vm2511_vm9, %vm2509_vm13  ;;  %4610 = vmatprep.subr.msk.bf16.mxu1 %vm4609_vm5, %v9861_v34  ;;  %vm2520_vm13 = vcmp.lt.f32.partialorder %v2414_v36, %v8367_v59  ;;  %vm3571_vm9 = vcmp.lt.f32.partialorder %v3475_v44, %v8342_v14  ;;  %vm2519_vm5 = vcmp.lt.f32.partialorder %v2414_v36, %v8375_v23  ;;  %v9868_v36 = vld [vmem:[#allocation16_spill] sm:$0xff] }
 0x6c5   : > { %v3480_v55 = vpop.permute.xlu1 %3479  ;;  %4612 = vmatpush1.bf16.msk.msra.mxu1 %vm4611_vm1, %v9861_v34  ;;  %v534_v44 = vsel %vm533_vm12, %v9868_v36, 2147483647 }
 0x6c6   : > { %vm3285_vm0 = vcmp.le.f32.partialorder %v7788_v53, %v8558_v54  ;;  %vm3286_vm4 = vcmp.le.f32.partialorder %v7814_v42, %v8558_v54  ;;  %vm3573_vm10 = vcmp.lt.f32.partialorder %v3480_v55, %v8342_v14  ;;  %vm3574_vm8 = vcmp.lt.f32.partialorder %v3480_v55, %v8335_v61  ;;  %4614 = vmatprep.subr.msk.bf16.mxu1 %vm8553_vm6, %v9861_v34 }
 0x6c7   : > { %v4659_v49 = vsel %vm3285_vm0, 1.0, %v5466_v50  ;;  %v4660_v60 = vsel %vm3286_vm4, 1.0, %v5466_v50  ;;  %vm4774_vm11 = vmpackc.low %vm3574_vm8, %vm3572_vm2  ;;  %vm2518_vm0 = vcmp.lt.f32.partialorder %v8522_v17, %v8367_v59  ;;  %vm3577_vm4 = vcmp.lt.f32.partialorder %v8531_v7, %v8342_v14  ;;  %v2449_v39 = vpop.permute.xlu0 %2448 }
 0x6c8   : > { %v3293_v1 = vcombine.low %v4659_v49, %v4660_v60  ;;  %vm4776_vm1 = vmpackc.low %vm3573_vm10, %vm3571_vm9  ;;  %4775 = vmatprep.subr.msk.bf16.mxu0 %vm4774_vm11, %v9861_v34  ;;  %vm2517_vm6 = vcmp.lt.f32.partialorder %v8522_v17, %v8375_v23  ;;  %vm2524_vm10 = vcmp.lt.f32.partialorder %v8527_v33, %v8367_v59  ;;  %vm2523_vm9 = vcmp.lt.f32.partialorder %v8527_v33, %v8375_v23 }
 0x6c9   : > { %vm4778_vm8 = vmpackc.low %vm3578_vm7, %vm3576_vm15  ;;  %4777 = vmatpush1.bf16.msk.msra.mxu0 %vm4776_vm1, %v9861_v34  ;;  %v2429_v11 = vpop.permute.xlu1 %2428  ;;  %4616 = vmatpush1.bf16.msk.msra.mxu1 %vm8567_vm3, %v9861_v34  ;;  %vm2522_vm11 = vcmp.lt.f32.partialorder %v8525_v10, %v8367_v59  ;;  %vm3582_vm1 = vcmp.lt.f32.partialorder %v8535_v63, %v8335_v61 }
 0x6ca   : > { %vm4617_vm2 = vmpackc.low %vm2520_vm13, %vm2518_vm0  ;;  %4779 = vmatprep.subr.msk.bf16.mxu0 %vm4778_vm8, %v9861_v34  ;;  %v3300_v16 = vrot.slane %v3293_v1, %v7883_v57  ;;  %vm3575_vm13 = vcmp.lt.f32.partialorder %v8529_v32, %v8342_v14  ;;  %vm3586_vm8 = vcmp.lt.f32.partialorder %v3510_v31, %v8335_v61 }
 0x6cb   : > { %vm4619_vm7 = vmpackc.low %vm2519_vm5, %vm2517_vm6  ;;  %4618 = vmatprep.subr.msk.bf16.mxu1 %vm4617_vm2, %v9861_v34  ;;  %vm2521_vm5 = vcmp.lt.f32.partialorder %v8525_v10, %v8375_v23  ;;  %vm3581_vm2 = vcmp.lt.f32.partialorder %v8535_v63, %v8342_v14  ;;  %v552_v10 = vsel %vm533_vm12, %v9868_v36, 2147483648  ;;  %v2454_v45 = vpop.permute.xlu0 %2453  ;;  %v5242_v36 = vld [vmem:[%s8943_s7 + $0x64] ss:$8 sps:$4 sm:$0xff]  }
 0x6cc   : > { %vm4780_vm3 = vmpackc.low %vm3577_vm4, %vm3575_vm13  ;;  %v3307_v8 = vrot.slane %v3300_v16, %v7883_v57 }
 0x6cd   : > { %vm4621_vm15 = vmpackc.low %vm2524_vm10, %vm2522_vm11  ;;  %4781 = vmatpush1.bf16.msk.msra.mxu0 %vm4780_vm3, %v9861_v34  ;;  %v3495_v26 = vpop.permute.xlu1 %3494  ;;  %4620 = vmatpush1.bf16.msk.msra.mxu1 %vm4619_vm7, %v9861_v34  ;;  %vm2526_vm10 = vcmp.lt.f32.partialorder %v2429_v11, %v8367_v59  ;;  %vm2528_vm7 = vcmp.lt.f32.partialorder %v8533_v48, %v8367_v59  ;;  %vm3585_vm3 = vcmp.lt.f32.partialorder %v3510_v31, %v8342_v14 }
 0x6ce   : > { %vm8628_vm0 = vmpackc.low %vm2523_vm9, %vm2521_vm5  ;;  %vm3579_vm4 = vcmp.lt.f32.partialorder %v3495_v26, %v8342_v14  ;;  %vm3580_vm6 = vcmp.lt.f32.partialorder %v3495_v26, %v8335_v61  ;;  %v3309_v20 = vmul.f32 %v8036_v52, %v3307_v8  ;;  %4622 = vmatprep.subr.msk.bf16.mxu1 %vm4621_vm15, %v9861_v34  ;;  %vm3584_vm9 = vcmp.lt.f32.partialorder %v8564_v51, %v8335_v61  ;;  %v5224_v26 = vld [vmem:[%s8943_s7 + $0x4] ss:$8 sps:$4 sm:$0xff]  }
 0x6cf   : > { %vm4782_vm13 = vmpackc.low %vm3582_vm1, %vm3580_vm6  ;;  %vm2525_vm15 = vcmp.lt.f32.partialorder %v2429_v11, %v8375_v23  ;;  %v2459_v5 = vpop.permute.xlu0 %2458 }
 0x6d0   : > { %vm4784_vm11 = vmpackc.low %vm3581_vm2, %vm3579_vm4  ;;  %4783 = vmatprep.subr.msk.bf16.mxu0 %vm4782_vm13, %v9861_v34  ;;  %v3314_v4 = vrot.slane %v3309_v20, %v9859_v15  ;;  %v3318_v58 = vrot.slane %v3309_v20, %v9860_v24  ;;  %vm3583_vm4 = vcmp.lt.f32.partialorder %v8564_v51, %v8342_v14  ;;  %v4510_v14 = vadd.f32 -0.5, %v2057_v2  ;;  %v5228_v2 = vld [vmem:[%s8943_s7 + $0x20] ss:$8 sps:$4 sm:$0xff]  }
 0x6d1   : > { %vm4786_vm5 = vmpackc.low %vm3586_vm8, %vm3584_vm9  ;;  %4785 = vmatpush1.bf16.msk.msra.mxu0 %vm4784_vm11, %v9861_v34  ;;  %4624 = vmatpush1.bf16.msk.msra.mxu1 %vm8628_vm0, %v9861_v34  ;;  %vm2527_vm8 = vcmp.lt.f32.partialorder %v8533_v48, %v8375_v23  ;;  %v9870_v51 = vmov 0  }
 0x6d2   : > { %vm4625_vm1 = vmpackc.low %vm2528_vm7, %vm2526_vm10  ;;  %4787 = vmatprep.subr.msk.bf16.mxu0 %vm4786_vm5, %v9861_v34  ;;  %v3321_v52 = vsel %vm533_vm12, %v3314_v4, 0.0  ;;  %v3322_v29 = vsel %vm533_vm12, %v3318_v58, 0.0  ;;  %v2277_v37 = vrot.slane %v4510_v14, %v9859_v15  ;;  %v2281_v19 = vrot.slane %v4510_v14, %v9860_v24  ;;  %v5225_v58 = vld [vmem:[%s8943_s7 + $0x10] ss:$8 sps:$4 sm:$0xff]   ;;  %v5233_v14 = vld [vmem:[%s8943_s7 + $0x34] ss:$8 sps:$4 sm:$0xff]  }
 0x6d3   : > { %4626 = vmatprep.subr.msk.bf16.mxu1 %vm4625_vm1, %v9861_v34  ;;  %v3323_v61 = vadd.f32 %v3322_v29, %v3321_v52  ;;  %vm4788_vm6 = vmpackc.low %vm3585_vm3, %vm3583_vm4  ;;  %vm2532_vm5 = vcmp.lt.f32.partialorder %v8539_v47, %v8367_v59  ;;  %v2464_v60 = vpop.permute.xlu0 %2463  ;;  %v5230_v52 = vld [vmem:[%s8943_s7 + $0x24] ss:$8 sps:$4 sm:$0xff]  }
 0x6d4   : > { %vm4627_vm2 = vmpackc.low %vm2527_vm8, %vm2525_vm15  ;;  %vm2284_vm0 = vcmp.ge.f32.partialorder %v8449_v0, %v2277_v37  ;;  %vm2285_vm10 = vcmp.ge.f32.partialorder %v8451_v56, %v2281_v19  ;;  %v9869_v0 = vld [vmem:[#allocation17_spill] sm:$0xff]  ;;  %vm2536_vm15 = vcmp.lt.f32.partialorder %v2454_v45, %v8367_v59  ;;  %vm2531_vm8 = vcmp.lt.f32.partialorder %v8539_v47, %v8375_v23 }
 0x6d5   : > { %3324 = vadd.xlane.f32.xlu1 %v3323_v61  ;;  %4789 = vmatpush1.bf16.msk.msra.mxu0 %vm4788_vm6, %v9861_v34  ;;  %v8675_v62 = vsel %vm2284_vm0, 1.0, %v5466_v50  ;;  %v8678_v38 = vsel %vm2285_vm10, 1.0, %v5466_v50  ;;  %v535_v56 = vsel %vm533_vm12, %v9869_v0, 2147483647  ;;  %v553_v33 = vsel %vm533_vm12, %v9869_v0, 2147483648 }
 0x6d6   : > { %4628 = vmatpush1.bf16.msk.msra.mxu1 %vm4627_vm2, %v9861_v34  ;;  %v2290_v43 = vsel %vm533_vm12, %v8675_v62, 0.0  ;;  %v2291_v41 = vsel %vm533_vm12, %v8678_v38, 0.0  ;;  %vm536_vm13 = vcmp.lt.s32.totalorder %v534_v44, %v535_v56  ;;  %vm554_vm9 = vcmp.gt.s32.totalorder %v552_v10, %v553_v33  ;;  %v5245_v0 = vld [vmem:[%s8943_s7 + $0x74] ss:$8 sps:$4 sm:$0xff]  }
 0x6d7   : > { %v2292_v17 = vadd.f32 %v2291_v41, %v2290_v43  ;;  %v8692_v32 = vsel %vm536_vm13, %v534_v44, %v535_v56  ;;  %v8695_v48 = vsel %vm554_vm9, %v552_v10, %v553_v33  ;;  %vm2534_vm2 = vcmp.lt.f32.partialorder %v2449_v39, %v8367_v59  ;;  %v5236_v43 = vld [vmem:[%s8943_s7 + $0x44] ss:$8 sps:$4 sm:$0xff]   ;;  %v5239_v41 = vld [vmem:[%s8943_s7 + $0x54] ss:$8 sps:$4 sm:$0xff]   ;;  %v5240_v44 = vld [vmem:[%s8943_s7 + $0x60] ss:$8 sps:$4 sm:$0xff]  }
 0x6d8   : > { %v539_v7 = vshra.s32 %v8692_v32, 16  ;;  %v557_v63 = vshra.s32 %v8695_v48, 16  ;;  %vm2535_vm0 = vcmp.lt.f32.partialorder %v2454_v45, %v8375_v23  ;;  %vm4633_vm13 = vmpackc.low %vm2536_vm15, %vm2534_vm2  ;;  %vm2540_vm9 = vcmp.lt.f32.partialorder %v2464_v60, %v8367_v59  ;;  %v5243_v56 = vld [vmem:[%s8943_s7 + $0x70] ss:$8 sps:$4 sm:$0xff]   ;;  %v5248_v10 = vld [vmem:[%s8943_s7 + $0x84] ss:$8 sps:$4 sm:$0xff]  }
 0x6d9   : > { %vm2537_vm2 = vcmp.lt.f32.partialorder %v2459_v5, %v8375_v23  ;;  %v556_v4 = vand.u32 65535, %v8695_v48  ;;  %v5246_v33 = vld [vmem:[%s8943_s7 + $0x80] ss:$8 sps:$4 sm:$0xff]   ;;  %v5254_v48 = vld [vmem:[%s8943_s7 + $0xa4] ss:$8 sps:$4 sm:$0xff]  }
 0x6da   : > { %v8698_v40 = vcvt.s32.f32 %v539_v7  ;;  %v8701_v18 = vcvt.s32.f32 %v557_v63  ;;  %v5249_v7 = vld [vmem:[%s8943_s7 + $0x90] ss:$8 sps:$4 sm:$0xff]   ;;  %v5252_v63 = vld [vmem:[%s8943_s7 + $0xa0] ss:$8 sps:$4 sm:$0xff]  }
 0x6db   : > { %v5258_v45 = vld [vmem:[%s8943_s7 + $0xc0] ss:$8 sps:$4 sm:$0xff]  }
 0x6e6   : > { %2438 = vperm.xlu1 %5173, %v484_v46   ;;  %v558_v46 = vcvt.s32.f32 %v556_v4 }
 0x70a   : > { %2293 = vadd.xlane.f32.xlu1 %v2292_v17  ;;  %v5237_v17 = vld [vmem:[%s8943_s7 + $0x50] ss:$8 sps:$4 sm:$0xff]  }
 0x70e   : > { %542 = vmin.xlane.f32.xlu1 %v8698_v40 }
 0x712   : > { %560 = vmax.xlane.f32.xlu1 %v8701_v18 }
 0x762   : > { %v3325_v22 = vpop.xlane.xlu1 %3324 }
 0x763   : > { %vm3326_vm11 = vcmp.ge.f32.partialorder %v3325_v22, %v8047_v25  ;;  %v5261_v22 = vld [vmem:[%s8943_s7 + $0xd0] ss:$8 sps:$4 sm:$0xff]  }
 0x764   : > { %v3327_v6 = vsel %vm3326_vm11, %v8558_v54, %v8543_v13  ;;  %vm2533_vm11 = vcmp.lt.f32.partialorder %v2449_v39, %v8375_v23  ;;  %v5260_v39 = vld [vmem:[%s8943_s7 + $0xc4] ss:$8 sps:$4 sm:$0xff]  }
 0x765   : > { %vm3328_vm7 = vcmp.le.f32.partialorder %v7788_v53, %v3327_v6  ;;  %vm3329_vm3 = vcmp.le.f32.partialorder %v7814_v42, %v3327_v6  ;;  %v5266_v6 = vld [vmem:[%s8943_s7 + $0xe4] ss:$8 sps:$4 sm:$0xff]  }
 0x766   : > { %v3330_v55 = vsel %vm3328_vm7, 1, %v9870_v51  ;;  %v3331_v28 = vsel %vm3329_vm3, 1, %v9870_v51  ;;  %v2439_v49 = vpop.permute.xlu1 %2438  ;;  %vm4635_vm7 = vmpackc.low %vm2535_vm0, %vm2533_vm11  ;;  %vm2538_vm3 = vcmp.lt.f32.partialorder %v2459_v5, %v8367_v59  ;;  %v5263_v5 = vld [vmem:[%s8943_s7 + $0xd4] ss:$8 sps:$4 sm:$0xff]   ;;  %v5264_v51 = vld [vmem:[%s8943_s7 + $0xe0] ss:$8 sps:$4 sm:$0xff]  }
 0x767   : > { %v3332_v1 = vcombine.low %v3330_v55, %v3331_v28  ;;  %vm2529_vm1 = vcmp.lt.f32.partialorder %v2439_v49, %v8375_v23  ;;  %vm2530_vm4 = vcmp.lt.f32.partialorder %v2439_v49, %v8367_v59  ;;  %v5269_v55 = vld [vmem:[%s8943_s7 + $0xf4] ss:$8 sps:$4 sm:$0xff]   ;;  %v5267_v28 = vld [vmem:[%s8943_s7 + $0xf0] ss:$8 sps:$4 sm:$0xff]  }
 0x768   : > { %vm4629_vm6 = vmpackc.low %vm2532_vm5, %vm2530_vm4 }
 0x769   : > { %v3339_v53 = vrot.slane %v3332_v1, %v7883_v57  ;;  %vm4631_vm10 = vmpackc.low %vm2531_vm8, %vm2529_vm1  ;;  %4630 = vmatprep.subr.msk.bf16.mxu1 %vm4629_vm6, %v9861_v34  ;;  %vm2539_vm1 = vcmp.lt.f32.partialorder %v2464_v60, %v8375_v23  ;;  %vm9871_vm8 = vcmp.lt.s32.totalorder %v9858_v12, %v8022_v27 }
 0x76a   : > { %4632 = vmatpush1.bf16.msk.msra.mxu1 %vm4631_vm10, %v9861_v34  ;;  %vm4637_vm5 = vmpackc.low %vm2540_vm9, %vm2538_vm3  ;;  %vm3858_vm3 = vcmp.eq.s32.totalorder %v9798_v35, 0 }
 0x76b   : > { %v3346_v42 = vrot.slane %v3339_v53, %v7883_v57  ;;  %4634 = vmatprep.subr.msk.bf16.mxu1 %vm4633_vm13, %v9861_v34  ;;  %vm4639_vm0 = vmpackc.low %vm2539_vm1, %vm2537_vm2 }
 0x76d   : > { %vm3347_vm4 = vcmp.ne.s32.totalorder %v3346_v42, 0 }
 0x76e   : > { %4636 = vmatpush1.bf16.msk.msra.mxu1 %vm4635_vm7, %v9861_v34  ;;  %vm3348_vm15 = vmand %vm2923_vm14, %vm3347_vm4 }
 0x76f   : > { %4638 = vmatprep.subr.msk.bf16.mxu1 %vm4637_vm5, %v9861_v34  ;;  %vm3349_vm6 = vmor %vm9871_vm8, %vm3348_vm15 }
 0x770   : > { %v8739_v25 = vsel %vm3349_vm6, 1.0, %v5466_v50 }
 0x771   : > { %v3755_v59 = vrot.slane %v8739_v25, %v9860_v24  ;;  %v3751_v47 = vrot.slane %v8739_v25, %v9859_v15 }
 0x772   : > { %4640 = vmatpush1.bf16.msk.msra.mxu1 %vm4639_vm0, %v9861_v34 }
 0x773   : > { %v3759_v13 = vpack.c.bf16 %v3755_v59, %v3755_v59  ;;  %v3758_v54 = vpack.c.bf16 %v3751_v47, %v3751_v47  ;;  %4042 = vmatprep.subr.bf16.mxu1 %v5224_v26 }
 0x775   : > { %3792 = vmatprep.mubr.bf16.mxu0 %v3759_v13 }
 0x776   : > { %3793 = vmatmul.mubr.bf16.vlgmr.msra.gmra.mrb[68].mxu0 %v3758_v54 }
 0x797   : > { %v2294_v27 = vpop.xlane.xlu1 %2293 }
 0x798   : > { %vm2295_vm14 = vcmp.lt.f32.partialorder %v2294_v27, 0.5 }
 0x799   : > { %v8748_v12 = vsel %vm2295_vm14, %v8262_v30, %v8675_v62  ;;  %v8752_v23 = vsel %vm2295_vm14, %v8265_v9, %v8678_v38  ;;  %v538_v30 = vand.u32 65535, %v8692_v32  ;;  %v5222_v9 = vld [vmem:[%s8943_s7] ss:$8 sps:$4 sm:$0xff]   ;;  %v5231_v62 = vld [vmem:[%s8943_s7 + $0x30] ss:$8 sps:$4 sm:$0xff]  }
 0x79a   : > { %v2701_v11 = vpack.c.bf16 %v8748_v12, %v8748_v12  ;;  %v2702_v34 = vpack.c.bf16 %v8752_v23, %v8752_v23  ;;  %v2300_v16 = vsel %vm533_vm12, %v8748_v12, 0.0  ;;  %v2301_v31 = vsel %vm533_vm12, %v8752_v23, 0.0  ;;  %v5234_v38 = vld [vmem:[%s8943_s7 + $0x40] ss:$8 sps:$4 sm:$0xff]   ;;  %v5251_v32 = vld [vmem:[%s8943_s7 + $0x94] ss:$8 sps:$4 sm:$0xff]  }
 0x79b   : > { %v2302_v8 = vadd.f32 %v2301_v31, %v2300_v16  ;;  %v540_v20 = vcvt.s32.f32 %v538_v30  ;;  %v8779_v29 = vpop.xlane.xlu1 %542 }
 0x79c   : > { %2735 = vmatprep.mubr.bf16.mxu1 %v2702_v34  ;;  %vm544_vm12 = vcmp.eq.f32.partialorder %v8698_v40, %v8779_v29  ;;  %v5257_v40 = vld [vmem:[%s8943_s7 + $0xb4] ss:$8 sps:$4 sm:$0xff]  }
 0x79d   : > { %2736 = vmatmul.mubr.bf16.vlgmr.msra.gmra.mrb[64].mxu1 %v2701_v11  ;;  %2303 = vadd.xlane.f32.xlu0 %v2302_v8  ;;  %v545_v61 = vsel %vm544_vm12, %v540_v20, inf  ;;  %vm4134_vm12 = vcmp.lt.s32.totalorder %v9782_v3, 256 }
 0x79e   : > { %4043 = vmatpush1.bf16.msra.mxu1 %v5222_v9  ;;  %546 = vmin.xlane.f32.xlu1 %v545_v61 }
 0x79f   : > { %4044 = vmatprep.subr.bf16.mxu1 %v5227_v21  ;;  %v8789_v37 = vpop.xlane.xlu1 %560 }
 0x7a0   : > { %vm562_vm10 = vcmp.eq.f32.partialorder %v8701_v18, %v8789_v37  ;;  %v5255_v18 = vld [vmem:[%s8943_s7 + $0xb0] ss:$8 sps:$4 sm:$0xff]  }
 0x7a1   : > { %v563_v19 = vsel %vm562_vm10, %v558_v46, -inf }
 0x7a2   : > { %4045 = vmatpush1.bf16.msra.mxu1 %v5225_v58  ;;  %564 = vmax.xlane.f32.xlu1 %v563_v19  ;;  %v549_v19 = vcvt.f32.s32 %v8779_v29 }
 0x7a3   : > { %4046 = vmatprep.subr.bf16.mxu1 %v5230_v52 }
 0x7a6   : > { %4047 = vmatpush1.bf16.msra.mxu1 %v5228_v2 }
 0x7a7   : > { %4048 = vmatprep.subr.bf16.mxu1 %v5233_v14 }
 0x7aa   : > { %4049 = vmatpush1.bf16.msra.mxu1 %v5231_v62  ;;  %v550_v62 = vshll.u32 %v549_v19, 16 }
 0x7ab   : > { %4050 = vmatprep.subr.bf16.mxu1 %v5236_v43 }
 0x7ae   : > { %4051 = vmatpush1.bf16.msra.mxu1 %v5234_v38 }
 0x7af   : > { %4052 = vmatprep.subr.bf16.mxu1 %v5239_v41 }
 0x7b2   : > { %4053 = vmatpush1.bf16.msra.mxu1 %v5237_v17 }
 0x7b3   : > { %4054 = vmatprep.subr.bf16.mxu1 %v5242_v36 }
 0x7b6   : > { %4055 = vmatpush1.bf16.msra.mxu1 %v5240_v44 }
 0x7b7   : > { %4056 = vmatprep.subr.bf16.mxu1 %v5245_v0 }
 0x7ba   : > { %4057 = vmatpush1.bf16.msra.mxu1 %v5243_v56 }
 0x7bb   : > { %4058 = vmatprep.subr.bf16.mxu1 %v5248_v10 }
 0x7be   : > { %4059 = vmatpush1.bf16.msra.mxu1 %v5246_v33 }
 0x7bf   : > { %4060 = vmatprep.subr.bf16.mxu1 %v5251_v32 }
 0x7c2   : > { %4061 = vmatpush1.bf16.msra.mxu1 %v5249_v7 }
 0x7c3   : > { %4062 = vmatprep.subr.bf16.mxu1 %v5254_v48 }
 0x7c6   : > { %4063 = vmatpush1.bf16.msra.mxu1 %v5252_v63 }
 0x7c7   : > { %4064 = vmatprep.subr.bf16.mxu1 %v5257_v40 }
 0x7ca   : > { %4065 = vmatpush1.bf16.msra.mxu1 %v5255_v18 }
 0x7cb   : > { %4066 = vmatprep.subr.bf16.mxu1 %v5260_v39 }
 0x7ce   : > { %4067 = vmatpush1.bf16.msra.mxu1 %v5258_v45 }
 0x7cf   : > { %4068 = vmatprep.subr.bf16.mxu1 %v5263_v5 }
 0x7d2   : > { %4069 = vmatpush1.bf16.msra.mxu1 %v5261_v22  ;;  %v5469_v22 = vmov 4294967041  }
 0x7d3   : > { %4070 = vmatprep.subr.bf16.mxu1 %v5266_v6 }
 0x7d6   : > { %4071 = vmatpush1.bf16.msra.mxu1 %v5264_v51 }
 0x7d7   : > { %4072 = vmatprep.subr.bf16.mxu1 %v5269_v55 }
 0x7da   : > { %4073 = vmatpush1.bf16.msra.mxu1 %v5267_v28 }
 0x82a   : > { %v2304_v54 = vpop.xlane.xlu0 %2303 }
 0x82b   : > { %v2305_v11 = vmin.f32 %v2304_v54, 3.0 }
 0x849   : > { %v3794_v49 = vpop.f32.mrb[68].mxu0 }
 0x84a   : > { %vm3801_vm13 = vcmp.lt.f32.partialorder %v3794_v49, 2.0  ;;  %v3796_v60 = vpop.f32.mrb[69].mxu0 }
 0x84b   : > { %v4790_v1 = vsel %vm3801_vm13, 1.0, %v5466_v50  ;;  %vm3802_vm9 = vcmp.lt.f32.partialorder %v3796_v60, 2.0  ;;  %v3798_v53 = vpop.f32.mrb[70].mxu0 }
 0x84c   : > { %v4791_v42 = vsel %vm3802_vm9, 1.0, %v5466_v50  ;;  %v3799_v59 = vpop.f32.mrb[71].mxu0 }
 0x84d   : > { %v3809_v47 = vcombine.low %v4790_v1, %v4791_v42 }
 0x84f   : > { %v3816_v13 = vrot.slane %v3809_v47, %v7883_v57 }
 0x851   : > { %v3823_v27 = vrot.slane %v3816_v13, %v7883_v57 }
 0x853   : > { %v3825_v16 = vmul.f32 %v8739_v25, %v3823_v27 }
 0x855   : > { %v3871_v4 = vrot.slane %v3825_v16, %v9859_v15  ;;  %v3875_v52 = vrot.slane %v3825_v16, %v9860_v24 }
 0x870   : > { %v2737_v34 = vpop.f32.mrb[64].mxu1 }
 0x871   : > { %vm2744_vm11 = vcmp.lt.f32.partialorder %v2737_v34, %v2305_v11  ;;  %v2739_v31 = vpop.f32.mrb[65].mxu1 }
 0x872   : > { %v4641_v8 = vsel %vm2744_vm11, 1.0, %v5466_v50  ;;  %vm2745_vm7 = vcmp.lt.f32.partialorder %v2739_v31, %v2305_v11  ;;  %v2741_v30 = vpop.f32.mrb[66].mxu1 }
 0x873   : > { %v2750_v9 = vmul.f32 %v4641_v8, %v8748_v12  ;;  %v4642_v26 = vsel %vm2745_vm7, 1.0, %v5466_v50  ;;  %v2742_v21 = vpop.f32.mrb[67].mxu1  ;;  %v547_v12 = vpop.xlane.xlu1 %546 }
 0x874   : > { %v2751_v20 = vmul.f32 %v4642_v26, %v8752_v23  ;;  %v567_v23 = vcvt.f32.s32 %v8789_v37  ;;  %v548_v43 = vcvt.f32.s32 %v547_v12 }
 0x875   : > { %v3862_v58 = vrot.slane %v2750_v9, %v9859_v15 }
 0x876   : > { %v3866_v25 = vrot.slane %v2751_v20, %v9859_v15  ;;  %v568_v38 = vshll.u32 %v567_v23, 16  ;;  %v551_v17 = vadd.s32 %v550_v62, %v548_v43 }
 0x877   : > { %v3878_v61 = vsel %vm3858_vm3, %v3862_v58, %v3871_v4  ;;  %v565_v35 = vpop.xlane.xlu1 %564 }
 0x878   : > { %v3879_v46 = vsel %vm3858_vm3, %v3866_v25, %v3875_v52  ;;  %v3880_v14 = vpack.c.bf16 %v3878_v61, %v3878_v61  ;;  %v566_v41 = vcvt.f32.s32 %v565_v35 }
 0x879   : > { %v3881_v2 = vpack.c.bf16 %v3879_v46, %v3879_v46 }
 0x87a   : > { %v569_v15 = vadd.s32 %v568_v38, %v566_v41 }
 0x87b   : > { %4074 = vmatprep.mubr.bf16.mxu1 %v3881_v2 }
 0x87c   : > { %4075 = vmatmul.mubr.bf16.vlgmr.msra.gmra.mrb[68].mxu1 %v3880_v14  ;;  %vm570_vm4 = vcmp.eq.s32.totalorder %v551_v17, %v569_v15 }
 0x94f   : > { %v4076_v36 = vpop.f32.mrb[68].mxu1 }
 0x950   : > { %vm4083_vm5 = vcmp.gt.f32.partialorder %v4076_v36, 0.5  ;;  %v4078_v24 = vpop.f32.mrb[69].mxu1 }
 0x951   : > { %v4824_v44 = vsel %vm4083_vm5, 1.0, %v5466_v50  ;;  %vm4084_vm1 = vcmp.gt.f32.partialorder %v4078_v24, 0.5  ;;  %v4080_v0 = vpop.f32.mrb[70].mxu1 }
 0x952   : > { %v4091_v56 = vsel %vm570_vm4, 0.0, %v4824_v44  ;;  %v4095_v29 = vrot.slane %v4824_v44, 1  ;;  %v4825_v37 = vsel %vm4084_vm1, 1.0, %v5466_v50  ;;  %v4081_v10 = vpop.f32.mrb[71].mxu1 }
 0x953   : > { %v4092_v33 = vsel %vm570_vm4, 0.0, %v4825_v37  ;;  %v4096_v32 = vrot.slane %v4825_v37, 1 }
 0x954   : > { %v4099_v7 = vsel %vm570_vm4, 0.0, %v4095_v29 }
 0x955   : > { %v4101_v48 = vadd.f32 %v4099_v7, %v4091_v56  ;;  %v4100_v63 = vsel %vm570_vm4, 0.0, %v4096_v32 }
 0x956   : > { %v4102_v40 = vadd.f32 %v4100_v63, %v4092_v33 }
 0x957   : > { %vm4103_vm15 = vcmp.gt.f32.partialorder %v4101_v48, 1.5 }
 0x958   : > { %v4105_v18 = vsel %vm4103_vm15, 0.0, %v4091_v56  ;;  %v4107_v39 = vsel %vm4103_vm15, 0.0, %v4099_v7  ;;  %vm4104_vm8 = vcmp.gt.f32.partialorder %v4102_v40, 1.5 }
 0x959   : > { %vm4109_vm6 = vcmp.gt.f32.partialorder %v4105_v18, 0.5  ;;  %vm4113_vm2 = vcmp.gt.f32.partialorder %v4107_v39, 0.5  ;;  %v4106_v45 = vsel %vm4104_vm8, 0.0, %v4092_v33  ;;  %v4108_v5 = vsel %vm4104_vm8, 0.0, %v4100_v63 }
 0x95a   : > { %v4111_v50 = vsel %vm4109_vm6, 1, %v5469_v22  ;;  %vm4110_vm0 = vcmp.gt.f32.partialorder %v4106_v45, 0.5  ;;  %vm4114_vm14 = vcmp.gt.f32.partialorder %v4108_v5, 0.5 }
 0x95b   : > { %v4115_v6 = vsel %vm4113_vm2, 0, %v4111_v50  ;;  %v4112_v51 = vsel %vm4110_vm0, 1, %v5469_v22 }
 0x95c   : > { %v4116_v55 = vsel %vm4114_vm14, 0, %v4112_v51 }
 0x95d   : > { %v4117_v28 = vcombine.low %v4115_v6, %v4116_v55 }
 0x95f   : > { %v4124_v49 = vrot.slane %v4117_v28, %v7883_v57 }
 0x961   : > { %v4131_v60 = vrot.slane %v4124_v49, %v7883_v57 }
 0x963   : > { %4136 = vst.msk [vmem:[%s394_s21] sm:$0x3] %vm4134_vm12, %v4131_v60 }
 0x964   : > { %5411 = shalt.err (!%p5408_p3)
}
 0x965   : > { %s5412_s23 = scalar_lea.hbm %s8894_s25, 32  ;;  %s5416_s21 = scalar_lea.hbm %s8945_s9, 64 }
 0x966   : > { %p5413_p4 = scmp.ne.s32.totalorder %s8894_s25, %s5412_s23  ;;  %p5417_p9 = scmp.lt.u32.totalorder %s8894_s25, %s8945_s9 }
 0x967   : > { %p5418_p10 = scmp.lt.u32.totalorder %s5416_s21, %s5412_s23  ;;  %p5420_p12 = scmp.lt.u32.totalorder %s5412_s23, %s8894_s25 }
 0x968   : > { %p5414_p7 = pnand %p5413_p4, %p5559_p5 }
 0x969   : > { %p5419_p11 = por %p5418_p10, %p5417_p9 }
 0x96a   : > { %p5415_p8 = pneg %p5414_p7 }
 0x96b   : > { %p5421_p13 = por %p5420_p12, %p5419_p11 }
 0x96d   : > { %p5422_p0 = pnand %p5421_p13, %p5415_p8 }
 0x96f   : > { %5425 = shalt.err (!%p5422_p0)
}
 0x970   : > { %5125 = dma.vmem_to_hbm [thread:$0]  (%p5559_p5), %s8896_s24, 32, %s8894_s25, %s4138_s13  }
 0x971 PF: > { %p5131_p1 = scmp.ge.s32.totalorder %s5460_s12, 2  ;;  %s4164_s28 = sand.u32 1, %s5448_s30  }
 0x972   : > { %s4165_s27 = scalar_lea.sflag [#allocation3], %s4164_s28 }
 0x973   : > { %p5128_p2 = pnand %p5131_p1, %p5563_p6 }
 0x975   : > { %5443 = dma.done.wait (!%p5128_p2), %s4165_s27, 32  }
 0x976   : > { %5445 = vsyncadd (!%p5128_p2), %s4165_s27, 4294967264  ;;  %p19_p3 = scmp.ge.s32.totalorder %s5546_s15, 4   ;;  %s9872_s30 = smov %s5452_s10 }
 0x977   : > { %s9873_s10 = smov %s5456_s11  ;;  %s9874_s11 = smov %s5557_s18 }
 0x978   : > { %s9875_s12 = smov %s5546_s15  ;;  %21 = sbr.rel (!%p19_p3) target bundleno = 3 (0x3), region = 106 }
 0x97f   :  { %4170 = vsyncpa [#allocation3], 1 }
 0x980   :  { %4172 = vsyncpa [#allocation3 + $0x1], 1 }

</bundles_post_ra>
